<compile_context>
chip_gen: v7x
topology: tpu7x:2x2x1
jax: 0.10.0
libtpu: 0.0.40
codegen_flags: <defaults>
</compile_context>

<pallas_src>
import numpy as np

import jax
import jax.numpy as jnp
from jax.experimental import pallas as pl
from jax.experimental.pallas import tpu as pltpu

EPS = 1e-8

# Network geometry (28x28x1 input implied by fc in_features = 512*2*2 = 2048).
K1_RAW, K1P = 100, 128        # conv1 im2col features (1*10*10) -> lane-padded
C1 = 128                      # conv1 out channels
C2, C2P = 220, 256            # conv2 out channels -> lane-padded
C3 = 512                      # conv3 out channels
NCLS, NCLSP = 10, 128         # fc out -> lane-padded
OH1, OW1 = 4, 4               # (28-10)//6 + 1
OH2, OW2 = 3, 3
OH3, OW3 = 2, 2

TB = 16                       # images per grid step (amortizes per-step overhead,
                              # multiple of 8 sublanes / 16 bf16-packed rows)


# --------------------------- fused Pallas kernel -----------------------------

def _l2_normalize_rows(x):
    # x / (eps + ||x||_2 over lanes); padded zero lanes add 0 to the sum of squares.
    ss = jnp.sum(x * x, axis=-1, keepdims=True)
    return x * (1.0 / (EPS + jnp.sqrt(ss)))


def _fused_kernel(p1_ref, w1_ref, b1_ref, g2_ref, w2_ref, b2_ref,
                  g3_ref, w3_ref, b3_ref, wfc_ref, bfc_ref, out_ref):
    f32, bf16 = jnp.float32, jnp.bfloat16

    # prologue: input channel-normalize (C == 1  =>  x / (eps + |x|)), applied
    # elementwise on the im2col patches (equivalent; padded lanes stay 0).
    p1 = p1_ref[...]
    p1 = (p1 * (1.0 / (EPS + jnp.abs(p1)))).astype(bf16)             # (TB*16, 128)

    # layer1: Conv2d(1,128,10,6) as one im2col matmul + bias + ReLU, fused L2-norm.
    h1 = jnp.dot(p1, w1_ref[...], preferred_element_type=f32) + b1_ref[...]
    h1 = _l2_normalize_rows(jnp.maximum(h1, 0.0)).astype(bf16)       # (TB*16, 128)

    # layer2: Conv2d(128,220,2,1) as 4 shifted-tap matmuls; the spatial shift per tap
    # is a 0/1 gather matrix, block-diagonal over the TB images in the step, indexed
    # on a leading tap axis (no sub-tile slicing).  Gather values are exact copies of
    # h1 entries, so the bf16 re-cast of xt introduces no extra rounding.
    acc2 = b2_ref[...]
    for t in range(4):
        xt = jnp.dot(g2_ref[t], h1, preferred_element_type=f32).astype(bf16)   # (TB*9, 128)
        acc2 = acc2 + jnp.dot(xt, w2_ref[t], preferred_element_type=f32)
    h2 = _l2_normalize_rows(jnp.maximum(acc2, 0.0)).astype(bf16)     # (TB*9, 256)

    # layer3: Conv2d(220,512,2,1); gathers emit spatial-position-major rows
    # (row = p*TB + img) so the fc below slices sublane-aligned TB-row blocks.
    acc3 = b3_ref[...]
    for t in range(4):
        xt = jnp.dot(g3_ref[t], h2, preferred_element_type=f32).astype(bf16)   # (4*TB, 256)
        acc3 = acc3 + jnp.dot(xt, w3_ref[t], preferred_element_type=f32)
    h3 = jnp.maximum(acc3, 0.0).astype(bf16)                         # (4*TB, 512)

    # fc: Linear(2048, 10); torch NCHW flatten order folded into wfc row order,
    # one (TB, 512) x (512, 128) matmul per spatial position (M = TB, not 1).
    acc = bfc_ref[...]
    for p in range(OH3 * OW3):
        acc = acc + jnp.dot(h3[p * TB:(p + 1) * TB, :], wfc_ref[p],
                            preferred_element_type=f32)
    out_ref[...] = acc.astype(out_ref.dtype)


# --------------------------- plain-JAX layout glue ----------------------------

def im2col_nhwc(x, kh, kw, stride):
    """(B, H, W, C) -> (B, OH, OW, kh*kw*C) with (kh, kw, C) flattening order."""
    b, h, w, c = x.shape
    oh = (h - kh) // stride + 1
    ow = (w - kw) // stride + 1
    cols = []
    for i in range(kh):
        for j in range(kw):
            cols.append(jax.lax.slice(
                x, (0, i, j, 0),
                (b, i + (oh - 1) * stride + 1, j + (ow - 1) * stride + 1, c),
                (1, stride, stride, 1)))
    patches = jnp.stack(cols, axis=3)              # (B, OH, OW, kh*kw, C)
    return patches.reshape(b, oh, ow, kh * kw * c), oh, ow


def _conv_tap_gather(ih, iw, kh, kw, tb, p_major_out=False):
    """Per-tap 0/1 gather matrices, block-diagonal over a batch tile of `tb` images.

    G[t] has shape (tb*oh*ow, tb*ih*iw) with (stride 1, VALID)
      G[t][r, img*ih*iw + (oi+di)*iw + (oj+dj)] = 1,   t = di*kw + dj,
      r = img*oh*ow + (oi*ow + oj)        (batch-major rows), or
      r = (oi*ow + oj)*tb + img           (position-major rows, p_major_out=True).
    """
    oh, ow = ih - kh + 1, iw - kw + 1
    g = np.zeros((kh * kw, tb * oh * ow, tb * ih * iw), np.float32)
    for di in range(kh):
        for dj in range(kw):
            t = di * kw + dj
            for img in range(tb):
                for oi in range(oh):
                    for oj in range(ow):
                        p = oi * ow + oj
                        r = p * tb + img if p_major_out else img * oh * ow + p
                        c = img * ih * iw + (oi + di) * iw + (oj + dj)
                        g[t, r, c] = 1.0
    return jnp.asarray(g)


def init_params(key):
    ks = jax.random.split(key, 8)

    def uinit(k, shape, fan_in):
        bound = 1.0 / float(np.sqrt(fan_in))
        return jax.random.uniform(k, shape, jnp.float32, -bound, bound)

    # torch-convention parameters (also used by the pure-JAX reference).
    w1_t = uinit(ks[0], (C1, 1, 10, 10), 100)
    b1 = uinit(ks[1], (C1,), 100)
    w2_t = uinit(ks[2], (C2, C1, 2, 2), C1 * 4)
    b2 = uinit(ks[3], (C2,), C1 * 4)
    w3_t = uinit(ks[4], (C3, C2, 2, 2), C2 * 4)
    b3 = uinit(ks[5], (C3,), C2 * 4)
    wfc_t = uinit(ks[6], (NCLS, OH3 * OW3 * C3), OH3 * OW3 * C3)
    bfc = uinit(ks[7], (NCLS,), OH3 * OW3 * C3)

    bf16 = jnp.bfloat16

    # conv1: (128,1,10,10) -> (100,128) im2col layout, K padded 100->128 (zero rows).
    w1 = jnp.transpose(w1_t, (2, 3, 1, 0)).reshape(K1_RAW, C1)
    w1 = jnp.pad(w1, ((0, K1P - K1_RAW), (0, 0))).astype(bf16)

    # conv2: (220,128,2,2) -> per-tap (in, out) on a leading tap axis, out padded 220->256.
    w2 = jnp.transpose(w2_t, (2, 3, 1, 0)).reshape(4, C1, C2)
    w2 = jnp.pad(w2, ((0, 0), (0, 0), (0, C2P - C2))).astype(bf16)
    b2p = jnp.pad(b2, (0, C2P - C2))

    # conv3: (512,220,2,2) -> per-tap (in, out), in-channels padded 220->256 (zero rows).
    w3 = jnp.transpose(w3_t, (2, 3, 1, 0)).reshape(4, C2, C3)
    w3 = jnp.pad(w3, ((0, 0), (0, C2P - C2), (0, 0))).astype(bf16)

    # fc: fold the NCHW flatten (k = c*4 + p, p = h*2+w) into the weight layout
    # (4, 512, 10) indexed [p, c, n], and pad the 10 logits to 128 lanes.
    wfc = jnp.transpose(wfc_t.reshape(NCLS, C3, OH3 * OW3), (2, 1, 0))   # (4, 512, 10)
    wfc = jnp.pad(wfc, ((0, 0), (0, 0), (0, NCLSP - NCLS))).astype(bf16)
    bfcp = jnp.pad(bfc, (0, NCLSP - NCLS))

    params = {
        "w1": w1, "b1": b1.reshape(1, C1),
        "g2": _conv_tap_gather(OH1, OW1, 2, 2, TB).astype(bf16),             # (4, TB*9, TB*16)
        "w2": w2, "b2": b2p.reshape(1, C2P),
        "g3": _conv_tap_gather(OH2, OW2, 2, 2, TB, p_major_out=True).astype(bf16),  # (4, TB*4, TB*9)
        "w3": w3, "b3": b3.reshape(1, C3),
        "wfc": wfc, "bfc": bfcp.reshape(1, NCLSP),
    }
    ref_params = {"w1": w1_t, "b1": b1, "w2": w2_t, "b2": b2,
                  "w3": w3_t, "b3": b3, "wfc": wfc_t, "bfc": bfc}
    return params, ref_params


def forward(params, x_nchw):
    """x_nchw: (B, 1, 28, 28) float32 -> (B, 10) logits."""
    b = x_nchw.shape[0]
    bp = ((b + TB - 1) // TB) * TB          # pad batch to a multiple of the image tile
    steps = bp // TB

    x = jnp.transpose(x_nchw, (0, 2, 3, 1))                       # NHWC
    p, oh, ow = im2col_nhwc(x, 10, 10, 6)                         # (B, 4, 4, 100)
    p = p.reshape(b * oh * ow, K1_RAW)
    p = jnp.pad(p, ((0, (bp - b) * oh * ow), (0, K1P - K1_RAW)))  # (bp*16, 128) f32

    c2 = lambda i: (0, 0)
    c3 = lambda i: (0, 0, 0)

    # Advisory cost estimate (helps XLA schedule the surrounding layout glue).
    flops = 2 * steps * (
        (TB * OH1 * OW1) * K1P * C1
        + 4 * ((TB * OH2 * OW2) * (TB * OH1 * OW1) * C1 + (TB * OH2 * OW2) * C1 * C2P)
        + 4 * ((TB * OH3 * OW3) * (TB * OH2 * OW2) * C2P + (TB * OH3 * OW3) * C2P * C3)
        + (OH3 * OW3) * TB * C3 * NCLSP)
    weight_bytes = sum(int(v.size) * v.dtype.itemsize for v in params.values())
    cost = pl.CostEstimate(
        flops=int(flops),
        transcendentals=int(steps * TB * (OH1 * OW1 + OH2 * OW2)),
        bytes_accessed=int(weight_bytes + p.size * 4 + bp * NCLSP * 4))

    out = pl.pallas_call(
        _fused_kernel,
        out_shape=jax.ShapeDtypeStruct((bp, NCLSP), jnp.float32),
        grid=(steps,),
        in_specs=[
            pl.BlockSpec((TB * OH1 * OW1, K1P), lambda i: (i, 0)),    # per-step patches
            pl.BlockSpec((K1P, C1), c2),                              # w1
            pl.BlockSpec((1, C1), c2),                                # b1
            pl.BlockSpec((4, TB * OH2 * OW2, TB * OH1 * OW1), c3),    # g2
            pl.BlockSpec((4, C1, C2P), c3),                           # w2
            pl.BlockSpec((1, C2P), c2),                               # b2
            pl.BlockSpec((4, TB * OH3 * OW3, TB * OH2 * OW2), c3),    # g3
            pl.BlockSpec((4, C2P, C3), c3),                           # w3
            pl.BlockSpec((1, C3), c2),                                # b3
            pl.BlockSpec((OH3 * OW3, C3, NCLSP), c3),                 # wfc
            pl.BlockSpec((1, NCLSP), c2),                             # bfc
        ],
        out_specs=pl.BlockSpec((TB, NCLSP), lambda i: (i, 0)),
        compiler_params=pltpu.CompilerParams(
            dimension_semantics=("parallel",),
            vmem_limit_bytes=32 * 1024 * 1024,
        ),
        cost_estimate=cost,
    )(p, params["w1"], params["b1"], params["g2"], params["w2"], params["b2"],
      params["g3"], params["w3"], params["b3"], params["wfc"], params["bfc"])

    return out[:b, :NCLS]


# --------------------------- pure-JAX reference -------------------------------

def reference_forward(tp, x):
    def normalize(h):
        return h / (EPS + jnp.linalg.norm(h, axis=1, keepdims=True))

    dn = ("NCHW", "OIHW", "NCHW")
    h = normalize(x)
    h = jax.lax.conv_general_dilated(h, tp["w1"], (6, 6), "VALID", dimension_numbers=dn)
    h = jax.nn.relu(h + tp["b1"].reshape(1, -1, 1, 1))
    h = normalize(h)
    h = jax.lax.conv_general_dilated(h, tp["w2"], (1, 1), "VALID", dimension_numbers=dn)
    h = jax.nn.relu(h + tp["b2"].reshape(1, -1, 1, 1))
    h = normalize(h)
    h = jax.lax.conv_general_dilated(h, tp["w3"], (1, 1), "VALID", dimension_numbers=dn)
    h = jax.nn.relu(h + tp["b3"].reshape(1, -1, 1, 1))
    h = h.reshape(h.shape[0], -1)                                # torch NCHW flatten
    return h @ tp["wfc"].T + tp["bfc"]


if __name__ == "__main__":
    key = jax.random.PRNGKey(0)
    pkey, xkey = jax.random.split(key)
    params, ref_params = init_params(pkey)
    # batch=2, single-channel 28x28 input (required by fc input size 512*2*2 = 2048)
    x = jax.random.normal(xkey, (2, 1, 28, 28), jnp.float32)

    out = jax.block_until_ready(jax.jit(forward)(params, x))
    assert out.shape == (2, 10) and out.dtype == jnp.float32
    assert bool(jnp.all(jnp.isfinite(out)))

    ref = jax.jit(reference_forward)(ref_params, x)
    np.testing.assert_allclose(np.asarray(out), np.asarray(ref), rtol=5e-2, atol=5e-3)

    print("KERNEL_OK")
</pallas_src>

<mosaic_0001>
module attributes {stable_mosaic.version = 11 : i64} {
  func.func @_fused_kernel(%arg0: i32, %arg1: memref<256x128xf32, #tpu.memory_space<vmem>>, %arg2: memref<128x128xbf16, #tpu.memory_space<vmem>>, %arg3: memref<1x128xf32, #tpu.memory_space<vmem>>, %arg4: memref<4x144x256xbf16, #tpu.memory_space<vmem>>, %arg5: memref<4x128x256xbf16, #tpu.memory_space<vmem>>, %arg6: memref<1x256xf32, #tpu.memory_space<vmem>>, %arg7: memref<4x64x144xbf16, #tpu.memory_space<vmem>>, %arg8: memref<4x256x512xbf16, #tpu.memory_space<vmem>>, %arg9: memref<1x512xf32, #tpu.memory_space<vmem>>, %arg10: memref<4x512x128xbf16, #tpu.memory_space<vmem>>, %arg11: memref<1x128xf32, #tpu.memory_space<vmem>>, %arg12: memref<16x128xf32, #tpu.memory_space<vmem>>) attributes {dimension_semantics = [#tpu.dimension_semantics<parallel>], iteration_bounds = array<i64: 1>, scalar_prefetch = 0 : i64, scratch_operands = 0 : i64, tpu.core_type = #tpu.core_type<tc>, window_params = [{transform_indices = @transform_0, window_bounds = array<i64: 256, 128>}, {pipeline_mode = #tpu.pipeline_mode<synchronous>, transform_indices = @transform_1, window_bounds = array<i64: 128, 128>}, {pipeline_mode = #tpu.pipeline_mode<synchronous>, transform_indices = @transform_2, window_bounds = array<i64: 1, 128>}, {pipeline_mode = #tpu.pipeline_mode<synchronous>, transform_indices = @transform_3, window_bounds = array<i64: 4, 144, 256>}, {pipeline_mode = #tpu.pipeline_mode<synchronous>, transform_indices = @transform_4, window_bounds = array<i64: 4, 128, 256>}, {pipeline_mode = #tpu.pipeline_mode<synchronous>, transform_indices = @transform_5, window_bounds = array<i64: 1, 256>}, {pipeline_mode = #tpu.pipeline_mode<synchronous>, transform_indices = @transform_6, window_bounds = array<i64: 4, 64, 144>}, {pipeline_mode = #tpu.pipeline_mode<synchronous>, transform_indices = @transform_7, window_bounds = array<i64: 4, 256, 512>}, {pipeline_mode = #tpu.pipeline_mode<synchronous>, transform_indices = @transform_8, window_bounds = array<i64: 1, 512>}, {pipeline_mode = #tpu.pipeline_mode<synchronous>, transform_indices = @transform_9, window_bounds = array<i64: 4, 512, 128>}, {pipeline_mode = #tpu.pipeline_mode<synchronous>, transform_indices = @transform_10, window_bounds = array<i64: 1, 128>}, {transform_indices = @transform_11, window_bounds = array<i64: 16, 128>}]} {
    %c0 = arith.constant 0 : index
    %c0_0 = arith.constant 0 : index
    %0 = vector.load %arg1[%c0, %c0_0] : memref<256x128xf32, #tpu.memory_space<vmem>>, vector<256x128xf32>
    %1 = math.absf %0 : vector<256x128xf32>
    %cst = arith.constant 9.99999993E-9 : f32
    %2 = vector.broadcast %cst : f32 to vector<256x128xf32>
    %3 = arith.addf %2, %1 : vector<256x128xf32>
    %cst_1 = arith.constant 1.000000e+00 : f32
    %4 = vector.broadcast %cst_1 : f32 to vector<256x128xf32>
    %5 = arith.divf %4, %3 : vector<256x128xf32>
    %6 = arith.mulf %0, %5 : vector<256x128xf32>
    %7 = arith.truncf %6 : vector<256x128xf32> to vector<256x128xbf16>
    %c0_2 = arith.constant 0 : index
    %c0_3 = arith.constant 0 : index
    %8 = vector.load %arg2[%c0_2, %c0_3] : memref<128x128xbf16, #tpu.memory_space<vmem>>, vector<128x128xbf16>
    %cst_4 = arith.constant dense<0.000000e+00> : vector<256x128xf32>
    %9 = tpu.matmul %7, %8, %cst_4 {dimension_numbers = #tpu.dot_dimension_numbers<[1], [0], [0], [1], [0, 0, 1, 1], [], []>} : vector<256x128xbf16>, vector<128x128xbf16>, vector<256x128xf32> -> vector<256x128xf32>
    %c0_5 = arith.constant 0 : index
    %c0_6 = arith.constant 0 : index
    %10 = vector.load %arg3[%c0_5, %c0_6] : memref<1x128xf32, #tpu.memory_space<vmem>>, vector<1x128xf32>
    %11 = vector.broadcast %10 : vector<1x128xf32> to vector<256x128xf32>
    %12 = arith.addf %9, %11 : vector<256x128xf32>
    %cst_7 = arith.constant 0.000000e+00 : f32
    %13 = vector.broadcast %cst_7 : f32 to vector<256x128xf32>
    %14 = arith.maximumf %12, %13 : vector<256x128xf32>
    %15 = arith.mulf %14, %14 : vector<256x128xf32>
    %cst_8 = arith.constant dense<0.000000e+00> : vector<256xf32>
    %16 = vector.multi_reduction <add>, %15, %cst_8 [1] : vector<256x128xf32> to vector<256xf32>
    %17 = vector.shape_cast %16 : vector<256xf32> to vector<256x1xf32>
    %18 = math.sqrt %17 : vector<256x1xf32>
    %cst_9 = arith.constant 9.99999993E-9 : f32
    %19 = vector.broadcast %cst_9 : f32 to vector<256x1xf32>
    %20 = arith.addf %19, %18 : vector<256x1xf32>
    %cst_10 = arith.constant 1.000000e+00 : f32
    %21 = vector.broadcast %cst_10 : f32 to vector<256x1xf32>
    %22 = arith.divf %21, %20 : vector<256x1xf32>
    %23 = vector.broadcast %22 : vector<256x1xf32> to vector<256x128xf32>
    %24 = arith.mulf %14, %23 : vector<256x128xf32>
    %25 = arith.truncf %24 : vector<256x128xf32> to vector<256x128xbf16>
    %c0_11 = arith.constant 0 : index
    %c0_12 = arith.constant 0 : index
    %26 = vector.load %arg6[%c0_11, %c0_12] : memref<1x256xf32, #tpu.memory_space<vmem>>, vector<1x256xf32>
    %c0_13 = arith.constant 0 : index
    %c0_14 = arith.constant 0 : index
    %c0_15 = arith.constant 0 : index
    %27 = vector.load %arg4[%c0_13, %c0_14, %c0_15] : memref<4x144x256xbf16, #tpu.memory_space<vmem>>, vector<1x144x256xbf16>
    %28 = vector.shape_cast %27 : vector<1x144x256xbf16> to vector<144x256xbf16>
    %cst_16 = arith.constant dense<0.000000e+00> : vector<144x128xf32>
    %29 = tpu.matmul %28, %25, %cst_16 {dimension_numbers = #tpu.dot_dimension_numbers<[1], [0], [0], [1], [0, 0, 1, 1], [], []>} : vector<144x256xbf16>, vector<256x128xbf16>, vector<144x128xf32> -> vector<144x128xf32>
    %30 = arith.truncf %29 : vector<144x128xf32> to vector<144x128xbf16>
    %c0_17 = arith.constant 0 : index
    %c0_18 = arith.constant 0 : index
    %c0_19 = arith.constant 0 : index
    %31 = vector.load %arg5[%c0_17, %c0_18, %c0_19] : memref<4x128x256xbf16, #tpu.memory_space<vmem>>, vector<1x128x256xbf16>
    %32 = vector.shape_cast %31 : vector<1x128x256xbf16> to vector<128x256xbf16>
    %cst_20 = arith.constant dense<0.000000e+00> : vector<144x256xf32>
    %33 = tpu.matmul %30, %32, %cst_20 {dimension_numbers = #tpu.dot_dimension_numbers<[1], [0], [0], [1], [0, 0, 1, 1], [], []>} : vector<144x128xbf16>, vector<128x256xbf16>, vector<144x256xf32> -> vector<144x256xf32>
    %34 = vector.broadcast %26 : vector<1x256xf32> to vector<144x256xf32>
    %35 = arith.addf %34, %33 : vector<144x256xf32>
    %c1 = arith.constant 1 : index
    %c0_21 = arith.constant 0 : index
    %c0_22 = arith.constant 0 : index
    %36 = vector.load %arg4[%c1, %c0_21, %c0_22] : memref<4x144x256xbf16, #tpu.memory_space<vmem>>, vector<1x144x256xbf16>
    %37 = vector.shape_cast %36 : vector<1x144x256xbf16> to vector<144x256xbf16>
    %cst_23 = arith.constant dense<0.000000e+00> : vector<144x128xf32>
    %38 = tpu.matmul %37, %25, %cst_23 {dimension_numbers = #tpu.dot_dimension_numbers<[1], [0], [0], [1], [0, 0, 1, 1], [], []>} : vector<144x256xbf16>, vector<256x128xbf16>, vector<144x128xf32> -> vector<144x128xf32>
    %39 = arith.truncf %38 : vector<144x128xf32> to vector<144x128xbf16>
    %c1_24 = arith.constant 1 : index
    %c0_25 = arith.constant 0 : index
    %c0_26 = arith.constant 0 : index
    %40 = vector.load %arg5[%c1_24, %c0_25, %c0_26] : memref<4x128x256xbf16, #tpu.memory_space<vmem>>, vector<1x128x256xbf16>
    %41 = vector.shape_cast %40 : vector<1x128x256xbf16> to vector<128x256xbf16>
    %cst_27 = arith.constant dense<0.000000e+00> : vector<144x256xf32>
    %42 = tpu.matmul %39, %41, %cst_27 {dimension_numbers = #tpu.dot_dimension_numbers<[1], [0], [0], [1], [0, 0, 1, 1], [], []>} : vector<144x128xbf16>, vector<128x256xbf16>, vector<144x256xf32> -> vector<144x256xf32>
    %43 = arith.addf %35, %42 : vector<144x256xf32>
    %c2 = arith.constant 2 : index
    %c0_28 = arith.constant 0 : index
    %c0_29 = arith.constant 0 : index
    %44 = vector.load %arg4[%c2, %c0_28, %c0_29] : memref<4x144x256xbf16, #tpu.memory_space<vmem>>, vector<1x144x256xbf16>
    %45 = vector.shape_cast %44 : vector<1x144x256xbf16> to vector<144x256xbf16>
    %cst_30 = arith.constant dense<0.000000e+00> : vector<144x128xf32>
    %46 = tpu.matmul %45, %25, %cst_30 {dimension_numbers = #tpu.dot_dimension_numbers<[1], [0], [0], [1], [0, 0, 1, 1], [], []>} : vector<144x256xbf16>, vector<256x128xbf16>, vector<144x128xf32> -> vector<144x128xf32>
    %47 = arith.truncf %46 : vector<144x128xf32> to vector<144x128xbf16>
    %c2_31 = arith.constant 2 : index
    %c0_32 = arith.constant 0 : index
    %c0_33 = arith.constant 0 : index
    %48 = vector.load %arg5[%c2_31, %c0_32, %c0_33] : memref<4x128x256xbf16, #tpu.memory_space<vmem>>, vector<1x128x256xbf16>
    %49 = vector.shape_cast %48 : vector<1x128x256xbf16> to vector<128x256xbf16>
    %cst_34 = arith.constant dense<0.000000e+00> : vector<144x256xf32>
    %50 = tpu.matmul %47, %49, %cst_34 {dimension_numbers = #tpu.dot_dimension_numbers<[1], [0], [0], [1], [0, 0, 1, 1], [], []>} : vector<144x128xbf16>, vector<128x256xbf16>, vector<144x256xf32> -> vector<144x256xf32>
    %51 = arith.addf %43, %50 : vector<144x256xf32>
    %c3 = arith.constant 3 : index
    %c0_35 = arith.constant 0 : index
    %c0_36 = arith.constant 0 : index
    %52 = vector.load %arg4[%c3, %c0_35, %c0_36] : memref<4x144x256xbf16, #tpu.memory_space<vmem>>, vector<1x144x256xbf16>
    %53 = vector.shape_cast %52 : vector<1x144x256xbf16> to vector<144x256xbf16>
    %cst_37 = arith.constant dense<0.000000e+00> : vector<144x128xf32>
    %54 = tpu.matmul %53, %25, %cst_37 {dimension_numbers = #tpu.dot_dimension_numbers<[1], [0], [0], [1], [0, 0, 1, 1], [], []>} : vector<144x256xbf16>, vector<256x128xbf16>, vector<144x128xf32> -> vector<144x128xf32>
    %55 = arith.truncf %54 : vector<144x128xf32> to vector<144x128xbf16>
    %c3_38 = arith.constant 3 : index
    %c0_39 = arith.constant 0 : index
    %c0_40 = arith.constant 0 : index
    %56 = vector.load %arg5[%c3_38, %c0_39, %c0_40] : memref<4x128x256xbf16, #tpu.memory_space<vmem>>, vector<1x128x256xbf16>
    %57 = vector.shape_cast %56 : vector<1x128x256xbf16> to vector<128x256xbf16>
    %cst_41 = arith.constant dense<0.000000e+00> : vector<144x256xf32>
    %58 = tpu.matmul %55, %57, %cst_41 {dimension_numbers = #tpu.dot_dimension_numbers<[1], [0], [0], [1], [0, 0, 1, 1], [], []>} : vector<144x128xbf16>, vector<128x256xbf16>, vector<144x256xf32> -> vector<144x256xf32>
    %59 = arith.addf %51, %58 : vector<144x256xf32>
    %cst_42 = arith.constant 0.000000e+00 : f32
    %60 = vector.broadcast %cst_42 : f32 to vector<144x256xf32>
    %61 = arith.maximumf %59, %60 : vector<144x256xf32>
    %62 = arith.mulf %61, %61 : vector<144x256xf32>
    %cst_43 = arith.constant dense<0.000000e+00> : vector<144xf32>
    %63 = vector.multi_reduction <add>, %62, %cst_43 [1] : vector<144x256xf32> to vector<144xf32>
    %64 = vector.shape_cast %63 : vector<144xf32> to vector<144x1xf32>
    %65 = math.sqrt %64 : vector<144x1xf32>
    %cst_44 = arith.constant 9.99999993E-9 : f32
    %66 = vector.broadcast %cst_44 : f32 to vector<144x1xf32>
    %67 = arith.addf %66, %65 : vector<144x1xf32>
    %cst_45 = arith.constant 1.000000e+00 : f32
    %68 = vector.broadcast %cst_45 : f32 to vector<144x1xf32>
    %69 = arith.divf %68, %67 : vector<144x1xf32>
    %70 = vector.broadcast %69 : vector<144x1xf32> to vector<144x256xf32>
    %71 = arith.mulf %61, %70 : vector<144x256xf32>
    %72 = arith.truncf %71 : vector<144x256xf32> to vector<144x256xbf16>
    %c0_46 = arith.constant 0 : index
    %c0_47 = arith.constant 0 : index
    %73 = vector.load %arg9[%c0_46, %c0_47] : memref<1x512xf32, #tpu.memory_space<vmem>>, vector<1x512xf32>
    %c0_48 = arith.constant 0 : index
    %c0_49 = arith.constant 0 : index
    %c0_50 = arith.constant 0 : index
    %74 = vector.load %arg7[%c0_48, %c0_49, %c0_50] : memref<4x64x144xbf16, #tpu.memory_space<vmem>>, vector<1x64x144xbf16>
    %75 = vector.shape_cast %74 : vector<1x64x144xbf16> to vector<64x144xbf16>
    %cst_51 = arith.constant dense<0.000000e+00> : vector<64x256xf32>
    %76 = tpu.matmul %75, %72, %cst_51 {dimension_numbers = #tpu.dot_dimension_numbers<[1], [0], [0], [1], [0, 0, 1, 1], [], []>} : vector<64x144xbf16>, vector<144x256xbf16>, vector<64x256xf32> -> vector<64x256xf32>
    %77 = arith.truncf %76 : vector<64x256xf32> to vector<64x256xbf16>
    %c0_52 = arith.constant 0 : index
    %c0_53 = arith.constant 0 : index
    %c0_54 = arith.constant 0 : index
    %78 = vector.load %arg8[%c0_52, %c0_53, %c0_54] : memref<4x256x512xbf16, #tpu.memory_space<vmem>>, vector<1x256x512xbf16>
    %79 = vector.shape_cast %78 : vector<1x256x512xbf16> to vector<256x512xbf16>
    %cst_55 = arith.constant dense<0.000000e+00> : vector<64x512xf32>
    %80 = tpu.matmul %77, %79, %cst_55 {dimension_numbers = #tpu.dot_dimension_numbers<[1], [0], [0], [1], [0, 0, 1, 1], [], []>} : vector<64x256xbf16>, vector<256x512xbf16>, vector<64x512xf32> -> vector<64x512xf32>
    %81 = vector.broadcast %73 : vector<1x512xf32> to vector<64x512xf32>
    %82 = arith.addf %81, %80 : vector<64x512xf32>
    %c1_56 = arith.constant 1 : index
    %c0_57 = arith.constant 0 : index
    %c0_58 = arith.constant 0 : index
    %83 = vector.load %arg7[%c1_56, %c0_57, %c0_58] : memref<4x64x144xbf16, #tpu.memory_space<vmem>>, vector<1x64x144xbf16>
    %84 = vector.shape_cast %83 : vector<1x64x144xbf16> to vector<64x144xbf16>
    %cst_59 = arith.constant dense<0.000000e+00> : vector<64x256xf32>
    %85 = tpu.matmul %84, %72, %cst_59 {dimension_numbers = #tpu.dot_dimension_numbers<[1], [0], [0], [1], [0, 0, 1, 1], [], []>} : vector<64x144xbf16>, vector<144x256xbf16>, vector<64x256xf32> -> vector<64x256xf32>
    %86 = arith.truncf %85 : vector<64x256xf32> to vector<64x256xbf16>
    %c1_60 = arith.constant 1 : index
    %c0_61 = arith.constant 0 : index
    %c0_62 = arith.constant 0 : index
    %87 = vector.load %arg8[%c1_60, %c0_61, %c0_62] : memref<4x256x512xbf16, #tpu.memory_space<vmem>>, vector<1x256x512xbf16>
    %88 = vector.shape_cast %87 : vector<1x256x512xbf16> to vector<256x512xbf16>
    %cst_63 = arith.constant dense<0.000000e+00> : vector<64x512xf32>
    %89 = tpu.matmul %86, %88, %cst_63 {dimension_numbers = #tpu.dot_dimension_numbers<[1], [0], [0], [1], [0, 0, 1, 1], [], []>} : vector<64x256xbf16>, vector<256x512xbf16>, vector<64x512xf32> -> vector<64x512xf32>
    %90 = arith.addf %82, %89 : vector<64x512xf32>
    %c2_64 = arith.constant 2 : index
    %c0_65 = arith.constant 0 : index
    %c0_66 = arith.constant 0 : index
    %91 = vector.load %arg7[%c2_64, %c0_65, %c0_66] : memref<4x64x144xbf16, #tpu.memory_space<vmem>>, vector<1x64x144xbf16>
    %92 = vector.shape_cast %91 : vector<1x64x144xbf16> to vector<64x144xbf16>
    %cst_67 = arith.constant dense<0.000000e+00> : vector<64x256xf32>
    %93 = tpu.matmul %92, %72, %cst_67 {dimension_numbers = #tpu.dot_dimension_numbers<[1], [0], [0], [1], [0, 0, 1, 1], [], []>} : vector<64x144xbf16>, vector<144x256xbf16>, vector<64x256xf32> -> vector<64x256xf32>
    %94 = arith.truncf %93 : vector<64x256xf32> to vector<64x256xbf16>
    %c2_68 = arith.constant 2 : index
    %c0_69 = arith.constant 0 : index
    %c0_70 = arith.constant 0 : index
    %95 = vector.load %arg8[%c2_68, %c0_69, %c0_70] : memref<4x256x512xbf16, #tpu.memory_space<vmem>>, vector<1x256x512xbf16>
    %96 = vector.shape_cast %95 : vector<1x256x512xbf16> to vector<256x512xbf16>
    %cst_71 = arith.constant dense<0.000000e+00> : vector<64x512xf32>
    %97 = tpu.matmul %94, %96, %cst_71 {dimension_numbers = #tpu.dot_dimension_numbers<[1], [0], [0], [1], [0, 0, 1, 1], [], []>} : vector<64x256xbf16>, vector<256x512xbf16>, vector<64x512xf32> -> vector<64x512xf32>
    %98 = arith.addf %90, %97 : vector<64x512xf32>
    %c3_72 = arith.constant 3 : index
    %c0_73 = arith.constant 0 : index
    %c0_74 = arith.constant 0 : index
    %99 = vector.load %arg7[%c3_72, %c0_73, %c0_74] : memref<4x64x144xbf16, #tpu.memory_space<vmem>>, vector<1x64x144xbf16>
    %100 = vector.shape_cast %99 : vector<1x64x144xbf16> to vector<64x144xbf16>
    %cst_75 = arith.constant dense<0.000000e+00> : vector<64x256xf32>
    %101 = tpu.matmul %100, %72, %cst_75 {dimension_numbers = #tpu.dot_dimension_numbers<[1], [0], [0], [1], [0, 0, 1, 1], [], []>} : vector<64x144xbf16>, vector<144x256xbf16>, vector<64x256xf32> -> vector<64x256xf32>
    %102 = arith.truncf %101 : vector<64x256xf32> to vector<64x256xbf16>
    %c3_76 = arith.constant 3 : index
    %c0_77 = arith.constant 0 : index
    %c0_78 = arith.constant 0 : index
    %103 = vector.load %arg8[%c3_76, %c0_77, %c0_78] : memref<4x256x512xbf16, #tpu.memory_space<vmem>>, vector<1x256x512xbf16>
    %104 = vector.shape_cast %103 : vector<1x256x512xbf16> to vector<256x512xbf16>
    %cst_79 = arith.constant dense<0.000000e+00> : vector<64x512xf32>
    %105 = tpu.matmul %102, %104, %cst_79 {dimension_numbers = #tpu.dot_dimension_numbers<[1], [0], [0], [1], [0, 0, 1, 1], [], []>} : vector<64x256xbf16>, vector<256x512xbf16>, vector<64x512xf32> -> vector<64x512xf32>
    %106 = arith.addf %98, %105 : vector<64x512xf32>
    %cst_80 = arith.constant 0.000000e+00 : f32
    %107 = vector.broadcast %cst_80 : f32 to vector<64x512xf32>
    %108 = arith.maximumf %106, %107 : vector<64x512xf32>
    %109 = arith.truncf %108 : vector<64x512xf32> to vector<64x512xbf16>
    %c0_81 = arith.constant 0 : index
    %c0_82 = arith.constant 0 : index
    %110 = vector.load %arg11[%c0_81, %c0_82] : memref<1x128xf32, #tpu.memory_space<vmem>>, vector<1x128xf32>
    %111 = vector.extract_strided_slice %109 {offsets = [0, 0], sizes = [16, 512], strides = [1, 1]} : vector<64x512xbf16> to vector<16x512xbf16>
    %c0_83 = arith.constant 0 : index
    %c0_84 = arith.constant 0 : index
    %c0_85 = arith.constant 0 : index
    %112 = vector.load %arg10[%c0_83, %c0_84, %c0_85] : memref<4x512x128xbf16, #tpu.memory_space<vmem>>, vector<1x512x128xbf16>
    %113 = vector.shape_cast %112 : vector<1x512x128xbf16> to vector<512x128xbf16>
    %cst_86 = arith.constant dense<0.000000e+00> : vector<16x128xf32>
    %114 = tpu.matmul %111, %113, %cst_86 {dimension_numbers = #tpu.dot_dimension_numbers<[1], [0], [0], [1], [0, 0, 1, 1], [], []>} : vector<16x512xbf16>, vector<512x128xbf16>, vector<16x128xf32> -> vector<16x128xf32>
    %115 = vector.broadcast %110 : vector<1x128xf32> to vector<16x128xf32>
    %116 = arith.addf %115, %114 : vector<16x128xf32>
    %117 = vector.extract_strided_slice %109 {offsets = [16, 0], sizes = [16, 512], strides = [1, 1]} : vector<64x512xbf16> to vector<16x512xbf16>
    %c1_87 = arith.constant 1 : index
    %c0_88 = arith.constant 0 : index
    %c0_89 = arith.constant 0 : index
    %118 = vector.load %arg10[%c1_87, %c0_88, %c0_89] : memref<4x512x128xbf16, #tpu.memory_space<vmem>>, vector<1x512x128xbf16>
    %119 = vector.shape_cast %118 : vector<1x512x128xbf16> to vector<512x128xbf16>
    %cst_90 = arith.constant dense<0.000000e+00> : vector<16x128xf32>
    %120 = tpu.matmul %117, %119, %cst_90 {dimension_numbers = #tpu.dot_dimension_numbers<[1], [0], [0], [1], [0, 0, 1, 1], [], []>} : vector<16x512xbf16>, vector<512x128xbf16>, vector<16x128xf32> -> vector<16x128xf32>
    %121 = arith.addf %116, %120 : vector<16x128xf32>
    %122 = vector.extract_strided_slice %109 {offsets = [32, 0], sizes = [16, 512], strides = [1, 1]} : vector<64x512xbf16> to vector<16x512xbf16>
    %c2_91 = arith.constant 2 : index
    %c0_92 = arith.constant 0 : index
    %c0_93 = arith.constant 0 : index
    %123 = vector.load %arg10[%c2_91, %c0_92, %c0_93] : memref<4x512x128xbf16, #tpu.memory_space<vmem>>, vector<1x512x128xbf16>
    %124 = vector.shape_cast %123 : vector<1x512x128xbf16> to vector<512x128xbf16>
    %cst_94 = arith.constant dense<0.000000e+00> : vector<16x128xf32>
    %125 = tpu.matmul %122, %124, %cst_94 {dimension_numbers = #tpu.dot_dimension_numbers<[1], [0], [0], [1], [0, 0, 1, 1], [], []>} : vector<16x512xbf16>, vector<512x128xbf16>, vector<16x128xf32> -> vector<16x128xf32>
    %126 = arith.addf %121, %125 : vector<16x128xf32>
    %127 = vector.extract_strided_slice %109 {offsets = [48, 0], sizes = [16, 512], strides = [1, 1]} : vector<64x512xbf16> to vector<16x512xbf16>
    %c3_95 = arith.constant 3 : index
    %c0_96 = arith.constant 0 : index
    %c0_97 = arith.constant 0 : index
    %128 = vector.load %arg10[%c3_95, %c0_96, %c0_97] : memref<4x512x128xbf16, #tpu.memory_space<vmem>>, vector<1x512x128xbf16>
    %129 = vector.shape_cast %128 : vector<1x512x128xbf16> to vector<512x128xbf16>
    %cst_98 = arith.constant dense<0.000000e+00> : vector<16x128xf32>
    %130 = tpu.matmul %127, %129, %cst_98 {dimension_numbers = #tpu.dot_dimension_numbers<[1], [0], [0], [1], [0, 0, 1, 1], [], []>} : vector<16x512xbf16>, vector<512x128xbf16>, vector<16x128xf32> -> vector<16x128xf32>
    %131 = arith.addf %126, %130 : vector<16x128xf32>
    %c0_99 = arith.constant 0 : index
    %c0_100 = arith.constant 0 : index
    %132 = vector.load %arg12[%c0_99, %c0_100] : memref<16x128xf32, #tpu.memory_space<vmem>>, vector<16x128xf32>
    tpu.vector_store %arg12[%c0_99, %c0_100], %131 {strides = array<i32>} : memref<16x128xf32, #tpu.memory_space<vmem>>, vector<16x128xf32>,
    return
  }
  func.func @transform_0(%arg0: i32) -> (i32, i32) {
    %c0_i32 = arith.constant 0 : i32
    %c0_i32_0 = arith.constant 0 : i32
    return %arg0, %c0_i32 : i32, i32
  }
  func.func @transform_1(%arg0: i32) -> (i32, i32) {
    %c0_i32 = arith.constant 0 : i32
    %c0_i32_0 = arith.constant 0 : i32
    %c0_i32_1 = arith.constant 0 : i32
    return %c0_i32, %c0_i32_0 : i32, i32
  }
  func.func @transform_2(%arg0: i32) -> (i32, i32) {
    %c0_i32 = arith.constant 0 : i32
    %c0_i32_0 = arith.constant 0 : i32
    %c0_i32_1 = arith.constant 0 : i32
    return %c0_i32, %c0_i32_0 : i32, i32
  }
  func.func @transform_3(%arg0: i32) -> (i32, i32, i32) {
    %c0_i32 = arith.constant 0 : i32
    %c0_i32_0 = arith.constant 0 : i32
    %c0_i32_1 = arith.constant 0 : i32
    %c0_i32_2 = arith.constant 0 : i32
    return %c0_i32, %c0_i32_0, %c0_i32_1 : i32, i32, i32
  }
  func.func @transform_4(%arg0: i32) -> (i32, i32, i32) {
    %c0_i32 = arith.constant 0 : i32
    %c0_i32_0 = arith.constant 0 : i32
    %c0_i32_1 = arith.constant 0 : i32
    %c0_i32_2 = arith.constant 0 : i32
    return %c0_i32, %c0_i32_0, %c0_i32_1 : i32, i32, i32
  }
  func.func @transform_5(%arg0: i32) -> (i32, i32) {
    %c0_i32 = arith.constant 0 : i32
    %c0_i32_0 = arith.constant 0 : i32
    %c0_i32_1 = arith.constant 0 : i32
    return %c0_i32, %c0_i32_0 : i32, i32
  }
  func.func @transform_6(%arg0: i32) -> (i32, i32, i32) {
    %c0_i32 = arith.constant 0 : i32
    %c0_i32_0 = arith.constant 0 : i32
    %c0_i32_1 = arith.constant 0 : i32
    %c0_i32_2 = arith.constant 0 : i32
    return %c0_i32, %c0_i32_0, %c0_i32_1 : i32, i32, i32
  }
  func.func @transform_7(%arg0: i32) -> (i32, i32, i32) {
    %c0_i32 = arith.constant 0 : i32
    %c0_i32_0 = arith.constant 0 : i32
    %c0_i32_1 = arith.constant 0 : i32
    %c0_i32_2 = arith.constant 0 : i32
    return %c0_i32, %c0_i32_0, %c0_i32_1 : i32, i32, i32
  }
  func.func @transform_8(%arg0: i32) -> (i32, i32) {
    %c0_i32 = arith.constant 0 : i32
    %c0_i32_0 = arith.constant 0 : i32
    %c0_i32_1 = arith.constant 0 : i32
    return %c0_i32, %c0_i32_0 : i32, i32
  }
  func.func @transform_9(%arg0: i32) -> (i32, i32, i32) {
    %c0_i32 = arith.constant 0 : i32
    %c0_i32_0 = arith.constant 0 : i32
    %c0_i32_1 = arith.constant 0 : i32
    %c0_i32_2 = arith.constant 0 : i32
    return %c0_i32, %c0_i32_0, %c0_i32_1 : i32, i32, i32
  }
  func.func @transform_10(%arg0: i32) -> (i32, i32) {
    %c0_i32 = arith.constant 0 : i32
    %c0_i32_0 = arith.constant 0 : i32
    %c0_i32_1 = arith.constant 0 : i32
    return %c0_i32, %c0_i32_0 : i32, i32
  }
  func.func @transform_11(%arg0: i32) -> (i32, i32) {
    %c0_i32 = arith.constant 0 : i32
    %c0_i32_0 = arith.constant 0 : i32
    return %arg0, %c0_i32 : i32, i32
  }
}

</mosaic_0001>

<bundles_post_ra>
// kernel: forward.1
= control target key start
LH: loop header
LB: loop body
LE: loop exit
PB: predicated region body
PF: predicated region fallthrough
CT: control target
= control target key end

     0   :  { %s13526_s1 = inlined_call_operand.vmem [shape: bf16[128,128], index: 1, kind: input, shape index: {}]   ;;  %s13527_s0 = inlined_call_operand.vmem [shape: f32[256,128], index: 0, kind: input, shape index: {}]   ;;  %s13528_s2 = inlined_call_operand.vmem [shape: f32[1,128], index: 2, kind: input, shape index: {}]   ;;  %s13529_s3 = inlined_call_operand.vmem [shape: bf16[4,144,256], index: 3, kind: input, shape index: {}]   ;;  %s13530_s4 = inlined_call_operand.vmem [shape: bf16[4,128,256], index: 4, kind: input, shape index: {}]   ;;  %s13531_s7 = inlined_call_operand.vmem [shape: bf16[4,256,512], index: 7, kind: input, shape index: {}]   ;;  %s13532_s5 = inlined_call_operand.vmem [shape: f32[1,256], index: 5, kind: input, shape index: {}]   ;;  %s13533_s6 = inlined_call_operand.vmem [shape: bf16[4,64,144], index: 6, kind: input, shape index: {}]   ;;  %s13534_s9 = inlined_call_operand.vmem [shape: bf16[4,512,128], index: 9, kind: input, shape index: {}]   ;;  %s13535_s8 = inlined_call_operand.vmem [shape: f32[1,512], index: 8, kind: input, shape index: {}]   ;;  %s13536_s10 = inlined_call_operand.vmem [shape: f32[1,128], index: 10, kind: input, shape index: {}]   ;;  %s13537_s11 = inlined_call_operand.vmem [shape: f32[16,128], index: 11, kind: output, shape index: {}]  }
   0x1   :  { %v9399_v0 = vld [vmem:[%s13526_s1] sm:$0xff]   ;;  %v9400_v1 = vld [vmem:[%s13526_s1 + $0x8] sm:$0xff]   ;;  %v9401_v2 = vld [vmem:[%s13526_s1 + $0x10] sm:$0xff]  }
   0x2   :  { %9078 = vmatprep.subr.bf16.mxu0 %v9399_v0  ;;  %v9402_v3 = vld [vmem:[%s13526_s1 + $0x18] sm:$0xff]   ;;  %v10511_v4 = vld [vmem:[%s13527_s0] sm:$0xff]  ;;  %v10516_v5 = vld [vmem:[%s13527_s0 + $0x8] sm:$0xff] }
   0x3   :  { %9079 = vmatpush3.bf16.msra.mxu0 %v9399_v0  ;;  %v10521_v6 = vld [vmem:[%s13527_s0 + $0x10] sm:$0xff]  ;;  %v71_v7 = vand.u32 2147483647, %v10511_v4  ;;  %v72_v8 = vand.u32 2147483647, %v10516_v5  ;;  %v10528_v9 = vld [vmem:[%s13527_s0 + $0x18] sm:$0xff] }
   0x4   :  { %9080 = vmatprep.subr.bf16.mxu0 %v9400_v1  ;;  %v10533_v10 = vld [vmem:[%s13527_s0 + $0x20] sm:$0xff]  ;;  %v73_v12 = vand.u32 2147483647, %v10521_v6  ;;  %v74_v13 = vand.u32 2147483647, %v10528_v9  ;;  %v10543_v14 = vld [vmem:[%s13527_s0 + $0x28] sm:$0xff] }
   0x5   :  { %v9403_v11 = vld [vmem:[%s13526_s1 + $0x20] sm:$0xff]   ;;  %v10548_v15 = vld [vmem:[%s13527_s0 + $0x30] sm:$0xff]  ;;  %v103_v16 = vadd.f32 1e-08, %v71_v7  ;;  %v104_v17 = vadd.f32 1e-08, %v72_v8 }
   0x6   :  { %v75_v18 = vand.u32 2147483647, %v10533_v10  ;;  %v105_v19 = vadd.f32 1e-08, %v73_v12  ;;  %v106_v20 = vadd.f32 1e-08, %v74_v13 }
   0x7   :  { %9081 = vmatpush3.bf16.msra.mxu0 %v9400_v1  ;;  %v76_v21 = vand.u32 2147483647, %v10543_v14  ;;  %10171 = vrcp.f32 %v103_v16  ;;  %v10555_v23 = vld [vmem:[%s13527_s0 + $0x38] sm:$0xff]  ;;  %v77_v24 = vand.u32 2147483647, %v10548_v15  ;;  %v10561_v25 = vld [vmem:[%s13527_s0 + $0x40] sm:$0xff] }
   0x8   :  { %9082 = vmatprep.subr.bf16.mxu0 %v9401_v2  ;;  %v107_v22 = vadd.f32 1e-08, %v75_v18  ;;  %10173 = vrcp.f32 %v104_v17  ;;  %v78_v27 = vand.u32 2147483647, %v10555_v23  ;;  %v10567_v28 = vld [vmem:[%s13527_s0 + $0x48] sm:$0xff]  ;;  %v10577_v34 = vld [vmem:[%s13527_s0 + $0x50] sm:$0xff] }
   0x9   :  { %v108_v26 = vadd.f32 1e-08, %v76_v21  ;;  %10175 = vrcp.f32 %v105_v19  ;;  %v109_v29 = vadd.f32 1e-08, %v77_v24  ;;  %v79_v30 = vand.u32 2147483647, %v10561_v25 }
   0xa   :  { %v80_v31 = vand.u32 2147483647, %v10567_v28  ;;  %v9404_v32 = vld [vmem:[%s13526_s1 + $0x28] sm:$0xff]   ;;  %10177 = vrcp.f32 %v106_v20  ;;  %v110_v33 = vadd.f32 1e-08, %v78_v27  ;;  %v10582_v36 = vld [vmem:[%s13527_s0 + $0x58] sm:$0xff] }
   0xb   :  { %9083 = vmatpush3.bf16.msra.mxu0 %v9401_v2  ;;  %10179 = vrcp.f32 %v107_v22  ;;  %v111_v35 = vadd.f32 1e-08, %v79_v30  ;;  %v10587_v38 = vld [vmem:[%s13527_s0 + $0x60] sm:$0xff]  ;;  %v81_v39 = vand.u32 2147483647, %v10577_v34  ;;  %v10593_v40 = vld [vmem:[%s13527_s0 + $0x68] sm:$0xff] }
   0xc   :  { %9084 = vmatprep.subr.bf16.mxu0 %v9402_v3  ;;  %10181 = vrcp.f32 %v108_v26  ;;  %v112_v37 = vadd.f32 1e-08, %v80_v31  ;;  %v9405_v41 = vld [vmem:[%s13526_s1 + $0x30] sm:$0xff]   ;;  %v82_v42 = vand.u32 2147483647, %v10582_v36  ;;  %v9406_v48 = vld [vmem:[%s13526_s1 + $0x38] sm:$0xff]  }
   0xd   :  { %10183 = vrcp.f32 %v109_v29  ;;  %v83_v43 = vand.u32 2147483647, %v10587_v38  ;;  %v84_v44 = vand.u32 2147483647, %v10593_v40  ;;  %v113_v46 = vadd.f32 1e-08, %v81_v39 }
   0xe   :  { %10185 = vrcp.f32 %v110_v33  ;;  %v114_v50 = vadd.f32 1e-08, %v82_v42  ;;  %v10608_v51 = vld [vmem:[%s13527_s0 + $0x70] sm:$0xff]  ;;  %v10614_v55 = vld [vmem:[%s13527_s0 + $0x78] sm:$0xff]  ;;  %v10620_v59 = vld [vmem:[%s13527_s0 + $0x80] sm:$0xff] }
   0xf   :  { %9085 = vmatpush3.bf16.msra.mxu0 %v9402_v3  ;;  %10187 = vrcp.f32 %v111_v35  ;;  %v115_v54 = vadd.f32 1e-08, %v83_v43  ;;  %v116_v58 = vadd.f32 1e-08, %v84_v44  ;;  %v85_v63 = vand.u32 2147483647, %v10608_v51 }
  0x10   :  { %9086 = vmatprep.subr.bf16.mxu0 %v9403_v11  ;;  %10189 = vrcp.f32 %v112_v37  ;;  %v10627_v0 = vld [vmem:[%s13527_s0 + $0x88] sm:$0xff]  ;;  %v86_v3 = vand.u32 2147483647, %v10614_v55  ;;  %v10637_v17 = vld [vmem:[%s13527_s0 + $0x90] sm:$0xff]  ;;  %v10642_v18 = vld [vmem:[%s13527_s0 + $0x98] sm:$0xff] }
  0x11   :  { %v10172_v45 = vpop.eup %10171  ;;  %10191 = vrcp.f32 %v113_v46  ;;  %v117_v13 = vadd.f32 1e-08, %v85_v63  ;;  %v10649_v22 = vld [vmem:[%s13527_s0 + $0xa0] sm:$0xff]  ;;  %v89_v27 = vand.u32 2147483647, %v10637_v17  ;;  %v10670_v43 = vld [vmem:[%s13527_s0 + $0xb8] sm:$0xff] }
  0x12   :  { %v10174_v47 = vpop.eup %10173  ;;  %v199_v49 = vmul.f32 %v10172_v45, %v10511_v4  ;;  %10193 = vrcp.f32 %v114_v50  ;;  %v118_v16 = vadd.f32 1e-08, %v86_v3  ;;  %v91_v30 = vand.u32 2147483647, %v10649_v22 }
  0x13   :  { %9087 = vmatpush3.bf16.msra.mxu0 %v9403_v11  ;;  %v10176_v52 = vpop.eup %10175  ;;  %v200_v53 = vmul.f32 %v10174_v47, %v10516_v5  ;;  %10195 = vrcp.f32 %v115_v54  ;;  %v121_v35 = vadd.f32 1e-08, %v89_v27  ;;  %v10677_v47 = vld [vmem:[%s13527_s0 + $0xc0] sm:$0xff] }
  0x14   :  { %9088 = vmatprep.subr.bf16.mxu0 %v9404_v32  ;;  %v10178_v56 = vpop.eup %10177  ;;  %v201_v57 = vmul.f32 %v10176_v52, %v10521_v6  ;;  %v87_v6 = vand.u32 2147483647, %v10620_v59  ;;  %10197 = vrcp.f32 %v116_v58  ;;  %v123_v42 = vadd.f32 1e-08, %v91_v30 }
  0x15   :  { %v10180_v60 = vpop.eup %10179  ;;  %v231_v61 = vpack.c.bf16 %v200_v53, %v199_v49  ;;  %v202_v62 = vmul.f32 %v10178_v56, %v10528_v9  ;;  %v88_v9 = vand.u32 2147483647, %v10627_v0  ;;  %10199 = vrcp.f32 %v117_v13 }
  0x16   :  { %v10182_v1 = vpop.eup %10181  ;;  %v203_v2 = vmul.f32 %v10180_v60, %v10533_v10  ;;  %10201 = vrcp.f32 %v118_v16  ;;  %v95_v53 = vand.u32 2147483647, %v10677_v47 }
  0x17   :  { %9089 = vmatpush3.bf16.msra.mxu0 %v9404_v32  ;;  %v10184_v4 = vpop.eup %10183  ;;  %9094 = vmatprep.mubr.bf16.mxu0 %v231_v61  ;;  %v204_v5 = vmul.f32 %v10182_v1, %v10543_v14  ;;  %v232_v8 = vpack.c.bf16 %v202_v62, %v201_v57  ;;  %v119_v14 = vadd.f32 1e-08, %v87_v6  ;;  %v120_v21 = vadd.f32 1e-08, %v88_v9  ;;  %v10693_v62 = vld [vmem:[%s13527_s0 + $0xd0] sm:$0xff]  ;;  %v10698_v1 = vld [vmem:[%s13527_s0 + $0xd8] sm:$0xff] }
  0x18   :  { %9090 = vmatprep.subr.bf16.mxu0 %v9405_v41  ;;  %v10186_v7 = vpop.eup %10185  ;;  %v205_v19 = vmul.f32 %v10184_v4, %v10548_v15  ;;  %v10657_v15 = vld [vmem:[%s13527_s0 + $0xa8] sm:$0xff]  ;;  %v127_v63 = vadd.f32 1e-08, %v95_v53 }
  0x19   :  { %v10188_v11 = vpop.eup %10187  ;;  %v233_v12 = vpack.c.bf16 %v204_v5, %v203_v2  ;;  %v206_v20 = vmul.f32 %v10186_v7, %v10555_v23  ;;  %v90_v23 = vand.u32 2147483647, %v10642_v18  ;;  %10203 = vrcp.f32 %v119_v14  ;;  %v10705_v5 = vld [vmem:[%s13527_s0 + $0xe0] sm:$0xff] }
  0x1a   :  { %v10190_v10 = vpop.eup %10189  ;;  %v207_v24 = vmul.f32 %v10188_v11, %v10561_v25  ;;  %10205 = vrcp.f32 %v120_v21  ;;  %v92_v25 = vand.u32 2147483647, %v10657_v15  ;;  %v99_v11 = vand.u32 2147483647, %v10705_v5  ;;  %v69_v21 = vld [vmem:[%s13527_s0 + $0xf0] sm:$0xff] }
  0x1b   :  { %9091 = vmatpush3.bf16.msra.mxu0 %v9405_v41  ;;  %v208_v26 = vmul.f32 %v10190_v10, %v10567_v28  ;;  %v10192_v29 = vpop.eup %10191  ;;  %v234_v32 = vpack.c.bf16 %v206_v20, %v205_v19  ;;  %v122_v39 = vadd.f32 1e-08, %v90_v23  ;;  %v10665_v41 = vld [vmem:[%s13527_s0 + $0xb0] sm:$0xff]  ;;  %10207 = vrcp.f32 %v121_v35  ;;  %v70_v23 = vld [vmem:[%s13527_s0 + $0xf8] sm:$0xff] }
  0x1c   :  { %9092 = vmatprep.subr.bf16.mxu0 %v9406_v48  ;;  %v10194_v31 = vpop.eup %10193  ;;  %v209_v44 = vmul.f32 %v10192_v29, %v10577_v34  ;;  %v124_v46 = vadd.f32 1e-08, %v92_v25  ;;  %v93_v50 = vand.u32 2147483647, %v10665_v41  ;;  %v10685_v34 = vld [vmem:[%s13527_s0 + $0xc8] sm:$0xff] }
  0x1d   :  { %v10196_v28 = vpop.eup %10195  ;;  %v235_v33 = vpack.c.bf16 %v208_v26, %v207_v24  ;;  %v210_v45 = vmul.f32 %v10194_v31, %v10582_v36  ;;  %10209 = vrcp.f32 %v122_v39  ;;  %v94_v36 = vand.u32 2147483647, %v10670_v43 }
  0x1e   :  { %v10198_v37 = vpop.eup %10197  ;;  %10211 = vrcp.f32 %v123_v42  ;;  %v125_v58 = vadd.f32 1e-08, %v93_v50  ;;  %v131_v20 = vadd.f32 1e-08, %v99_v11  ;;  %v101_v31 = vand.u32 2147483647, %v69_v21 }
  0x1f   :  { %9093 = vmatpush3.bf16.msra.mxu0 %v9406_v48  ;;  %v211_v48 = vmul.f32 %v10196_v28, %v10587_v38  ;;  %v212_v49 = vmul.f32 %v10198_v37, %v10593_v40  ;;  %v10200_v52 = vpop.eup %10199  ;;  %v236_v56 = vpack.c.bf16 %v210_v45, %v209_v44  ;;  %10213 = vrcp.f32 %v124_v46 }
  0x20   :  { %v10202_v54 = vpop.eup %10201  ;;  %v96_v38 = vand.u32 2147483647, %v10685_v34  ;;  %v126_v61 = vadd.f32 1e-08, %v94_v36  ;;  %v213_v2 = vmul.f32 %v10200_v52, %v10608_v51  ;;  %10215 = vrcp.f32 %v125_v58  ;;  %v68_v51 = vld [vmem:[%s13527_s0 + $0xe8] sm:$0xff] }
  0x21   :  { %v237_v57 = vpack.c.bf16 %v212_v49, %v211_v48  ;;  %v214_v3 = vmul.f32 %v10202_v54, %v10614_v55  ;;  %v98_v55 = vand.u32 2147483647, %v10698_v1  ;;  %v102_v25 = vand.u32 2147483647, %v70_v23  ;;  %v10735_v58 = vld [vmem:[%s13528_s2] ss:$0 sm:$0xff] }
  0x22   :  { %9095 = vmatmul.mubr.bf16.vlgmr.msra.gmra.mrb[0].mxu0 %v232_v8  ;;  %v128_v4 = vadd.f32 1e-08, %v96_v38  ;;  %v97_v8 = vand.u32 2147483647, %v10693_v62  ;;  %10217 = vrcp.f32 %v126_v61  ;;  %v133_v37 = vadd.f32 1e-08, %v101_v31 }
  0x23   :  { %9098 = vmatprep.mubr.bf16.mxu0 %v233_v12  ;;  %v10204_v40 = vpop.eup %10203  ;;  %10219 = vrcp.f32 %v127_v63  ;;  %v238_v13 = vpack.c.bf16 %v214_v3, %v213_v2  ;;  %v130_v19 = vadd.f32 1e-08, %v98_v55  ;;  %v134_v39 = vadd.f32 1e-08, %v102_v25 }
  0x24   :  { %v10206_v60 = vpop.eup %10205  ;;  %v215_v6 = vmul.f32 %v10204_v40, %v10620_v59  ;;  %10221 = vrcp.f32 %v128_v4  ;;  %v100_v59 = vand.u32 2147483647, %v68_v51  ;;  %v129_v16 = vadd.f32 1e-08, %v97_v8 }
  0x25   :  { %v216_v7 = vmul.f32 %v10206_v60, %v10627_v0  ;;  %v10208_v9 = vpop.eup %10207 }
  0x26   :  { %v217_v24 = vmul.f32 %v10208_v9, %v10637_v17  ;;  %v132_v27 = vadd.f32 1e-08, %v100_v59  ;;  %10223 = vrcp.f32 %v129_v16 }
  0x27   :  { %v10210_v12 = vpop.eup %10209  ;;  %v239_v0 = vpack.c.bf16 %v216_v7, %v215_v6  ;;  %10225 = vrcp.f32 %v130_v19 }
  0x28   :  { %v10212_v10 = vpop.eup %10211  ;;  %v218_v26 = vmul.f32 %v10210_v12, %v10642_v18  ;;  %10227 = vrcp.f32 %v131_v20 }
  0x29   :  { %v10214_v14 = vpop.eup %10213  ;;  %v219_v29 = vmul.f32 %v10212_v10, %v10649_v22  ;;  %10229 = vrcp.f32 %v132_v27 }
  0x2a   :  { %9099 = vmatmul.mubr.bf16.gmra.mrb[4].mxu0 %v234_v32  ;;  %v220_v30 = vmul.f32 %v10214_v14, %v10657_v15  ;;  %v10216_v32 = vpop.eup %10215  ;;  %v240_v17 = vpack.c.bf16 %v218_v26, %v217_v24  ;;  %10231 = vrcp.f32 %v133_v37 }
  0x2b   :  { %9102 = vmatprep.mubr.bf16.mxu0 %v235_v33  ;;  %v221_v42 = vmul.f32 %v10216_v32, %v10665_v41  ;;  %10233 = vrcp.f32 %v134_v39 }
  0x2c   :  { %v10218_v28 = vpop.eup %10217  ;;  %v241_v33 = vpack.c.bf16 %v220_v30, %v219_v29 }
  0x2d   :  { %v10220_v18 = vpop.eup %10219  ;;  %v222_v22 = vmul.f32 %v10218_v28, %v10670_v43 }
  0x2e   :  { %v10222_v35 = vpop.eup %10221  ;;  %v223_v15 = vmul.f32 %v10220_v18, %v10677_v47 }
  0x2f   :  { %v224_v44 = vmul.f32 %v10222_v35, %v10685_v34  ;;  %v242_v48 = vpack.c.bf16 %v222_v22, %v221_v42 }
  0x30   :  { %v10224_v45 = vpop.eup %10223 }
  0x31   :  { %v10226_v46 = vpop.eup %10225  ;;  %v243_v50 = vpack.c.bf16 %v224_v44, %v223_v15  ;;  %v225_v52 = vmul.f32 %v10224_v45, %v10693_v62 }
  0x32   :  { %9103 = vmatmul.mubr.bf16.gmra.mrb[8].mxu0 %v236_v56  ;;  %v10228_v49 = vpop.eup %10227  ;;  %v226_v41 = vmul.f32 %v10226_v46, %v10698_v1 }
  0x33   :  { %9106 = vmatprep.mubr.bf16.mxu0 %v237_v57  ;;  %v10230_v36 = vpop.eup %10229  ;;  %v227_v43 = vmul.f32 %v10228_v49, %v10705_v5 }
  0x34   :  { %v228_v53 = vmul.f32 %v10230_v36, %v68_v51  ;;  %v10232_v47 = vpop.eup %10231  ;;  %v244_v54 = vpack.c.bf16 %v226_v41, %v225_v52 }
  0x35   :  { %v10234_v34 = vpop.eup %10233  ;;  %v229_v38 = vmul.f32 %v10232_v47, %v69_v21 }
  0x36   :  { %v245_v56 = vpack.c.bf16 %v228_v53, %v227_v43  ;;  %v230_v40 = vmul.f32 %v10234_v34, %v70_v23 }
  0x38   :  { %v246_v57 = vpack.c.bf16 %v230_v40, %v229_v38 }
  0x3a   :  { %9107 = vmatmul.mubr.bf16.gmra.mrb[12].mxu0 %v238_v13 }
  0x3b   :  { %9110 = vmatprep.mubr.bf16.mxu0 %v239_v0 }
  0x42   :  { %9111 = vmatmul.mubr.bf16.gmra.mrb[16].mxu0 %v240_v17 }
  0x43   :  { %9114 = vmatprep.mubr.bf16.mxu0 %v241_v33 }
  0x4a   :  { %9115 = vmatmul.mubr.bf16.gmra.mrb[20].mxu0 %v242_v48 }
  0x4b   :  { %9118 = vmatprep.mubr.bf16.mxu0 %v243_v50 }
  0x52   :  { %9119 = vmatmul.mubr.bf16.gmra.mrb[24].mxu0 %v244_v54 }
  0x53   :  { %9122 = vmatprep.mubr.bf16.mxu0 %v245_v56 }
  0x5a   :  { %9123 = vmatmul.mubr.bf16.gmra.mrb[28].mxu0 %v246_v57 }
  0xf5   :  { %v9096_v60 = vpop.f32.mrb[0].mxu0 }
  0xf6   :  { %v361_v61 = vadd.f32 %v9096_v60, %v10735_v58  ;;  %v352_v62 = vpop.f32.mrb[1].mxu0 }
  0xf7   :  { %v353_v63 = vadd.f32 %v10735_v58, %v352_v62  ;;  %v9097_v1 = vpop.f32.mrb[2].mxu0 }
  0xf8   :  { %v10739_v2 = vmax.f32 %v361_v61, 0.0  ;;  %v364_v3 = vadd.f32 %v9097_v1, %v10735_v58  ;;  %v355_v4 = vpop.f32.mrb[3].mxu0 }
  0xf9   :  { %v10742_v5 = vmax.f32 %v353_v63, 0.0  ;;  %v356_v8 = vadd.f32 %v10735_v58, %v355_v4 }
  0xfa   :  { %v513_v6 = vmul.f32 %v10739_v2, %v10739_v2  ;;  %v10746_v7 = vmax.f32 %v364_v3, 0.0 }
  0xfb   :  { %v511_v51 = vmul.f32 %v10742_v5, %v10742_v5  ;;  %v10752_v12 = vmax.f32 %v356_v8, 0.0 }
  0xfc   :  { %547 = vadd.xlane.f32.xlu0 %v513_v6  ;;  %v514_v10 = vmul.f32 %v10746_v7, %v10746_v7 }
  0xfd   :  { %v9100_v55 = vpop.f32.mrb[4].mxu0  ;;  %543 = vadd.xlane.f32.xlu1 %v511_v51  ;;  %v512_v26 = vmul.f32 %v10752_v12, %v10752_v12 }
  0xfe   :  { %v377_v9 = vadd.f32 %v9100_v55, %v10735_v58  ;;  %v368_v11 = vpop.f32.mrb[5].mxu0 }
  0xff   :  { %v369_v13 = vadd.f32 %v10735_v58, %v368_v11  ;;  %v9101_v59 = vpop.f32.mrb[6].mxu0 }
 0x100   :  { %v10757_v0 = vmax.f32 %v377_v9, 0.0  ;;  %v380_v16 = vadd.f32 %v9101_v59, %v10735_v58  ;;  %v371_v14 = vpop.f32.mrb[7].mxu0 }
 0x101   :  { %549 = vadd.xlane.f32.xlu1 %v514_v10  ;;  %v10760_v19 = vmax.f32 %v369_v13, 0.0  ;;  %v372_v24 = vadd.f32 %v10735_v58, %v371_v14 }
 0x102   :  { %v517_v20 = vmul.f32 %v10757_v0, %v10757_v0  ;;  %v10764_v21 = vmax.f32 %v380_v16, 0.0 }
 0x103   :  { %v515_v30 = vmul.f32 %v10760_v19, %v10760_v19  ;;  %v10772_v31 = vmax.f32 %v372_v24, 0.0 }
 0x104   :  { %555 = vadd.xlane.f32.xlu0 %v517_v20  ;;  %v518_v28 = vmul.f32 %v10764_v21, %v10764_v21 }
 0x105   :  { %v9104_v27 = vpop.f32.mrb[8].mxu0  ;;  %545 = vadd.xlane.f32.xlu1 %v512_v26  ;;  %v516_v22 = vmul.f32 %v10772_v31, %v10772_v31 }
 0x106   :  { %v393_v23 = vadd.f32 %v9104_v27, %v10735_v58  ;;  %v384_v29 = vpop.f32.mrb[9].mxu0 }
 0x107   :  { %v385_v32 = vadd.f32 %v10735_v58, %v384_v29  ;;  %v9105_v25 = vpop.f32.mrb[10].mxu0 }
 0x108   :  { %v10777_v17 = vmax.f32 %v393_v23, 0.0  ;;  %v396_v18 = vadd.f32 %v9105_v25, %v10735_v58  ;;  %v387_v33 = vpop.f32.mrb[11].mxu0  ;;  %551 = vadd.xlane.f32.xlu0 %v515_v30 }
 0x109   :  { %557 = vadd.xlane.f32.xlu1 %v518_v28  ;;  %v10780_v35 = vmax.f32 %v385_v32, 0.0  ;;  %v388_v42 = vadd.f32 %v10735_v58, %v387_v33 }
 0x10a   :  { %v521_v37 = vmul.f32 %v10777_v17, %v10777_v17  ;;  %v10784_v39 = vmax.f32 %v396_v18, 0.0 }
 0x10b   :  { %v519_v46 = vmul.f32 %v10780_v35, %v10780_v35  ;;  %v10796_v48 = vmax.f32 %v388_v42, 0.0 }
 0x10c   :  { %563 = vadd.xlane.f32.xlu0 %v521_v37  ;;  %v522_v50 = vmul.f32 %v10784_v39, %v10784_v39 }
 0x10d   :  { %v9108_v15 = vpop.f32.mrb[12].mxu0  ;;  %553 = vadd.xlane.f32.xlu1 %v516_v22  ;;  %v520_v41 = vmul.f32 %v10796_v48, %v10796_v48 }
 0x10e   :  { %v10790_v44 = vadd.f32 %v9108_v15, %v10735_v58  ;;  %v10792_v45 = vpop.f32.mrb[13].mxu0 }
 0x10f   :  { %v9109_v49 = vpop.f32.mrb[14].mxu0 }
 0x110   :  { %v10801_v36 = vadd.f32 %v9109_v49, %v10735_v58  ;;  %v403_v52 = vpop.f32.mrb[15].mxu0  ;;  %559 = vadd.xlane.f32.xlu0 %v519_v46 }
 0x111   :  { %565 = vadd.xlane.f32.xlu1 %v522_v50  ;;  %v404_v15 = vadd.f32 %v10735_v58, %v403_v52 }
 0x115   :  { %v9112_v43 = vpop.f32.mrb[16].mxu0  ;;  %561 = vadd.xlane.f32.xlu1 %v520_v41  ;;  %v401_v41 = vadd.f32 %v10735_v58, %v10792_v45 }
 0x116   :  { %v425_v53 = vadd.f32 %v9112_v43, %v10735_v58  ;;  %v416_v47 = vpop.f32.mrb[17].mxu0 }
 0x117   :  { %v417_v54 = vadd.f32 %v10735_v58, %v416_v47  ;;  %v9113_v34 = vpop.f32.mrb[18].mxu0 }
 0x118   :  { %v10807_v56 = vmax.f32 %v425_v53, 0.0  ;;  %v428_v38 = vadd.f32 %v9113_v34, %v10735_v58  ;;  %v419_v40 = vpop.f32.mrb[19].mxu0 }
 0x119   :  { %v10810_v57 = vmax.f32 %v417_v54, 0.0  ;;  %v420_v61 = vadd.f32 %v10735_v58, %v419_v40 }
 0x11a   :  { %v10812_v60 = vmax.f32 %v428_v38, 0.0  ;;  %v529_v62 = vmul.f32 %v10807_v56, %v10807_v56  ;;  %v10866_v38 = vmax.f32 %v404_v15, 0.0 }
 0x11b   :  { %v10819_v3 = vmax.f32 %v420_v61, 0.0  ;;  %v527_v8 = vmul.f32 %v10810_v57, %v10810_v57 }
 0x11c   :  { %579 = vadd.xlane.f32.xlu0 %v529_v62  ;;  %v530_v63 = vmul.f32 %v10812_v60, %v10812_v60 }
 0x11d   :  { %v9116_v1 = vpop.f32.mrb[20].mxu0  ;;  %v528_v16 = vmul.f32 %v10819_v3, %v10819_v3 }
 0x11e   :  { %v441_v4 = vadd.f32 %v9116_v1, %v10735_v58  ;;  %v432_v6 = vpop.f32.mrb[21].mxu0  ;;  %581 = vadd.xlane.f32.xlu1 %v530_v63  ;;  %v10872_v63 = vmax.f32 %v401_v41, 0.0 }
 0x11f   :  { %v9117_v51 = vpop.f32.mrb[22].mxu0  ;;  %v433_v59 = vadd.f32 %v10735_v58, %v432_v6  ;;  %v524_v6 = vmul.f32 %v10866_v38, %v10866_v38 }
 0x120   :  { %v444_v55 = vadd.f32 %v9117_v51, %v10735_v58  ;;  %v435_v9 = vpop.f32.mrb[23].mxu0  ;;  %575 = vadd.xlane.f32.xlu0 %v527_v8  ;;  %v10826_v13 = vmax.f32 %v441_v4, 0.0  ;;  %v523_v51 = vmul.f32 %v10872_v63, %v10872_v63 }
 0x121   :  { %v436_v11 = vadd.f32 %v10735_v58, %v435_v9  ;;  %v10837_v26 = vmax.f32 %v433_v59, 0.0  ;;  %v10893_v59 = vmax.f32 %v10801_v36, 0.0 }
 0x122   :  { %v10829_v10 = vmax.f32 %v444_v55, 0.0  ;;  %v533_v29 = vmul.f32 %v10826_v13, %v10826_v13 }
 0x123   :  { %v10833_v14 = vmax.f32 %v436_v11, 0.0  ;;  %v531_v22 = vmul.f32 %v10837_v26, %v10837_v26  ;;  %13539 = vst [vmem:[#allocation2_spill] sm:$0xff] %v10893_v59 }
 0x124   :  { %577 = vadd.xlane.f32.xlu0 %v528_v16  ;;  %v534_v20 = vmul.f32 %v10829_v10, %v10829_v10 }
 0x125   :  { %v9120_v24 = vpop.f32.mrb[24].mxu0  ;;  %v532_v28 = vmul.f32 %v10833_v14, %v10833_v14 }
 0x126   :  { %v457_v27 = vadd.f32 %v9120_v24, %v10735_v58  ;;  %v448_v23 = vpop.f32.mrb[25].mxu0  ;;  %589 = vadd.xlane.f32.xlu1 %v534_v20  ;;  %v10898_v20 = vmax.f32 %v10790_v44, 0.0 }
 0x127   :  { %v9121_v30 = vpop.f32.mrb[26].mxu0  ;;  %v449_v37 = vadd.f32 %v10735_v58, %v448_v23  ;;  %v9409_v23 = vld [vmem:[%s13529_s3 + $0x4] ss:$8 sps:$4 sm:$0xff]  }
 0x128   :  { %v460_v32 = vadd.f32 %v9121_v30, %v10735_v58  ;;  %v451_v25 = vpop.f32.mrb[27].mxu0  ;;  %587 = vadd.xlane.f32.xlu0 %v533_v29  ;;  %v10846_v33 = vmax.f32 %v457_v27, 0.0  ;;  %v526_v27 = vmul.f32 %v10893_v59, %v10893_v59  ;;  %v525_v36 = vmul.f32 %v10898_v20, %v10898_v20  ;;  %1116 = vmatprep.mubr.bf16.mxu1 %v9409_v23 }
 0x129   :  { %v452_v18 = vadd.f32 %v10735_v58, %v451_v25  ;;  %v10860_v43 = vmax.f32 %v449_v37, 0.0 }
 0x12a   :  { %v10849_v42 = vmax.f32 %v460_v32, 0.0  ;;  %585 = vadd.xlane.f32.xlu1 %v532_v28  ;;  %v537_v54 = vmul.f32 %v10846_v33, %v10846_v33 }
 0x12b   :  { %v10854_v46 = vmax.f32 %v452_v18, 0.0  ;;  %v535_v1 = vmul.f32 %v10860_v43, %v10860_v43 }
 0x12c   :  { %583 = vadd.xlane.f32.xlu0 %v531_v22  ;;  %v538_v49 = vmul.f32 %v10849_v42, %v10849_v42 }
 0x12d   :  { %v9124_v50 = vpop.f32.mrb[28].mxu0  ;;  %v536_v45 = vmul.f32 %v10854_v46, %v10854_v46 }
 0x12e   :  { %597 = vadd.xlane.f32.xlu1 %v538_v49  ;;  %v473_v53 = vadd.f32 %v9124_v50, %v10735_v58  ;;  %v464_v47 = vpop.f32.mrb[29].mxu0 }
 0x12f   :  { %v465_v52 = vadd.f32 %v10735_v58, %v464_v47  ;;  %v9125_v34 = vpop.f32.mrb[30].mxu0 }
 0x130   :  { %595 = vadd.xlane.f32.xlu0 %v537_v54  ;;  %v476_v40 = vadd.f32 %v9125_v34, %v10735_v58  ;;  %v467_v61 = vpop.f32.mrb[31].mxu0  ;;  %v10888_v9 = vmax.f32 %v473_v53, 0.0 }
 0x131   :  { %v468_v62 = vadd.f32 %v10735_v58, %v467_v61  ;;  %v10880_v8 = vmax.f32 %v465_v52, 0.0 }
 0x132   :  { %593 = vadd.xlane.f32.xlu1 %v536_v45  ;;  %v10886_v55 = vmax.f32 %v476_v40, 0.0  ;;  %v541_v24 = vmul.f32 %v10888_v9, %v10888_v9 }
 0x133   :  { %v10876_v4 = vmax.f32 %v468_v62, 0.0  ;;  %v539_v11 = vmul.f32 %v10880_v8, %v10880_v8 }
 0x134   :  { %591 = vadd.xlane.f32.xlu0 %v535_v1  ;;  %v542_v16 = vmul.f32 %v10886_v55, %v10886_v55 }
 0x135   :  { %v540_v58 = vmul.f32 %v10876_v4, %v10876_v4 }
 0x136   :  { %569 = vadd.xlane.f32.xlu1 %v524_v6 }
 0x138   :  { %567 = vadd.xlane.f32.xlu0 %v523_v51 }
 0x13a   :  { %601 = vadd.xlane.f32.xlu1 %v540_v58 }
 0x13c   :  { %599 = vadd.xlane.f32.xlu0 %v539_v11 }
 0x13e   :  { %605 = vadd.xlane.f32.xlu1 %v542_v16 }
 0x140   :  { %603 = vadd.xlane.f32.xlu0 %v541_v24 }
 0x142   :  { %573 = vadd.xlane.f32.xlu1 %v526_v27 }
 0x144   :  { %571 = vadd.xlane.f32.xlu0 %v525_v36 }
 0x189   :  { %v548_v44 = vpop.xlane.xlu0 %547 }
 0x18a   :  { %10235 = vrsqrt.f32 %v548_v44  ;;  %v544_v29 = vpop.xlane.xlu1 %543  ;;  %vm623_vm0 = vcmp.eq.f32.partialorder %v548_v44, inf  ;;  %vm625_vm1 = vcmp.eq.f32.partialorder %v548_v44, 0.0  ;;  %v626_v47 = vand.u32 2147483648, %v548_v44 }
 0x18b   :  { %10237 = vrsqrt.f32 %v544_v29  ;;  %vm609_vm2 = vcmp.eq.f32.partialorder %v544_v29, inf  ;;  %vm611_vm3 = vcmp.eq.f32.partialorder %v544_v29, 0.0  ;;  %v612_v40 = vand.u32 2147483648, %v544_v29 }
 0x18e   :  { %v550_v30 = vpop.xlane.xlu1 %549 }
 0x18f   :  { %10239 = vrsqrt.f32 %v550_v30  ;;  %vm630_vm4 = vcmp.eq.f32.partialorder %v550_v30, inf  ;;  %vm632_vm5 = vcmp.eq.f32.partialorder %v550_v30, 0.0  ;;  %v633_v62 = vand.u32 2147483648, %v550_v30 }
 0x191   :  { %v10909_v32 = vpop.xlane.xlu0 %555 }
 0x192   :  { %10241 = vrsqrt.f32 %v10909_v32  ;;  %v546_v25 = vpop.xlane.xlu1 %545  ;;  %vm651_vm6 = vcmp.eq.f32.partialorder %v10909_v32, inf  ;;  %vm653_vm7 = vcmp.eq.f32.partialorder %v10909_v32, 0.0  ;;  %v654_v58 = vand.u32 2147483648, %v10909_v32 }
 0x193   :  { %10243 = vrsqrt.f32 %v546_v25  ;;  %vm616_vm8 = vcmp.eq.f32.partialorder %v546_v25, inf  ;;  %vm618_vm9 = vcmp.eq.f32.partialorder %v546_v25, 0.0  ;;  %v619_v23 = vand.u32 2147483648, %v546_v25 }
 0x194   :  { %v10236_v28 = vpop.eup %10235 }
 0x195   :  { %v10238_v18 = vpop.eup %10237  ;;  %v622_v37 = vmul.f32 %v10236_v28, %v548_v44  ;;  %v10912_v22 = vpop.xlane.xlu0 %551 }
 0x196   :  { %v608_v15 = vmul.f32 %v10238_v18, %v544_v29  ;;  %10245 = vrsqrt.f32 %v10912_v22  ;;  %v10915_v49 = vpop.xlane.xlu1 %557  ;;  %vm637_vm10 = vcmp.eq.f32.partialorder %v10912_v22, inf  ;;  %vm639_vm11 = vcmp.eq.f32.partialorder %v10912_v22, 0.0 }
 0x197   :  { %10247 = vrsqrt.f32 %v10915_v49  ;;  %v624_v41 = vsel %vm623_vm0, %v548_v44, %v622_v37  ;;  %vm658_vm12 = vcmp.eq.f32.partialorder %v10915_v49, inf  ;;  %vm660_vm13 = vcmp.eq.f32.partialorder %v10915_v49, 0.0 }
 0x198   :  { %v610_v54 = vsel %vm609_vm2, %v544_v29, %v608_v15  ;;  %v627_v45 = vsel %vm625_vm1, %v626_v47, %v624_v41  ;;  %v640_v47 = vand.u32 2147483648, %v10912_v22 }
 0x199   :  { %v10240_v50 = vpop.eup %10239  ;;  %v10918_v53 = vpop.xlane.xlu0 %563  ;;  %v613_v6 = vsel %vm611_vm3, %v612_v40, %v610_v54  ;;  %v833_v36 = vadd.f32 1e-08, %v627_v45  ;;  %v661_v40 = vand.u32 2147483648, %v10915_v49 }
 0x19a   :  { %v629_v52 = vmul.f32 %v10240_v50, %v550_v30  ;;  %10249 = vrsqrt.f32 %v10918_v53  ;;  %v10921_v34 = vpop.xlane.xlu1 %553  ;;  %v831_v29 = vadd.f32 1e-08, %v613_v6  ;;  %vm679_vm14 = vcmp.eq.f32.partialorder %v10918_v53, inf }
 0x19b   :  { %10251 = vrsqrt.f32 %v10921_v34  ;;  %vm681_vm15 = vcmp.eq.f32.partialorder %v10918_v53, 0.0  ;;  %vm644_vm0 = vcmp.eq.f32.partialorder %v10921_v34, inf  ;;  %vm646_vm1 = vcmp.eq.f32.partialorder %v10921_v34, 0.0 }
 0x19c   :  { %v10242_v61 = vpop.eup %10241  ;;  %v631_v16 = vsel %vm630_vm4, %v550_v30, %v629_v52 }
 0x19d   :  { %v10244_v1 = vpop.eup %10243  ;;  %v650_v51 = vmul.f32 %v10242_v61, %v10909_v32  ;;  %v10928_v11 = vpop.xlane.xlu0 %559  ;;  %v634_v37 = vsel %vm632_vm5, %v633_v62, %v631_v16  ;;  %v682_v16 = vand.u32 2147483648, %v10918_v53 }
 0x19e   :  { %v615_v24 = vmul.f32 %v10244_v1, %v546_v25  ;;  %10253 = vrsqrt.f32 %v10928_v11  ;;  %v10931_v27 = vpop.xlane.xlu1 %565  ;;  %v834_v45 = vadd.f32 1e-08, %v634_v37  ;;  %vm665_vm2 = vcmp.eq.f32.partialorder %v10928_v11, inf }
 0x19f   :  { %10255 = vrsqrt.f32 %v10931_v27  ;;  %v652_v15 = vsel %vm651_vm6, %v10909_v32, %v650_v51  ;;  %vm686_vm3 = vcmp.eq.f32.partialorder %v10931_v27, inf  ;;  %vm667_vm4 = vcmp.eq.f32.partialorder %v10928_v11, 0.0 }
 0x1a0   :  { %v10246_v44 = vpop.eup %10245  ;;  %v617_v28 = vsel %vm616_vm8, %v546_v25, %v615_v24  ;;  %10257 = vrcp.f32 %v833_v36  ;;  %v655_v62 = vsel %vm653_vm7, %v654_v58, %v652_v15  ;;  %vm688_vm5 = vcmp.eq.f32.partialorder %v10931_v27, 0.0 }
 0x1a1   :  { %v10248_v18 = vpop.eup %10247  ;;  %v620_v50 = vsel %vm618_vm9, %v619_v23, %v617_v28  ;;  %v636_v41 = vmul.f32 %v10246_v44, %v10912_v22  ;;  %10259 = vrcp.f32 %v831_v29  ;;  %v837_v58 = vadd.f32 1e-08, %v655_v62 }
 0x1a2   :  { %v657_v54 = vmul.f32 %v10248_v18, %v10915_v49  ;;  %v10945_v25 = vpop.xlane.xlu1 %561  ;;  %v832_v30 = vadd.f32 1e-08, %v620_v50  ;;  %v647_v18 = vand.u32 2147483648, %v10921_v34  ;;  %v689_v62 = vand.u32 2147483648, %v10931_v27 }
 0x1a3   :  { %v638_v52 = vsel %vm637_vm10, %v10912_v22, %v636_v41  ;;  %10261 = vrsqrt.f32 %v10945_v25  ;;  %vm672_vm6 = vcmp.eq.f32.partialorder %v10945_v25, inf  ;;  %vm674_vm7 = vcmp.eq.f32.partialorder %v10945_v25, 0.0 }
 0x1a4   :  { %v10250_v61 = vpop.eup %10249  ;;  %v659_v1 = vsel %vm658_vm12, %v10915_v49, %v657_v54  ;;  %v641_v6 = vsel %vm639_vm11, %v640_v47, %v638_v52  ;;  %10263 = vrcp.f32 %v832_v30 }
 0x1a5   :  { %v678_v51 = vmul.f32 %v10250_v61, %v10918_v53  ;;  %v10252_v32 = vpop.eup %10251  ;;  %v662_v22 = vsel %vm660_vm13, %v661_v40, %v659_v1  ;;  %10265 = vrcp.f32 %v834_v45  ;;  %v835_v23 = vadd.f32 1e-08, %v641_v6 }
 0x1a6   :  { %v643_v29 = vmul.f32 %v10252_v32, %v10921_v34  ;;  %v838_v49 = vadd.f32 1e-08, %v662_v22  ;;  %v668_v40 = vand.u32 2147483648, %v10928_v11 }
 0x1a7   :  { %v680_v24 = vsel %vm679_vm14, %v10918_v53, %v678_v51 }
 0x1a8   :  { %v10254_v36 = vpop.eup %10253  ;;  %v683_v44 = vsel %vm681_vm15, %v682_v16, %v680_v24  ;;  %v645_v53 = vsel %vm644_vm0, %v10921_v34, %v643_v29 }
 0x1a9   :  { %v10256_v28 = vpop.eup %10255  ;;  %v664_v37 = vmul.f32 %v10254_v36, %v10928_v11  ;;  %v10969_v15 = vpop.xlane.xlu0 %579  ;;  %v841_v41 = vadd.f32 1e-08, %v683_v44  ;;  %v648_v47 = vsel %vm646_vm1, %v647_v18, %v645_v53 }
 0x1aa   :  { %v685_v50 = vmul.f32 %v10256_v28, %v10931_v27  ;;  %10267 = vrsqrt.f32 %v10969_v15  ;;  %v836_v52 = vadd.f32 1e-08, %v648_v47  ;;  %v10258_v45 = vpop.eup %10257  ;;  %vm735_vm8 = vcmp.eq.f32.partialorder %v10969_v15, inf }
 0x1ab   :  { %10269 = vrcp.f32 %v837_v58  ;;  %v666_v54 = vsel %vm665_vm2, %v10928_v11, %v664_v37  ;;  %v10979_v30 = vpop.xlane.xlu1 %581  ;;  %v10260_v34 = vpop.eup %10259  ;;  %v675_v11 = vand.u32 2147483648, %v10945_v25  ;;  %v929_v36 = vmul.f32 %v10258_v45, %v10739_v2 }
 0x1ac   :  { %10271 = vrcp.f32 %v835_v23  ;;  %v687_v61 = vsel %vm686_vm3, %v10931_v27, %v685_v50  ;;  %v669_v6 = vsel %vm667_vm4, %v668_v40, %v666_v54  ;;  %v927_v27 = vmul.f32 %v10260_v34, %v10742_v5 }
 0x1ad   :  { %10273 = vrsqrt.f32 %v10979_v30  ;;  %v10986_v1 = vpop.xlane.xlu0 %575  ;;  %v10262_v51 = vpop.eup %10261  ;;  %v690_v16 = vsel %vm688_vm5, %v689_v62, %v687_v61  ;;  %v839_v22 = vadd.f32 1e-08, %v669_v6  ;;  %vm737_vm9 = vcmp.eq.f32.partialorder %v10969_v15, 0.0 }
 0x1ae   :  { %10275 = vrcp.f32 %v838_v49  ;;  %v671_v32 = vmul.f32 %v10262_v51, %v10945_v25  ;;  %v10264_v58 = vpop.eup %10263  ;;  %v842_v44 = vadd.f32 1e-08, %v690_v16  ;;  %v738_v28 = vand.u32 2147483648, %v10969_v15 }
 0x1af   :  { %10277 = vrcp.f32 %v841_v41  ;;  %v10266_v23 = vpop.eup %10265  ;;  %vm742_vm10 = vcmp.eq.f32.partialorder %v10979_v30, inf  ;;  %vm744_vm11 = vcmp.eq.f32.partialorder %v10979_v30, 0.0  ;;  %v745_v37 = vand.u32 2147483648, %v10979_v30 }
 0x1b0   :  { %10279 = vrcp.f32 %v836_v52  ;;  %v673_v29 = vsel %vm672_vm6, %v10945_v25, %v671_v32  ;;  %v928_v49 = vmul.f32 %v10264_v58, %v10752_v12  ;;  %vm721_vm12 = vcmp.eq.f32.partialorder %v10986_v1, inf }
 0x1b1   :  { %10281 = vrsqrt.f32 %v10986_v1  ;;  %v10994_v24 = vpop.xlane.xlu0 %577  ;;  %v676_v2 = vsel %vm674_vm7, %v675_v11, %v673_v29  ;;  %v930_v47 = vmul.f32 %v10266_v23, %v10746_v7  ;;  %vm723_vm13 = vcmp.eq.f32.partialorder %v10986_v1, 0.0 }
 0x1b2   :  { %10283 = vrsqrt.f32 %v10994_v24  ;;  %v724_v25 = vand.u32 2147483648, %v10986_v1  ;;  %vm728_vm14 = vcmp.eq.f32.partialorder %v10994_v24, inf  ;;  %v840_v52 = vadd.f32 1e-08, %v676_v2 }
 0x1b3   :  { %v11005_v18 = vpop.xlane.xlu1 %589  ;;  %vm730_vm15 = vcmp.eq.f32.partialorder %v10994_v24, 0.0  ;;  %v731_v61 = vand.u32 2147483648, %v10994_v24  ;;  %v11034_v6 = vpack.c.bf16 %v928_v49, %v927_v27  ;;  %v11043_v11 = vpack.c.bf16 %v930_v47, %v929_v36 }
 0x1b4   :  { %v10268_v5 = vpop.eup %10267  ;;  %10285 = vrsqrt.f32 %v11005_v18  ;;  %vm770_vm0 = vcmp.eq.f32.partialorder %v11005_v18, inf  ;;  %vm772_vm1 = vcmp.eq.f32.partialorder %v11005_v18, 0.0  ;;  %v773_v16 = vand.u32 2147483648, %v11005_v18 }
 0x1b5   :  { %v11012_v53 = vpop.eup %10269  ;;  %10287 = vrcp.f32 %v839_v22  ;;  %v734_v50 = vmul.f32 %v10268_v5, %v10969_v15  ;;  %v11016_v41 = vpop.xlane.xlu0 %587 }
 0x1b6   :  { %v10272_v54 = vpop.eup %10271  ;;  %10289 = vrcp.f32 %v842_v44  ;;  %vm763_vm2 = vcmp.eq.f32.partialorder %v11016_v41, inf  ;;  %vm765_vm3 = vcmp.eq.f32.partialorder %v11016_v41, 0.0  ;;  %v766_v2 = vand.u32 2147483648, %v11016_v41 }
 0x1b7   :  { %v10274_v12 = vpop.eup %10273  ;;  %v736_v40 = vsel %vm735_vm8, %v10969_v15, %v734_v50  ;;  %10291 = vrsqrt.f32 %v11016_v41  ;;  %v11028_v7 = vpop.xlane.xlu1 %585  ;;  %v931_v27 = vmul.f32 %v10272_v54, %v10760_v19 }
 0x1b8   :  { %v10276_v45 = vpop.eup %10275  ;;  %v739_v62 = vsel %vm737_vm9, %v738_v28, %v736_v40  ;;  %v741_v34 = vmul.f32 %v10274_v12, %v10979_v30  ;;  %10293 = vrsqrt.f32 %v11028_v7  ;;  %vm756_vm4 = vcmp.eq.f32.partialorder %v11028_v7, inf }
 0x1b9   :  { %v11036_v51 = vpop.eup %10277  ;;  %v11041_v32 = vpop.xlane.xlu0 %583  ;;  %v849_v58 = vadd.f32 1e-08, %v739_v62  ;;  %v11056_v36 = vmul.f32 %v10276_v45, %v10764_v21  ;;  %vm758_vm5 = vcmp.eq.f32.partialorder %v11028_v7, 0.0 }
 0x1ba   :  { %v10280_v15 = vpop.eup %10279  ;;  %v743_v22 = vsel %vm742_vm10, %v10979_v30, %v741_v34  ;;  %10295 = vrsqrt.f32 %v11041_v32  ;;  %v759_v30 = vand.u32 2147483648, %v11028_v7  ;;  %vm749_vm6 = vcmp.eq.f32.partialorder %v11041_v32, inf }
 0x1bb   :  { %v10282_v23 = vpop.eup %10281  ;;  %10297 = vrcp.f32 %v840_v52  ;;  %v746_v44 = vsel %vm744_vm11, %v745_v37, %v743_v22  ;;  %v11053_v29 = vpop.xlane.xlu1 %597  ;;  %v932_v21 = vmul.f32 %v10280_v15, %v10772_v31  ;;  %vm751_vm7 = vcmp.eq.f32.partialorder %v11041_v32, 0.0 }
 0x1bc   :  { %v10284_v28 = vpop.eup %10283  ;;  %v720_v5 = vmul.f32 %v10282_v23, %v10986_v1  ;;  %10299 = vrsqrt.f32 %v11053_v29  ;;  %v850_v50 = vadd.f32 1e-08, %v746_v44  ;;  %vm798_vm8 = vcmp.eq.f32.partialorder %v11053_v29, inf }
 0x1bd   :  { %v727_v19 = vmul.f32 %v10284_v28, %v10994_v24  ;;  %v11066_v37 = vpop.xlane.xlu0 %595  ;;  %10301 = vrcp.f32 %v849_v58  ;;  %v11097_v23 = vpack.c.bf16 %v932_v21, %v931_v27  ;;  %vm800_vm9 = vcmp.eq.f32.partialorder %v11053_v29, 0.0 }
 0x1be   :  { %v10286_v49 = vpop.eup %10285  ;;  %v722_v47 = vsel %vm721_vm12, %v10986_v1, %v720_v5  ;;  %10303 = vrsqrt.f32 %v11066_v37  ;;  %v752_v1 = vand.u32 2147483648, %v11041_v32  ;;  %vm791_vm10 = vcmp.eq.f32.partialorder %v11066_v37, inf }
 0x1bf   :  { %v11073_v54 = vpop.eup %10287  ;;  %v725_v12 = vsel %vm723_vm13, %v724_v25, %v722_v47  ;;  %v729_v52 = vsel %vm728_vm14, %v10994_v24, %v727_v19  ;;  %v769_v31 = vmul.f32 %v10286_v49, %v11005_v18  ;;  %v11083_v40 = vpop.xlane.xlu1 %593  ;;  %v801_v19 = vand.u32 2147483648, %v11053_v29 }
 0x1c0   :  { %v11085_v45 = vpop.eup %10289  ;;  %v847_v62 = vadd.f32 1e-08, %v725_v12  ;;  %v732_v34 = vsel %vm730_vm15, %v731_v61, %v729_v52  ;;  %10305 = vrsqrt.f32 %v11083_v40  ;;  %vm793_vm11 = vcmp.eq.f32.partialorder %v11066_v37, 0.0 }
 0x1c1   :  { %v10292_v25 = vpop.eup %10291  ;;  %v848_v15 = vadd.f32 1e-08, %v732_v34  ;;  %v771_v58 = vsel %vm770_vm0, %v11005_v18, %v769_v31  ;;  %v11095_v22 = vpop.xlane.xlu0 %591  ;;  %10307 = vrcp.f32 %v850_v50  ;;  %v794_v34 = vand.u32 2147483648, %v11066_v37 }
 0x1c2   :  { %v10294_v44 = vpop.eup %10293  ;;  %v774_v24 = vsel %vm772_vm1, %v773_v16, %v771_v58  ;;  %v762_v61 = vmul.f32 %v10292_v25, %v11016_v41  ;;  %10309 = vrcp.f32 %v847_v62  ;;  %vm784_vm12 = vcmp.eq.f32.partialorder %v11083_v40, inf }
 0x1c3   :  { %v854_v28 = vadd.f32 1e-08, %v774_v24  ;;  %v755_v5 = vmul.f32 %v10294_v44, %v11028_v7  ;;  %v11105_v49 = vpop.xlane.xlu1 %569  ;;  %10311 = vrsqrt.f32 %v11095_v22  ;;  %vm786_vm13 = vcmp.eq.f32.partialorder %v11083_v40, 0.0 }
 0x1c4   :  { %v10296_v47 = vpop.eup %10295  ;;  %v764_v27 = vsel %vm763_vm2, %v11016_v41, %v762_v61  ;;  %10313 = vrcp.f32 %v848_v15  ;;  %v787_v61 = vand.u32 2147483648, %v11083_v40  ;;  %vm777_vm14 = vcmp.eq.f32.partialorder %v11095_v22, inf }
 0x1c5   :  { %v11113_v18 = vpop.eup %10297  ;;  %v767_v16 = vsel %vm765_vm3, %v766_v2, %v764_v27  ;;  %v757_v21 = vsel %vm756_vm4, %v11028_v7, %v755_v5  ;;  %v748_v50 = vmul.f32 %v10296_v47, %v11041_v32  ;;  %v11121_v12 = vpop.xlane.xlu0 %567  ;;  %10315 = vrsqrt.f32 %v11105_v49 }
 0x1c6   :  { %v10300_v52 = vpop.eup %10299  ;;  %v853_v31 = vadd.f32 1e-08, %v767_v16  ;;  %v760_v62 = vsel %vm758_vm5, %v759_v30, %v757_v21  ;;  %10317 = vrcp.f32 %v854_v28  ;;  %vm779_vm15 = vcmp.eq.f32.partialorder %v11095_v22, 0.0 }
 0x1c7   :  { %v852_v41 = vadd.f32 1e-08, %v760_v62  ;;  %v750_v2 = vsel %vm749_vm6, %v11041_v32, %v748_v50  ;;  %v797_v25 = vmul.f32 %v10300_v52, %v11053_v29  ;;  %v11131_v15 = vpop.xlane.xlu1 %601  ;;  %v11133_v58 = vpop.eup %10301  ;;  %vm700_vm0 = vcmp.eq.f32.partialorder %v11105_v49, inf }
 0x1c8   :  { %10319 = vrcp.f32 %v853_v31  ;;  %v753_v7 = vsel %vm751_vm7, %v752_v1, %v750_v2  ;;  %v10304_v30 = vpop.eup %10303  ;;  %vm702_vm1 = vcmp.eq.f32.partialorder %v11105_v49, 0.0  ;;  %vm693_vm2 = vcmp.eq.f32.partialorder %v11121_v12, inf }
 0x1c9   :  { %10321 = vrcp.f32 %v852_v41  ;;  %v851_v44 = vadd.f32 1e-08, %v753_v7  ;;  %v799_v24 = vsel %vm798_vm8, %v11053_v29, %v797_v25  ;;  %v11143_v28 = vpop.xlane.xlu0 %599  ;;  %v790_v1 = vmul.f32 %v10304_v30, %v11066_v37 }
 0x1ca   :  { %v10306_v5 = vpop.eup %10305  ;;  %v802_v32 = vsel %vm800_vm9, %v801_v19, %v799_v24  ;;  %10323 = vrsqrt.f32 %v11121_v12  ;;  %v780_v19 = vand.u32 2147483648, %v11095_v22  ;;  %v703_v7 = vand.u32 2147483648, %v11105_v49 }
 0x1cb   :  { %10325 = vrcp.f32 %v851_v44  ;;  %v858_v47 = vadd.f32 1e-08, %v802_v32  ;;  %v783_v27 = vmul.f32 %v10306_v5, %v11083_v40  ;;  %v11152_v16 = vpop.xlane.xlu1 %605  ;;  %v11154_v21 = vpop.eup %10307  ;;  %v792_v29 = vsel %vm791_vm10, %v11066_v37, %v790_v1 }
 0x1cc   :  { %10327 = vrsqrt.f32 %v11131_v15  ;;  %v10310_v50 = vpop.eup %10309  ;;  %v795_v52 = vsel %vm793_vm11, %v794_v34, %v792_v29  ;;  %vm695_vm3 = vcmp.eq.f32.partialorder %v11121_v12, 0.0  ;;  %v696_v24 = vand.u32 2147483648, %v11121_v12 }
 0x1cd   :  { %10329 = vrcp.f32 %v858_v47  ;;  %v785_v31 = vsel %vm784_vm12, %v11083_v40, %v783_v27  ;;  %v11168_v62 = vpop.xlane.xlu0 %603  ;;  %v10312_v41 = vpop.eup %10311  ;;  %v857_v2 = vadd.f32 1e-08, %v795_v52  ;;  %vm812_vm4 = vcmp.eq.f32.partialorder %v11131_v15, inf }
 0x1ce   :  { %v788_v25 = vsel %vm786_vm13, %v787_v61, %v785_v31  ;;  %10331 = vrsqrt.f32 %v11143_v28  ;;  %v10314_v30 = vpop.eup %10313  ;;  %v776_v34 = vmul.f32 %v10312_v41, %v11095_v22  ;;  %vm814_vm5 = vcmp.eq.f32.partialorder %v11131_v15, 0.0 }
 0x1cf   :  { %v856_v37 = vadd.f32 1e-08, %v788_v25  ;;  %10333 = vrsqrt.f32 %v11152_v16  ;;  %v10316_v44 = vpop.eup %10315  ;;  %v11180_v40 = vpop.xlane.xlu1 %573  ;;  %v815_v29 = vand.u32 2147483648, %v11131_v15  ;;  %vm805_vm6 = vcmp.eq.f32.partialorder %v11143_v28, inf }
 0x1d0   :  { %10335 = vrcp.f32 %v857_v2  ;;  %v11182_v61 = vpop.eup %10317  ;;  %v778_v5 = vsel %vm777_vm14, %v11095_v22, %v776_v34  ;;  %v699_v32 = vmul.f32 %v10316_v44, %v11105_v49  ;;  %vm807_vm7 = vcmp.eq.f32.partialorder %v11143_v28, 0.0 }
 0x1d1   :  { %10337 = vrcp.f32 %v856_v37  ;;  %v11189_v1 = vpop.xlane.xlu0 %571  ;;  %v781_v27 = vsel %vm779_vm15, %v780_v19, %v778_v5  ;;  %v808_v19 = vand.u32 2147483648, %v11143_v28  ;;  %vm826_vm8 = vcmp.eq.f32.partialorder %v11152_v16, inf }
 0x1d2   :  { %v11191_v47 = vpop.eup %10319  ;;  %10339 = vrsqrt.f32 %v11168_v62  ;;  %v855_v31 = vadd.f32 1e-08, %v781_v27  ;;  %v701_v41 = vsel %vm700_vm0, %v11105_v49, %v699_v32  ;;  %vm828_vm9 = vcmp.eq.f32.partialorder %v11152_v16, 0.0 }
 0x1d3   :  { %v10322_v52 = vpop.eup %10321  ;;  %10341 = vrsqrt.f32 %v11180_v40  ;;  %v704_v22 = vsel %vm702_vm1, %v703_v7, %v701_v41  ;;  %v829_v34 = vand.u32 2147483648, %v11152_v16  ;;  %vm819_vm10 = vcmp.eq.f32.partialorder %v11168_v62, inf }
 0x1d4   :  { %v10324_v2 = vpop.eup %10323  ;;  %10343 = vrsqrt.f32 %v11189_v1  ;;  %v822_v49 = vand.u32 2147483648, %v11168_v62  ;;  %v943_v7 = vmul.f32 %v10310_v50, %v10810_v57  ;;  %v944_v5 = vmul.f32 %v10314_v30, %v10819_v3 }
 0x1d5   :  { %v10326_v25 = vpop.eup %10325  ;;  %10345 = vrcp.f32 %v855_v31  ;;  %v692_v37 = vmul.f32 %v10324_v2, %v11121_v12  ;;  %v844_v27 = vadd.f32 1e-08, %v704_v22  ;;  %vm821_vm11 = vcmp.eq.f32.partialorder %v11168_v62, 0.0 }
 0x1d6   :  { %v10328_v44 = vpop.eup %10327  ;;  %vm714_vm12 = vcmp.eq.f32.partialorder %v11180_v40, inf  ;;  %v945_v2 = vmul.f32 %v11133_v58, %v10807_v56  ;;  %vm716_vm13 = vcmp.eq.f32.partialorder %v11180_v40, 0.0  ;;  %v11228_v3 = vpack.c.bf16 %v944_v5, %v943_v7 }
 0x1d7   :  { %v11215_v32 = vpop.eup %10329  ;;  %v694_v31 = vsel %vm693_vm2, %v11121_v12, %v692_v37  ;;  %v811_v41 = vmul.f32 %v10328_v44, %v11131_v15  ;;  %v946_v50 = vmul.f32 %v11154_v21, %v10812_v60  ;;  %v947_v30 = vmul.f32 %v10326_v25, %v10837_v26 }
 0x1d8   :  { %v10332_v59 = vpop.eup %10331  ;;  %v697_v57 = vsel %vm695_vm3, %v696_v24, %v694_v31  ;;  %v717_v12 = vand.u32 2147483648, %v11180_v40  ;;  %8622 = vmatprep.subr.bf16.mxu1 %v11228_v3  ;;  %v948_v26 = vmul.f32 %v10322_v52, %v10833_v14  ;;  %vm707_vm14 = vcmp.eq.f32.partialorder %v11189_v1, inf }
 0x1d9   :  { %v10334_v22 = vpop.eup %10333  ;;  %v843_v37 = vadd.f32 1e-08, %v697_v57  ;;  %v813_v44 = vsel %vm812_vm4, %v11131_v15, %v811_v41  ;;  %v804_v56 = vmul.f32 %v10332_v59, %v11143_v28  ;;  %v11242_v60 = vpack.c.bf16 %v946_v50, %v945_v2  ;;  %8623 = vmatpush3.bf16.msra.mxu1 %v11034_v6 }
 0x1da   :  { %v10336_v58 = vpop.eup %10335  ;;  %v816_v24 = vsel %vm814_vm5, %v815_v29, %v813_v44  ;;  %v825_v7 = vmul.f32 %v10334_v22, %v11152_v16  ;;  %vm709_vm15 = vcmp.eq.f32.partialorder %v11189_v1, 0.0  ;;  %10347 = vrcp.f32 %v844_v27 }
 0x1db   :  { %v10338_v21 = vpop.eup %10337  ;;  %v860_v25 = vadd.f32 1e-08, %v816_v24  ;;  %v806_v59 = vsel %vm805_vm6, %v11143_v28, %v804_v56  ;;  %8624 = vmatprep.subr.bf16.mxu1 %v11242_v60  ;;  %v11257_v52 = vpack.c.bf16 %v948_v26, %v947_v30  ;;  %v949_v57 = vmul.f32 %v11191_v47, %v10826_v13 }
 0x1dc   :  { %v10340_v15 = vpop.eup %10339  ;;  %v809_v29 = vsel %vm807_vm7, %v808_v19, %v806_v59  ;;  %v827_v14 = vsel %vm826_vm8, %v11152_v16, %v825_v7  ;;  %v710_v16 = vand.u32 2147483648, %v11189_v1  ;;  %v950_v13 = vmul.f32 %v11182_v61, %v10829_v10 }
 0x1dd   :  { %v10342_v5 = vpop.eup %10341  ;;  %10349 = vrcp.f32 %v860_v25  ;;  %v859_v31 = vadd.f32 1e-08, %v809_v29  ;;  %v830_v41 = vsel %vm828_vm9, %v829_v34, %v827_v14  ;;  %v818_v2 = vmul.f32 %v10340_v15, %v11168_v62  ;;  %8625 = vmatpush3.bf16.msra.mxu1 %v11043_v11 }
 0x1de   :  { %v10344_v27 = vpop.eup %10343  ;;  %10351 = vrcp.f32 %v843_v37  ;;  %v862_v28 = vadd.f32 1e-08, %v830_v41  ;;  %v713_v19 = vmul.f32 %v10342_v5, %v11180_v40  ;;  %8626 = vmatprep.subr.bf16.mxu1 %v11257_v52  ;;  %v11287_v7 = vpack.c.bf16 %v950_v13, %v949_v57  ;;  %v9413_v41 = vld [vmem:[%s13529_s3 + $0x24] ss:$8 sps:$4 sm:$0xff]   ;;  %v9421_v57 = vld [vmem:[%s13529_s3 + $0x40] ss:$8 sps:$4 sm:$0xff]  }
 0x1df   :  { %v10346_v50 = vpop.eup %10345  ;;  %10353 = vrcp.f32 %v859_v31  ;;  %v820_v30 = vsel %vm819_vm10, %v11168_v62, %v818_v2  ;;  %v706_v22 = vmul.f32 %v10344_v27, %v11189_v1  ;;  %v952_v26 = vmul.f32 %v10338_v21, %v10854_v46  ;;  %v13540_v31 = vld [vmem:[#allocation2_spill] sm:$0xff]  ;;  %v9416_v27 = vld [vmem:[%s13529_s3 + $0x34] ss:$8 sps:$4 sm:$0xff]  }
 0x1e0   :  { %v823_v34 = vsel %vm821_vm11, %v822_v49, %v820_v30  ;;  %v715_v37 = vsel %vm714_vm12, %v11180_v40, %v713_v19  ;;  %v951_v47 = vmul.f32 %v10346_v50, %v10860_v43  ;;  %10355 = vrcp.f32 %v862_v28  ;;  %v9415_v2 = vld [vmem:[%s13529_s3 + $0x20] ss:$8 sps:$4 sm:$0xff]   ;;  %v9418_v28 = vld [vmem:[%s13529_s3 + $0x30] ss:$8 sps:$4 sm:$0xff]   ;;  %v9419_v19 = vld [vmem:[%s13529_s3 + $0x44] ss:$8 sps:$4 sm:$0xff]  }
 0x1e1   :  { %v861_v44 = vadd.f32 1e-08, %v823_v34  ;;  %v718_v56 = vsel %vm716_vm13, %v717_v12, %v715_v37  ;;  %v708_v62 = vsel %vm707_vm14, %v11189_v1, %v706_v22  ;;  %8627 = vmatpush3.bf16.msra.mxu1 %v11097_v23  ;;  %v933_v43 = vmul.f32 %v11012_v53, %v10757_v0  ;;  %v9422_v50 = vld [vmem:[%s13529_s3 + $0x54] ss:$8 sps:$4 sm:$0xff]   ;;  %v9467_v30 = vld [vmem:[%s13530_s4] ss:$8 sps:$4 sm:$0xff]  }
 0x1e2   :  { %v846_v49 = vadd.f32 1e-08, %v718_v56  ;;  %v711_v24 = vsel %vm709_vm15, %v710_v16, %v708_v62  ;;  %8628 = vmatprep.subr.bf16.mxu1 %v11287_v7  ;;  %v11294_v40 = vpack.c.bf16 %v952_v26, %v951_v47  ;;  %v936_v1 = vmul.f32 %v11113_v18, %v10796_v48  ;;  %v9469_v22 = vld [vmem:[%s13530_s4 + $0x4] ss:$8 sps:$4 sm:$0xff]   ;;  %v9424_v16 = vld [vmem:[%s13529_s3 + $0x50] ss:$8 sps:$4 sm:$0xff]  }
 0x1e3   :  { %10357 = vrcp.f32 %v861_v44  ;;  %v845_v10 = vadd.f32 1e-08, %v711_v24  ;;  %v11297_v61 = vpack.c.bf16 %v11056_v36, %v933_v43  ;;  %v953_v12 = vmul.f32 %v10336_v58, %v10846_v33  ;;  %1294 = vmatprep.subr.bf16.mxu0 %v9469_v22  ;;  %v9425_v34 = vld [vmem:[%s13529_s3 + $0x64] ss:$8 sps:$4 sm:$0xff]   ;;  %v9473_v37 = vld [vmem:[%s13530_s4 + $0x10] ss:$8 sps:$4 sm:$0xff]  }
 0x1e4   :  { %10359 = vrcp.f32 %v846_v49  ;;  %v10348_v46 = vpop.eup %10347  ;;  %v935_v0 = vmul.f32 %v11073_v54, %v10780_v35  ;;  %v954_v25 = vmul.f32 %v11215_v32, %v10849_v42  ;;  %v938_v48 = vmul.f32 %v11085_v45, %v10784_v39  ;;  %1295 = vmatpush1.bf16.msra.mxu0 %v9467_v30  ;;  %v9475_v13 = vld [vmem:[%s13530_s4 + $0x14] ss:$8 sps:$4 sm:$0xff]   ;;  %v9427_v47 = vld [vmem:[%s13529_s3 + $0x60] ss:$8 sps:$4 sm:$0xff]   ;;  %v9481_v62 = vld [vmem:[%s13530_s4 + $0x24] ss:$8 sps:$4 sm:$0xff]  }
 0x1e5   :  { %10361 = vrcp.f32 %v845_v10  ;;  %8629 = vmatpush3.bf16.msra.mxu1 %v11297_v61  ;;  %v937_v35 = vmul.f32 %v11036_v51, %v10777_v17  ;;  %v940_v14 = vmul.f32 %v10348_v46, %v10866_v38  ;;  %v9407_v38 = vld [vmem:[%s13529_s3] ss:$8 sps:$4 sm:$0xff]   ;;  %1296 = vmatprep.subr.bf16.mxu0 %v9475_v13  ;;  %v9428_v44 = vld [vmem:[%s13529_s3 + $0x74] ss:$8 sps:$4 sm:$0xff]   ;;  %v9485_v49 = vld [vmem:[%s13530_s4 + $0x30] ss:$8 sps:$4 sm:$0xff]  }
 0x1e6   :  { %8630 = vmatprep.subr.bf16.mxu1 %v11294_v40  ;;  %v11308_v59 = vpack.c.bf16 %v936_v1, %v935_v0  ;;  %v11312_v18 = vpack.c.bf16 %v954_v25, %v953_v12  ;;  %v9479_v56 = vld [vmem:[%s13530_s4 + $0x20] ss:$8 sps:$4 sm:$0xff]   ;;  %v9487_v24 = vld [vmem:[%s13530_s4 + $0x34] ss:$8 sps:$4 sm:$0xff]   ;;  %v9430_v26 = vld [vmem:[%s13529_s3 + $0x70] ss:$8 sps:$4 sm:$0xff]  }
 0x1e7   :  { %v10350_v21 = vpop.eup %10349  ;;  %v11322_v32 = vpack.c.bf16 %v938_v48, %v937_v35  ;;  %v9431_v10 = vld [vmem:[%s13529_s3 + $0x84] ss:$8 sps:$4 sm:$0xff]   ;;  %v9491_v43 = vld [vmem:[%s13530_s4 + $0x40] ss:$8 sps:$4 sm:$0xff]   ;;  %v9436_v12 = vld [vmem:[%s13529_s3 + $0x94] ss:$8 sps:$4 sm:$0xff]  }
 0x1e8   :  { %v10352_v53 = vpop.eup %10351  ;;  %v956_v58 = vmul.f32 %v10350_v21, %v10876_v4  ;;  %1297 = vmatpush1.bf16.msra.mxu0 %v9473_v37  ;;  %v9493_v1 = vld [vmem:[%s13530_s4 + $0x44] ss:$8 sps:$4 sm:$0xff]   ;;  %v9433_v46 = vld [vmem:[%s13529_s3 + $0x80] ss:$8 sps:$4 sm:$0xff]   ;;  %v9497_v21 = vld [vmem:[%s13530_s4 + $0x50] ss:$8 sps:$4 sm:$0xff]  }
 0x1e9   :  { %v10354_v36 = vpop.eup %10353  ;;  %8631 = vmatpush3.bf16.msra.mxu1 %v11308_v59  ;;  %v939_v39 = vmul.f32 %v10352_v53, %v10872_v63  ;;  %1298 = vmatprep.subr.bf16.mxu0 %v9481_v62  ;;  %v9499_v0 = vld [vmem:[%s13530_s4 + $0x54] ss:$8 sps:$4 sm:$0xff]   ;;  %v9434_v53 = vld [vmem:[%s13529_s3 + $0x90] ss:$8 sps:$4 sm:$0xff]   ;;  %v9437_v25 = vld [vmem:[%s13529_s3 + $0xa4] ss:$8 sps:$4 sm:$0xff]  }
 0x1ea   :  { %v955_v33 = vmul.f32 %v10354_v36, %v10880_v8  ;;  %v10356_v15 = vpop.eup %10355  ;;  %8632 = vmatprep.subr.bf16.mxu1 %v11312_v18  ;;  %v9503_v36 = vld [vmem:[%s13530_s4 + $0x60] ss:$8 sps:$4 sm:$0xff]   ;;  %v9505_v48 = vld [vmem:[%s13530_s4 + $0x64] ss:$8 sps:$4 sm:$0xff]   ;;  %v9512_v30 = vld [vmem:[%s13529_s3 + $0x1b0] ss:$8 sps:$4 sm:$0xff]  }
 0x1eb   :  { %v958_v4 = vmul.f32 %v10356_v15, %v10886_v55  ;;  %v11333_v5 = vpack.c.bf16 %v940_v14, %v939_v39  ;;  %v9410_v55 = vld [vmem:[%s13529_s3 + $0x14] ss:$8 sps:$4 sm:$0xff]   ;;  %v9442_v15 = vld [vmem:[%s13529_s3 + $0xb0] ss:$8 sps:$4 sm:$0xff]   ;;  %v9443_v35 = vld [vmem:[%s13529_s3 + $0xc4] ss:$8 sps:$4 sm:$0xff]  }
 0x1ec   :  { %v11320_v42 = vpack.c.bf16 %v956_v58, %v955_v33  ;;  %1299 = vmatpush1.bf16.msra.mxu0 %v9479_v56  ;;  %v9439_v33 = vld [vmem:[%s13529_s3 + $0xa0] ss:$8 sps:$4 sm:$0xff]   ;;  %v9440_v58 = vld [vmem:[%s13529_s3 + $0xb4] ss:$8 sps:$4 sm:$0xff]   ;;  %v9448_v14 = vld [vmem:[%s13529_s3 + $0xd0] ss:$8 sps:$4 sm:$0xff]  }
 0x1ed   :  { %v10358_v54 = vpop.eup %10357  ;;  %8633 = vmatpush3.bf16.msra.mxu1 %v11322_v32  ;;  %1300 = vmatprep.subr.bf16.mxu0 %v9487_v24  ;;  %v9511_v39 = vld [vmem:[%s13530_s4 + $0x74] ss:$8 sps:$4 sm:$0xff]   ;;  %v9520_v24 = vld [vmem:[%s13529_s3 + $0x1c0] ss:$8 sps:$4 sm:$0xff]   ;;  %vm3306_vm0 = vcmask 130048  }
 0x1ee   :  { %v10360_v45 = vpop.eup %10359  ;;  %v957_v8 = vmul.f32 %v10358_v54, %v10888_v9  ;;  %8634 = vmatprep.subr.bf16.mxu1 %v11320_v42  ;;  %v9509_v54 = vld [vmem:[%s13530_s4 + $0x70] ss:$8 sps:$4 sm:$0xff]   ;;  %v9525_v56 = vld [vmem:[%s13530_s4 + $0x94] ss:$8 sps:$4 sm:$0xff]  }
 0x1ef   :  { %v10362_v29 = vpop.eup %10361  ;;  %v942_v63 = vmul.f32 %v10360_v45, %v13540_v31  ;;  %v10435_v45 = vmov 0   ;;  %v9451_v31 = vld [vmem:[%s13529_s3 + $0xe0] ss:$8 sps:$4 sm:$0xff]  }
 0x1f0   :  { %v11330_v17 = vpack.c.bf16 %v958_v4, %v957_v8  ;;  %v941_v51 = vmul.f32 %v10362_v29, %v10898_v20  ;;  %v9412_v20 = vld [vmem:[%s13529_s3 + $0x10] ss:$8 sps:$4 sm:$0xff]   ;;  %1301 = vmatpush1.bf16.msra.mxu0 %v9485_v49  ;;  %1326 = vmatprep.mubr.bf16.mxu0 %v10435_v45  ;;  %v9445_v8 = vld [vmem:[%s13529_s3 + $0xc0] ss:$8 sps:$4 sm:$0xff]   ;;  %v9446_v4 = vld [vmem:[%s13529_s3 + $0xd4] ss:$8 sps:$4 sm:$0xff]  }
 0x1f1   :  { %8635 = vmatpush3.bf16.msra.mxu1 %v11333_v5  ;;  %1302 = vmatprep.subr.bf16.mxu0 %v9493_v1  ;;  %v9517_v29 = vld [vmem:[%s13530_s4 + $0x84] ss:$8 sps:$4 sm:$0xff]   ;;  %v9521_v1 = vld [vmem:[%s13529_s3 + $0x1d4] ss:$8 sps:$4 sm:$0xff]  }
 0x1f2   :  { %v11337_v9 = vpack.c.bf16 %v942_v63, %v941_v51  ;;  %8636 = vmatprep.subr.bf16.mxu1 %v11330_v17  ;;  %v9449_v51 = vld [vmem:[%s13529_s3 + $0xe4] ss:$8 sps:$4 sm:$0xff]   ;;  %v9452_v63 = vld [vmem:[%s13529_s3 + $0xf4] ss:$8 sps:$4 sm:$0xff]  }
 0x1f4   :  { %1303 = vmatpush1.bf16.msra.mxu0 %v9491_v43 }
 0x1f5   :  { %8637 = vmatpush3.bf16.msra.mxu1 %v11337_v9  ;;  %1304 = vmatprep.subr.bf16.mxu0 %v9499_v0  ;;  %v9530_v0 = vld [vmem:[%s13530_s4 + $0xa0] ss:$8 sps:$4 sm:$0xff]  }
 0x1f6   :  { %8692 = vmatprep.subr.bf16.mxu1 %v11228_v3 }
 0x1f8   :  { %1117 = vmatmul.mubr.bf16.vlgmr.msra.gmra.mrb[0].mxu1 %v9407_v38  ;;  %1305 = vmatpush1.bf16.msra.mxu0 %v9497_v21  ;;  %v9454_v38 = vld [vmem:[%s13529_s3 + $0xf0] ss:$8 sps:$4 sm:$0xff]  }
 0x1f9   :  { %8693 = vmatpush3.bf16.msra.mxu1 %v11034_v6  ;;  %1124 = vmatprep.mubr.bf16.mxu1 %v9410_v55  ;;  %v9457_v55 = vld [vmem:[%s13529_s3 + $0x100] ss:$8 sps:$4 sm:$0xff]  }
 0x1fa   :  { %8694 = vmatprep.subr.bf16.mxu1 %v11242_v60  ;;  %1306 = vmatprep.subr.bf16.mxu0 %v9505_v48 }
 0x1fc   :  { %1307 = vmatpush1.bf16.msra.mxu0 %v9503_v36 }
 0x1fd   :  { %8695 = vmatpush3.bf16.msra.mxu1 %v11043_v11  ;;  %1308 = vmatprep.subr.bf16.mxu0 %v9511_v39  ;;  %v9544_v39 = vld [vmem:[%s13530_s4 + $0xc4] ss:$8 sps:$4 sm:$0xff]  }
 0x1fe   :  { %8696 = vmatprep.subr.bf16.mxu1 %v11257_v52 }
 0x200   :  { %1125 = vmatmul.mubr.bf16.gmra.mrb[4].mxu1 %v9412_v20  ;;  %1309 = vmatpush1.bf16.msra.mxu0 %v9509_v54  ;;  %v9458_v20 = vld [vmem:[%s13529_s3 + $0x114] ss:$8 sps:$4 sm:$0xff]   ;;  %v9527_v54 = vld [vmem:[%s13529_s3 + $0x1e4] ss:$8 sps:$4 sm:$0xff]  }
 0x201   :  { %8697 = vmatpush3.bf16.msra.mxu1 %v11097_v23  ;;  %1132 = vmatprep.mubr.bf16.mxu1 %v9413_v41  ;;  %v9460_v41 = vld [vmem:[%s13529_s3 + $0x110] ss:$8 sps:$4 sm:$0xff]  }
 0x202   :  { %8698 = vmatprep.subr.bf16.mxu1 %v11287_v7  ;;  %1784 = vmatprep.subr.bf16.mxu0 %v9517_v29  ;;  %v9542_v29 = vld [vmem:[%s13530_s4 + $0xc0] ss:$8 sps:$4 sm:$0xff]  }
 0x205   :  { %8699 = vmatpush3.bf16.msra.mxu1 %v11297_v61 }
 0x206   :  { %8700 = vmatprep.subr.bf16.mxu1 %v11294_v40 }
 0x208   :  { %1133 = vmatmul.mubr.bf16.gmra.mrb[8].mxu1 %v9415_v2  ;;  %v9463_v2 = vld [vmem:[%s13529_s3 + $0x124] ss:$8 sps:$4 sm:$0xff]  }
 0x209   :  { %8701 = vmatpush3.bf16.msra.mxu1 %v11308_v59  ;;  %1140 = vmatprep.mubr.bf16.mxu1 %v9416_v27  ;;  %v9461_v27 = vld [vmem:[%s13529_s3 + $0x120] ss:$8 sps:$4 sm:$0xff]  }
 0x20a   :  { %8702 = vmatprep.subr.bf16.mxu1 %v11312_v18 }
 0x20d   :  { %8703 = vmatpush3.bf16.msra.mxu1 %v11322_v32 }
 0x20e   :  { %8704 = vmatprep.subr.bf16.mxu1 %v11320_v42 }
 0x210   :  { %1141 = vmatmul.mubr.bf16.gmra.mrb[12].mxu1 %v9418_v28  ;;  %v9464_v28 = vld [vmem:[%s13529_s3 + $0x134] ss:$8 sps:$4 sm:$0xff]  }
 0x211   :  { %8705 = vmatpush3.bf16.msra.mxu1 %v11333_v5  ;;  %1148 = vmatprep.mubr.bf16.mxu1 %v9419_v19  ;;  %v9466_v19 = vld [vmem:[%s13529_s3 + $0x130] ss:$8 sps:$4 sm:$0xff]  }
 0x212   :  { %8706 = vmatprep.subr.bf16.mxu1 %v11330_v17 }
 0x215   :  { %8707 = vmatpush3.bf16.msra.mxu1 %v11337_v9 }
 0x216   :  { %8762 = vmatprep.subr.bf16.mxu1 %v11228_v3 }
 0x218   :  { %1149 = vmatmul.mubr.bf16.gmra.mrb[16].mxu1 %v9421_v57  ;;  %v9470_v57 = vld [vmem:[%s13529_s3 + $0x144] ss:$8 sps:$4 sm:$0xff]  }
 0x219   :  { %1156 = vmatprep.mubr.bf16.mxu1 %v9422_v50 }
 0x220   :  { %1157 = vmatmul.mubr.bf16.gmra.mrb[20].mxu1 %v9424_v16 }
 0x221   :  { %1164 = vmatprep.mubr.bf16.mxu1 %v9425_v34  ;;  %v9518_v34 = vld [vmem:[%s13529_s3 + $0x1c4] ss:$8 sps:$4 sm:$0xff]  }
 0x228   :  { %1165 = vmatmul.mubr.bf16.gmra.mrb[24].mxu1 %v9427_v47  ;;  %v9515_v47 = vld [vmem:[%s13530_s4 + $0x80] ss:$8 sps:$4 sm:$0xff]  }
 0x229   :  { %1172 = vmatprep.mubr.bf16.mxu1 %v9428_v44 }
 0x230   :  { %1173 = vmatmul.mubr.bf16.gmra.mrb[28].mxu1 %v9430_v26  ;;  %v9523_v26 = vld [vmem:[%s13530_s4 + $0x90] ss:$8 sps:$4 sm:$0xff]  }
 0x231   :  { %1180 = vmatprep.mubr.bf16.mxu1 %v9431_v10 }
 0x238   :  { %1181 = vmatmul.mubr.bf16.gmra.mrb[32].mxu1 %v9433_v46  ;;  %v9532_v46 = vld [vmem:[%s13530_s4 + $0xa4] ss:$8 sps:$4 sm:$0xff]  }
 0x239   :  { %1605 = vmatprep.mubr.bf16.mxu1 %v9436_v12 }
 0x240   :  { %1606 = vmatmul.mubr.bf16.vlgmr.msra.gmra.mrb[36].mxu1 %v9434_v53 }
 0x241   :  { %8763 = vmatpush3.bf16.msra.mxu1 %v11034_v6  ;;  %1613 = vmatprep.mubr.bf16.mxu1 %v9437_v25  ;;  %v9538_v25 = vld [vmem:[%s13530_s4 + $0xb4] ss:$8 sps:$4 sm:$0xff]  }
 0x242   :  { %8764 = vmatprep.subr.bf16.mxu1 %v11242_v60 }
 0x245   :  { %8765 = vmatpush3.bf16.msra.mxu1 %v11043_v11 }
 0x246   :  { %8766 = vmatprep.subr.bf16.mxu1 %v11257_v52 }
 0x248   :  { %1614 = vmatmul.mubr.bf16.gmra.mrb[40].mxu1 %v9439_v33  ;;  %v9526_v33 = vld [vmem:[%s13529_s3 + $0x1d0] ss:$8 sps:$4 sm:$0xff]  }
 0x249   :  { %8767 = vmatpush3.bf16.msra.mxu1 %v11097_v23  ;;  %1621 = vmatprep.mubr.bf16.mxu1 %v9440_v58  ;;  %v9536_v58 = vld [vmem:[%s13530_s4 + $0xb0] ss:$8 sps:$4 sm:$0xff]  }
 0x24a   :  { %8768 = vmatprep.subr.bf16.mxu1 %v11287_v7 }
 0x24d   :  { %8769 = vmatpush3.bf16.msra.mxu1 %v11297_v61 }
 0x24e   :  { %8770 = vmatprep.subr.bf16.mxu1 %v11294_v40 }
 0x250   :  { %1622 = vmatmul.mubr.bf16.gmra.mrb[44].mxu1 %v9442_v15 }
 0x251   :  { %8771 = vmatpush3.bf16.msra.mxu1 %v11308_v59  ;;  %1629 = vmatprep.mubr.bf16.mxu1 %v9443_v35 }
 0x252   :  { %8772 = vmatprep.subr.bf16.mxu1 %v11312_v18 }
 0x255   :  { %8773 = vmatpush3.bf16.msra.mxu1 %v11322_v32 }
 0x256   :  { %8774 = vmatprep.subr.bf16.mxu1 %v11320_v42 }
 0x258   :  { %1630 = vmatmul.mubr.bf16.gmra.mrb[48].mxu1 %v9445_v8 }
 0x259   :  { %8775 = vmatpush3.bf16.msra.mxu1 %v11333_v5  ;;  %1637 = vmatprep.mubr.bf16.mxu1 %v9446_v4 }
 0x25a   :  { %8776 = vmatprep.subr.bf16.mxu1 %v11330_v17 }
 0x25d   :  { %8777 = vmatpush3.bf16.msra.mxu1 %v11337_v9 }
 0x25e   :  { %8832 = vmatprep.subr.bf16.mxu1 %v11228_v3  ;;  %v9455_v3 = vld [vmem:[%s13529_s3 + $0x104] ss:$8 sps:$4 sm:$0xff]  }
 0x260   :  { %1638 = vmatmul.mubr.bf16.gmra.mrb[52].mxu1 %v9448_v14 }
 0x261   :  { %1645 = vmatprep.mubr.bf16.mxu1 %v9449_v51  ;;  %v9550_v51 = vld [vmem:[%s13530_s4 + $0xd4] ss:$8 sps:$4 sm:$0xff]  }
 0x268   :  { %1646 = vmatmul.mubr.bf16.gmra.mrb[56].mxu1 %v9451_v31 }
 0x269   :  { %1653 = vmatprep.mubr.bf16.mxu1 %v9452_v63 }
 0x270   :  { %1654 = vmatmul.mubr.bf16.gmra.mrb[60].mxu1 %v9454_v38  ;;  %v9529_v38 = vld [vmem:[%s13529_s3 + $0x1e0] ss:$8 sps:$4 sm:$0xff]  }
 0x271   :  { %1661 = vmatprep.mubr.bf16.mxu1 %v9455_v3  ;;  %v9548_v3 = vld [vmem:[%s13530_s4 + $0xd0] ss:$8 sps:$4 sm:$0xff]  }
 0x278   :  { %1662 = vmatmul.mubr.bf16.gmra.mrb[64].mxu1 %v9457_v55 }
 0x279   :  { %1669 = vmatprep.mubr.bf16.mxu1 %v9458_v20 }
 0x280   :  { %1670 = vmatmul.mubr.bf16.gmra.mrb[68].mxu1 %v9460_v41  ;;  %v9533_v41 = vld [vmem:[%s13529_s3 + $0x1f4] ss:$8 sps:$4 sm:$0xff]  }
 0x281   :  { %2084 = vmatprep.mubr.bf16.mxu1 %v9463_v2  ;;  %v9556_v2 = vld [vmem:[%s13530_s4 + $0xe4] ss:$8 sps:$4 sm:$0xff]  }
 0x288   :  { %2085 = vmatmul.mubr.bf16.vlgmr.msra.gmra.mrb[72].mxu1 %v9461_v27 }
 0x289   :  { %8833 = vmatpush3.bf16.msra.mxu1 %v11034_v6  ;;  %2092 = vmatprep.mubr.bf16.mxu1 %v9464_v28  ;;  %v9472_v6 = vld [vmem:[%s13529_s3 + $0x140] ss:$8 sps:$4 sm:$0xff]  }
 0x28a   :  { %8834 = vmatprep.subr.bf16.mxu1 %v11242_v60  ;;  %v9482_v60 = vld [vmem:[%s13529_s3 + $0x164] ss:$8 sps:$4 sm:$0xff]  }
 0x28d   :  { %8835 = vmatpush3.bf16.msra.mxu1 %v11043_v11  ;;  %v9476_v11 = vld [vmem:[%s13529_s3 + $0x154] ss:$8 sps:$4 sm:$0xff]  }
 0x28e   :  { %8836 = vmatprep.subr.bf16.mxu1 %v11257_v52  ;;  %v9484_v52 = vld [vmem:[%s13529_s3 + $0x160] ss:$8 sps:$4 sm:$0xff]  }
 0x290   :  { %2093 = vmatmul.mubr.bf16.gmra.mrb[76].mxu1 %v9466_v19  ;;  %v9554_v19 = vld [vmem:[%s13530_s4 + $0xe0] ss:$8 sps:$4 sm:$0xff]  }
 0x291   :  { %8837 = vmatpush3.bf16.msra.mxu1 %v11097_v23  ;;  %2100 = vmatprep.mubr.bf16.mxu1 %v9470_v57  ;;  %v9478_v23 = vld [vmem:[%s13529_s3 + $0x150] ss:$8 sps:$4 sm:$0xff]  }
 0x292   :  { %8838 = vmatprep.subr.bf16.mxu1 %v11287_v7  ;;  %v9488_v7 = vld [vmem:[%s13529_s3 + $0x174] ss:$8 sps:$4 sm:$0xff]  }
 0x295   :  { %8839 = vmatpush3.bf16.msra.mxu1 %v11297_v61  ;;  %v9494_v61 = vld [vmem:[%s13529_s3 + $0x184] ss:$8 sps:$4 sm:$0xff]  }
 0x296   :  { %8840 = vmatprep.subr.bf16.mxu1 %v11294_v40  ;;  %v9490_v40 = vld [vmem:[%s13529_s3 + $0x170] ss:$8 sps:$4 sm:$0xff]  }
 0x298   :  { %2101 = vmatmul.mubr.bf16.gmra.mrb[80].mxu1 %v9472_v6  ;;  %v9562_v6 = vld [vmem:[%s13530_s4 + $0xf4] ss:$8 sps:$4 sm:$0xff]  }
 0x299   :  { %8841 = vmatpush3.bf16.msra.mxu1 %v11308_v59  ;;  %2108 = vmatprep.mubr.bf16.mxu1 %v9476_v11  ;;  %v9496_v59 = vld [vmem:[%s13529_s3 + $0x180] ss:$8 sps:$4 sm:$0xff]  }
 0x29a   :  { %8842 = vmatprep.subr.bf16.mxu1 %v11312_v18  ;;  %v9500_v18 = vld [vmem:[%s13529_s3 + $0x194] ss:$8 sps:$4 sm:$0xff]  }
 0x29d   :  { %8843 = vmatpush3.bf16.msra.mxu1 %v11322_v32  ;;  %v9506_v32 = vld [vmem:[%s13529_s3 + $0x1a4] ss:$8 sps:$4 sm:$0xff]  }
 0x29e   :  { %8844 = vmatprep.subr.bf16.mxu1 %v11320_v42  ;;  %v9502_v42 = vld [vmem:[%s13529_s3 + $0x190] ss:$8 sps:$4 sm:$0xff]  }
 0x2a0   :  { %2109 = vmatmul.mubr.bf16.gmra.mrb[84].mxu1 %v9478_v23 }
 0x2a1   :  { %8845 = vmatpush3.bf16.msra.mxu1 %v11333_v5  ;;  %2116 = vmatprep.mubr.bf16.mxu1 %v9482_v60  ;;  %v9514_v5 = vld [vmem:[%s13529_s3 + $0x1b4] ss:$8 sps:$4 sm:$0xff]   ;;  %v9535_v60 = vld [vmem:[%s13529_s3 + $0x1f0] ss:$8 sps:$4 sm:$0xff]  }
 0x2a2   :  { %8846 = vmatprep.subr.bf16.mxu1 %v11330_v17  ;;  %v9508_v17 = vld [vmem:[%s13529_s3 + $0x1a0] ss:$8 sps:$4 sm:$0xff]  }
 0x2a5   :  { %8847 = vmatpush3.bf16.msra.mxu1 %v11337_v9 }
 0x2a8   :  { %2117 = vmatmul.mubr.bf16.gmra.mrb[88].mxu1 %v9484_v52  ;;  %v9560_v52 = vld [vmem:[%s13530_s4 + $0xf0] ss:$8 sps:$4 sm:$0xff]  }
 0x2a9   :  { %2124 = vmatprep.mubr.bf16.mxu1 %v9488_v7 }
 0x2b0   :  { %2125 = vmatmul.mubr.bf16.gmra.mrb[92].mxu1 %v9490_v40 }
 0x2b1   :  { %2132 = vmatprep.mubr.bf16.mxu1 %v9494_v61  ;;  %v9539_v61 = vld [vmem:[%s13529_s3 + $0x204] ss:$8 sps:$4 sm:$0xff]  }
 0x2b8   :  { %2133 = vmatmul.mubr.bf16.gmra.mrb[96].mxu1 %v9496_v59  ;;  %v9565_v59 = vld [vmem:[%s13530_s4 + $0x104] ss:$8 sps:$4 sm:$0xff]  }
 0x2b9   :  { %2140 = vmatprep.mubr.bf16.mxu1 %v9500_v18 }
 0x2c0   :  { %2141 = vmatmul.mubr.bf16.gmra.mrb[100].mxu1 %v9502_v42 }
 0x2c1   :  { %2148 = vmatprep.mubr.bf16.mxu1 %v9506_v32 }
 0x2c8   :  { %2149 = vmatmul.mubr.bf16.gmra.mrb[104].mxu1 %v9508_v17 }
 0x2c9   :  { %2563 = vmatprep.mubr.bf16.mxu1 %v9514_v5 }
 0x2cb   :  { %v8638_v9 = vpop.f32.mrb[0].mxu1 }
 0x2cc   :  { %v8639_v50 = vpop.f32.mrb[1].mxu1 }
 0x2cd   :  { %v8640_v22 = vadd.f32 %v8639_v50, %v8638_v9  ;;  %v8641_v16 = vpop.f32.mrb[2].mxu1  ;;  %v9541_v9 = vld [vmem:[%s13529_s3 + $0x200] ss:$8 sps:$4 sm:$0xff]  }
 0x2ce   :  { %v8642_v37 = vpop.f32.mrb[3].mxu1 }
 0x2cf   :  { %v8643_v13 = vadd.f32 %v8642_v37, %v8641_v16 }
 0x2d0   :  { %2564 = vmatmul.mubr.bf16.vlgmr.msra.gmra.mrb[108].mxu1 %v9512_v30 }
 0x2d1   :  { %v1189_v44 = vpack.c.bf16 %v8643_v13, %v8640_v22  ;;  %2571 = vmatprep.mubr.bf16.mxu1 %v9518_v34  ;;  %v9545_v22 = vld [vmem:[%s13529_s3 + $0x214] ss:$8 sps:$4 sm:$0xff]  }
 0x2d3   :  { %v8644_v62 = vpop.f32.mrb[4].mxu1  ;;  %1327 = vmatmul.mubr.bf16.vlgmr.msra.gmra.mrb[32].mxu0 %v1189_v44  ;;  %v9547_v44 = vld [vmem:[%s13529_s3 + $0x210] ss:$8 sps:$4 sm:$0xff]  }
 0x2d4   :  { %v8645_v49 = vpop.f32.mrb[5].mxu1  ;;  %1785 = vmatpush1.bf16.msra.mxu0 %v9515_v47  ;;  %1336 = vmatprep.mubr.bf16.mxu0 %v10435_v45 }
 0x2d5   :  { %v8646_v10 = vadd.f32 %v8645_v49, %v8644_v62  ;;  %v8647_v43 = vpop.f32.mrb[6].mxu1  ;;  %1786 = vmatprep.subr.bf16.mxu0 %v9525_v56  ;;  %v9551_v49 = vld [vmem:[%s13529_s3 + $0x224] ss:$8 sps:$4 sm:$0xff]  }
 0x2d6   :  { %v8648_v12 = vpop.f32.mrb[7].mxu1 }
 0x2d7   :  { %v8649_v21 = vadd.f32 %v8648_v12, %v8647_v43 }
 0x2d8   :  { %2572 = vmatmul.mubr.bf16.gmra.mrb[112].mxu1 %v9520_v24  ;;  %1787 = vmatpush1.bf16.msra.mxu0 %v9523_v26 }
 0x2d9   :  { %v1190_v53 = vpack.c.bf16 %v8649_v21, %v8646_v10  ;;  %2579 = vmatprep.mubr.bf16.mxu1 %v9521_v1  ;;  %1788 = vmatprep.subr.bf16.mxu0 %v9532_v46  ;;  %v9553_v46 = vld [vmem:[%s13529_s3 + $0x220] ss:$8 sps:$4 sm:$0xff]  }
 0x2db   :  { %v8650_v36 = vpop.f32.mrb[8].mxu1  ;;  %1337 = vmatmul.mubr.bf16.gmra.mrb[36].mxu0 %v1190_v53 }
 0x2dc   :  { %v8651_v48 = vpop.f32.mrb[9].mxu1  ;;  %1346 = vmatprep.mubr.bf16.mxu0 %v10435_v45  ;;  %1789 = vmatpush1.bf16.msra.mxu0 %v9530_v0  ;;  %v9557_v0 = vld [vmem:[%s13529_s3 + $0x234] ss:$8 sps:$4 sm:$0xff]  }
 0x2dd   :  { %v8652_v15 = vadd.f32 %v8651_v48, %v8650_v36  ;;  %v8653_v35 = vpop.f32.mrb[10].mxu1  ;;  %1790 = vmatprep.subr.bf16.mxu0 %v9538_v25 }
 0x2de   :  { %v8654_v8 = vpop.f32.mrb[11].mxu1 }
 0x2df   :  { %v8655_v4 = vadd.f32 %v8654_v8, %v8653_v35 }
 0x2e0   :  { %2580 = vmatmul.mubr.bf16.gmra.mrb[116].mxu1 %v9526_v33  ;;  %1791 = vmatpush1.bf16.msra.mxu0 %v9536_v58  ;;  %v9559_v58 = vld [vmem:[%s13529_s3 + $0x230] ss:$8 sps:$4 sm:$0xff]  }
 0x2e1   :  { %v1191_v14 = vpack.c.bf16 %v8655_v4, %v8652_v15  ;;  %2587 = vmatprep.mubr.bf16.mxu1 %v9527_v54  ;;  %1792 = vmatprep.subr.bf16.mxu0 %v9544_v39 }
 0x2e3   :  { %v8656_v31 = vpop.f32.mrb[12].mxu1  ;;  %1347 = vmatmul.mubr.bf16.gmra.mrb[40].mxu0 %v1191_v14 }
 0x2e4   :  { %v8657_v63 = vpop.f32.mrb[13].mxu1  ;;  %1356 = vmatprep.mubr.bf16.mxu0 %v10435_v45  ;;  %1793 = vmatpush1.bf16.msra.mxu0 %v9542_v29 }
 0x2e5   :  { %v8658_v55 = vadd.f32 %v8657_v63, %v8656_v31  ;;  %v8659_v20 = vpop.f32.mrb[14].mxu1  ;;  %1794 = vmatprep.subr.bf16.mxu0 %v9550_v51 }
 0x2e6   :  { %v8660_v27 = vpop.f32.mrb[15].mxu1 }
 0x2e7   :  { %v8661_v28 = vadd.f32 %v8660_v27, %v8659_v20 }
 0x2e8   :  { %2588 = vmatmul.mubr.bf16.gmra.mrb[120].mxu1 %v9529_v38  ;;  %1795 = vmatpush1.bf16.msra.mxu0 %v9548_v3  ;;  %v9563_v38 = vld [vmem:[%s13530_s4 + $0x100] ss:$8 sps:$4 sm:$0xff]  }
 0x2e9   :  { %v1192_v57 = vpack.c.bf16 %v8661_v28, %v8658_v55  ;;  %2595 = vmatprep.mubr.bf16.mxu1 %v9533_v41  ;;  %1796 = vmatprep.subr.bf16.mxu0 %v9556_v2  ;;  %v9568_v55 = vld [vmem:[%s13530_s4 + $0x114] ss:$8 sps:$4 sm:$0xff]   ;;  %v9566_v2 = vld [vmem:[%s13530_s4 + $0x110] ss:$8 sps:$4 sm:$0xff]  }
 0x2eb   :  { %v8662_v11 = vpop.f32.mrb[16].mxu1  ;;  %1357 = vmatmul.mubr.bf16.gmra.mrb[44].mxu0 %v1192_v57 }
 0x2ec   :  { %v8663_v23 = vpop.f32.mrb[17].mxu1  ;;  %1366 = vmatprep.mubr.bf16.mxu0 %v10435_v45  ;;  %1797 = vmatpush1.bf16.msra.mxu0 %v9554_v19  ;;  %v9571_v19 = vld [vmem:[%s13530_s4 + $0x124] ss:$8 sps:$4 sm:$0xff]  }
 0x2ed   :  { %v8664_v7 = vadd.f32 %v8663_v23, %v8662_v11  ;;  %v8665_v40 = vpop.f32.mrb[18].mxu1  ;;  %1798 = vmatprep.subr.bf16.mxu0 %v9562_v6  ;;  %v9569_v11 = vld [vmem:[%s13530_s4 + $0x120] ss:$8 sps:$4 sm:$0xff]  }
 0x2ee   :  { %v8666_v18 = vpop.f32.mrb[19].mxu1 }
 0x2ef   :  { %v8667_v42 = vadd.f32 %v8666_v18, %v8665_v40  ;;  %v9572_v40 = vld [vmem:[%s13530_s4 + $0x130] ss:$8 sps:$4 sm:$0xff]   ;;  %v9577_v18 = vld [vmem:[%s13530_s4 + $0x144] ss:$8 sps:$4 sm:$0xff]  }
 0x2f0   :  { %2596 = vmatmul.mubr.bf16.gmra.mrb[124].mxu1 %v9535_v60  ;;  %1799 = vmatpush1.bf16.msra.mxu0 %v9560_v52  ;;  %v9574_v60 = vld [vmem:[%s13530_s4 + $0x134] ss:$8 sps:$4 sm:$0xff]  }
 0x2f1   :  { %v1193_v32 = vpack.c.bf16 %v8667_v42, %v8664_v7  ;;  %2603 = vmatprep.mubr.bf16.mxu1 %v9539_v61  ;;  %2263 = vmatprep.subr.bf16.mxu0 %v9565_v59 }
 0x2f3   :  { %v8668_v17 = vpop.f32.mrb[20].mxu1  ;;  %1367 = vmatmul.mubr.bf16.gmra.mrb[48].mxu0 %v1193_v32 }
 0x2f4   :  { %v8669_v5 = vpop.f32.mrb[21].mxu1  ;;  %1376 = vmatprep.mubr.bf16.mxu0 %v10435_v45 }
 0x2f5   :  { %v8670_v50 = vadd.f32 %v8669_v5, %v8668_v17  ;;  %v8671_v30 = vpop.f32.mrb[22].mxu1  ;;  %v9575_v17 = vld [vmem:[%s13530_s4 + $0x140] ss:$8 sps:$4 sm:$0xff]  }
 0x2f6   :  { %v8672_v16 = vpop.f32.mrb[23].mxu1 }
 0x2f7   :  { %v8673_v34 = vadd.f32 %v8672_v16, %v8671_v30 }
 0x2f8   :  { %2604 = vmatmul.mubr.bf16.gmra.mrb[128].mxu1 %v9541_v9  ;;  %v9580_v9 = vld [vmem:[%s13530_s4 + $0x154] ss:$8 sps:$4 sm:$0xff]  }
 0x2f9   :  { %v1194_v37 = vpack.c.bf16 %v8673_v34, %v8670_v50  ;;  %2611 = vmatprep.mubr.bf16.mxu1 %v9545_v22  ;;  %v9578_v22 = vld [vmem:[%s13530_s4 + $0x150] ss:$8 sps:$4 sm:$0xff]  }
 0x2fb   :  { %v8674_v13 = vpop.f32.mrb[24].mxu1  ;;  %1377 = vmatmul.mubr.bf16.gmra.mrb[52].mxu0 %v1194_v37  ;;  %v9583_v37 = vld [vmem:[%s13530_s4 + $0x164] ss:$8 sps:$4 sm:$0xff]  }
 0x2fc   :  { %v8675_v47 = vpop.f32.mrb[25].mxu1  ;;  %1386 = vmatprep.mubr.bf16.mxu0 %v10435_v45 }
 0x2fd   :  { %v8676_v56 = vadd.f32 %v8675_v47, %v8674_v13  ;;  %v8677_v62 = vpop.f32.mrb[26].mxu1 }
 0x2fe   :  { %v8678_v24 = vpop.f32.mrb[27].mxu1 }
 0x2ff   :  { %v8679_v26 = vadd.f32 %v8678_v24, %v8677_v62  ;;  %v9586_v62 = vld [vmem:[%s13530_s4 + $0x174] ss:$8 sps:$4 sm:$0xff]  }
 0x300   :  { %2612 = vmatmul.mubr.bf16.gmra.mrb[132].mxu1 %v9547_v44  ;;  %v9581_v44 = vld [vmem:[%s13530_s4 + $0x160] ss:$8 sps:$4 sm:$0xff]  }
 0x301   :  { %v1195_v10 = vpack.c.bf16 %v8679_v26, %v8676_v56  ;;  %2619 = vmatprep.mubr.bf16.mxu1 %v9551_v49  ;;  %v9584_v26 = vld [vmem:[%s13530_s4 + $0x170] ss:$8 sps:$4 sm:$0xff]  }
 0x303   :  { %v8680_v43 = vpop.f32.mrb[28].mxu1  ;;  %1387 = vmatmul.mubr.bf16.gmra.mrb[56].mxu0 %v1195_v10 }
 0x304   :  { %v8681_v1 = vpop.f32.mrb[29].mxu1  ;;  %1396 = vmatprep.mubr.bf16.mxu0 %v10435_v45 }
 0x305   :  { %v8682_v12 = vadd.f32 %v8681_v1, %v8680_v43  ;;  %v8683_v21 = vpop.f32.mrb[30].mxu1  ;;  %v9589_v1 = vld [vmem:[%s13530_s4 + $0x184] ss:$8 sps:$4 sm:$0xff]  }
 0x306   :  { %v8684_v53 = vpop.f32.mrb[31].mxu1 }
 0x307   :  { %v8685_v25 = vadd.f32 %v8684_v53, %v8683_v21 }
 0x308   :  { %2620 = vmatmul.mubr.bf16.gmra.mrb[136].mxu1 %v9553_v46 }
 0x309   :  { %v1196_v36 = vpack.c.bf16 %v8685_v25, %v8682_v12  ;;  %2627 = vmatprep.mubr.bf16.mxu1 %v9557_v0 }
 0x30b   :  { %v8686_v48 = vpop.f32.mrb[32].mxu1  ;;  %1397 = vmatmul.mubr.bf16.gmra.mrb[60].mxu0 %v1196_v36 }
 0x30c   :  { %v8687_v33 = vpop.f32.mrb[33].mxu1  ;;  %1406 = vmatprep.mubr.bf16.mxu0 %v10435_v45 }
 0x30d   :  { %v8688_v15 = vadd.f32 %v8687_v33, %v8686_v48  ;;  %v8689_v35 = vpop.f32.mrb[34].mxu1 }
 0x30e   :  { %v8690_v54 = vpop.f32.mrb[35].mxu1 }
 0x30f   :  { %v8691_v39 = vadd.f32 %v8690_v54, %v8689_v35 }
 0x310   :  { %2628 = vmatmul.mubr.bf16.gmra.mrb[140].mxu1 %v9559_v58 }
 0x311   :  { %v1197_v8 = vpack.c.bf16 %v8691_v39, %v8688_v15 }
 0x313   :  { %1407 = vmatmul.mubr.bf16.gmra.mrb[64].mxu0 %v1197_v8  ;;  %v8708_v4 = vpop.f32.mrb[36].mxu1 }
 0x314   :  { %v8709_v29 = vpop.f32.mrb[37].mxu1  ;;  %1816 = vmatprep.mubr.bf16.mxu0 %v10435_v45 }
 0x315   :  { %v8710_v14 = vadd.f32 %v8709_v29, %v8708_v4  ;;  %v8711_v51 = vpop.f32.mrb[38].mxu1 }
 0x316   :  { %v8712_v31 = vpop.f32.mrb[39].mxu1 }
 0x317   :  { %v8713_v63 = vadd.f32 %v8712_v31, %v8711_v51 }
 0x319   :  { %v1678_v3 = vpack.c.bf16 %v8713_v63, %v8710_v14 }
 0x31b   :  { %v8714_v20 = vpop.f32.mrb[40].mxu1  ;;  %1817 = vmatmul.mubr.bf16.vlgmr.msra.gmra.mrb[32].mxu0 %v1678_v3 }
 0x31c   :  { %v8715_v41 = vpop.f32.mrb[41].mxu1  ;;  %2264 = vmatpush1.bf16.msra.mxu0 %v9563_v38  ;;  %1826 = vmatprep.mubr.bf16.mxu0 %v10435_v45 }
 0x31d   :  { %v8716_v27 = vadd.f32 %v8715_v41, %v8714_v20  ;;  %v8717_v28 = vpop.f32.mrb[42].mxu1  ;;  %2265 = vmatprep.subr.bf16.mxu0 %v9568_v55 }
 0x31e   :  { %v8718_v57 = vpop.f32.mrb[43].mxu1 }
 0x31f   :  { %v8719_v6 = vadd.f32 %v8718_v57, %v8717_v28 }
 0x320   :  { %2266 = vmatpush1.bf16.msra.mxu0 %v9566_v2 }
 0x321   :  { %v1679_v23 = vpack.c.bf16 %v8719_v6, %v8716_v27  ;;  %2267 = vmatprep.subr.bf16.mxu0 %v9571_v19 }
 0x323   :  { %v8720_v52 = vpop.f32.mrb[44].mxu1  ;;  %1827 = vmatmul.mubr.bf16.gmra.mrb[36].mxu0 %v1679_v23 }
 0x324   :  { %v8721_v7 = vpop.f32.mrb[45].mxu1  ;;  %1836 = vmatprep.mubr.bf16.mxu0 %v10435_v45  ;;  %2268 = vmatpush1.bf16.msra.mxu0 %v9569_v11 }
 0x325   :  { %v8722_v61 = vadd.f32 %v8721_v7, %v8720_v52  ;;  %v8723_v59 = vpop.f32.mrb[46].mxu1  ;;  %2269 = vmatprep.subr.bf16.mxu0 %v9574_v60 }
 0x326   :  { %v8724_v42 = vpop.f32.mrb[47].mxu1 }
 0x327   :  { %v8725_v32 = vadd.f32 %v8724_v42, %v8723_v59  ;;  %v9592_v59 = vld [vmem:[%s13530_s4 + $0x194] ss:$8 sps:$4 sm:$0xff]  }
 0x328   :  { %2270 = vmatpush1.bf16.msra.mxu0 %v9572_v40  ;;  %v9587_v40 = vld [vmem:[%s13530_s4 + $0x180] ss:$8 sps:$4 sm:$0xff]  }
 0x329   :  { %v1680_v5 = vpack.c.bf16 %v8725_v32, %v8722_v61  ;;  %2271 = vmatprep.subr.bf16.mxu0 %v9577_v18  ;;  %v9590_v32 = vld [vmem:[%s13530_s4 + $0x190] ss:$8 sps:$4 sm:$0xff]  }
 0x32b   :  { %v8726_v50 = vpop.f32.mrb[48].mxu1  ;;  %1837 = vmatmul.mubr.bf16.gmra.mrb[40].mxu0 %v1680_v5 }
 0x32c   :  { %v8727_v30 = vpop.f32.mrb[49].mxu1  ;;  %1846 = vmatprep.mubr.bf16.mxu0 %v10435_v45  ;;  %2272 = vmatpush1.bf16.msra.mxu0 %v9575_v17 }
 0x32d   :  { %v8728_v16 = vadd.f32 %v8727_v30, %v8726_v50  ;;  %v8729_v34 = vpop.f32.mrb[50].mxu1  ;;  %2273 = vmatprep.subr.bf16.mxu0 %v9580_v9  ;;  %v9595_v9 = vld [vmem:[%s13530_s4 + $0x1a4] ss:$8 sps:$4 sm:$0xff]  }
 0x32e   :  { %v8730_v13 = vpop.f32.mrb[51].mxu1 }
 0x32f   :  { %v8731_v47 = vadd.f32 %v8730_v13, %v8729_v34  ;;  %v9598_v34 = vld [vmem:[%s13530_s4 + $0x1b4] ss:$8 sps:$4 sm:$0xff]  }
 0x330   :  { %2274 = vmatpush1.bf16.msra.mxu0 %v9578_v22  ;;  %v9593_v22 = vld [vmem:[%s13530_s4 + $0x1a0] ss:$8 sps:$4 sm:$0xff]  }
 0x331   :  { %v1681_v56 = vpack.c.bf16 %v8731_v47, %v8728_v16  ;;  %2275 = vmatprep.subr.bf16.mxu0 %v9583_v37  ;;  %v9596_v47 = vld [vmem:[%s13530_s4 + $0x1b0] ss:$8 sps:$4 sm:$0xff]  }
 0x333   :  { %v8732_v49 = vpop.f32.mrb[52].mxu1  ;;  %1847 = vmatmul.mubr.bf16.gmra.mrb[44].mxu0 %v1681_v56 }
 0x334   :  { %v8733_v24 = vpop.f32.mrb[53].mxu1  ;;  %1856 = vmatprep.mubr.bf16.mxu0 %v10435_v45  ;;  %2276 = vmatpush1.bf16.msra.mxu0 %v9581_v44 }
 0x335   :  { %v8734_v10 = vadd.f32 %v8733_v24, %v8732_v49  ;;  %v8735_v43 = vpop.f32.mrb[54].mxu1  ;;  %2277 = vmatprep.subr.bf16.mxu0 %v9586_v62  ;;  %v9601_v62 = vld [vmem:[%s13530_s4 + $0x1c4] ss:$8 sps:$4 sm:$0xff]  }
 0x336   :  { %v8736_v46 = vpop.f32.mrb[55].mxu1 }
 0x337   :  { %v8737_v12 = vadd.f32 %v8736_v46, %v8735_v43  ;;  %v9604_v43 = vld [vmem:[%s13530_s4 + $0x1d4] ss:$8 sps:$4 sm:$0xff]  }
 0x338   :  { %2278 = vmatpush1.bf16.msra.mxu0 %v9584_v26  ;;  %v9599_v26 = vld [vmem:[%s13530_s4 + $0x1c0] ss:$8 sps:$4 sm:$0xff]  }
 0x339   :  { %v1682_v21 = vpack.c.bf16 %v8737_v12, %v8734_v10  ;;  %2742 = vmatprep.subr.bf16.mxu0 %v9589_v1  ;;  %v9602_v12 = vld [vmem:[%s13530_s4 + $0x1d0] ss:$8 sps:$4 sm:$0xff]  }
 0x33b   :  { %v8738_v0 = vpop.f32.mrb[56].mxu1  ;;  %1857 = vmatmul.mubr.bf16.gmra.mrb[48].mxu0 %v1682_v21 }
 0x33c   :  { %v8739_v53 = vpop.f32.mrb[57].mxu1  ;;  %1866 = vmatprep.mubr.bf16.mxu0 %v10435_v45 }
 0x33d   :  { %v8740_v25 = vadd.f32 %v8739_v53, %v8738_v0  ;;  %v8741_v36 = vpop.f32.mrb[58].mxu1  ;;  %v9607_v53 = vld [vmem:[%s13530_s4 + $0x1e4] ss:$8 sps:$4 sm:$0xff]  }
 0x33e   :  { %v8742_v48 = vpop.f32.mrb[59].mxu1 }
 0x33f   :  { %v8743_v33 = vadd.f32 %v8742_v48, %v8741_v36  ;;  %v9605_v48 = vld [vmem:[%s13530_s4 + $0x1e0] ss:$8 sps:$4 sm:$0xff]  }
 0x341   :  { %v1683_v58 = vpack.c.bf16 %v8743_v33, %v8740_v25 }
 0x343   :  { %v8744_v15 = vpop.f32.mrb[60].mxu1  ;;  %1867 = vmatmul.mubr.bf16.gmra.mrb[52].mxu0 %v1683_v58  ;;  %v9610_v58 = vld [vmem:[%s13530_s4 + $0x1f4] ss:$8 sps:$4 sm:$0xff]  }
 0x344   :  { %v8745_v35 = vpop.f32.mrb[61].mxu1  ;;  %1876 = vmatprep.mubr.bf16.mxu0 %v10435_v45 }
 0x345   :  { %v8746_v54 = vadd.f32 %v8745_v35, %v8744_v15  ;;  %v8747_v39 = vpop.f32.mrb[62].mxu1 }
 0x346   :  { %v8748_v8 = vpop.f32.mrb[63].mxu1 }
 0x347   :  { %v8749_v4 = vadd.f32 %v8748_v8, %v8747_v39 }
 0x349   :  { %v1684_v29 = vpack.c.bf16 %v8749_v4, %v8746_v54  ;;  %v9608_v54 = vld [vmem:[%s13530_s4 + $0x1f0] ss:$8 sps:$4 sm:$0xff]  }
 0x34b   :  { %v8750_v14 = vpop.f32.mrb[64].mxu1  ;;  %1877 = vmatmul.mubr.bf16.gmra.mrb[56].mxu0 %v1684_v29 }
 0x34c   :  { %v8751_v51 = vpop.f32.mrb[65].mxu1  ;;  %1886 = vmatprep.mubr.bf16.mxu0 %v10435_v45 }
 0x34d   :  { %v8752_v31 = vadd.f32 %v8751_v51, %v8750_v14  ;;  %v8753_v63 = vpop.f32.mrb[66].mxu1 }
 0x34e   :  { %v8754_v38 = vpop.f32.mrb[67].mxu1 }
 0x34f   :  { %v8755_v3 = vadd.f32 %v8754_v38, %v8753_v63 }
 0x351   :  { %v1685_v55 = vpack.c.bf16 %v8755_v3, %v8752_v31 }
 0x353   :  { %v8756_v20 = vpop.f32.mrb[68].mxu1  ;;  %1887 = vmatmul.mubr.bf16.gmra.mrb[60].mxu0 %v1685_v55 }
 0x354   :  { %v8757_v41 = vpop.f32.mrb[69].mxu1  ;;  %1896 = vmatprep.mubr.bf16.mxu0 %v10435_v45 }
 0x355   :  { %v8758_v2 = vadd.f32 %v8757_v41, %v8756_v20  ;;  %v8759_v27 = vpop.f32.mrb[70].mxu1 }
 0x356   :  { %v8760_v28 = vpop.f32.mrb[71].mxu1 }
 0x357   :  { %v8761_v19 = vadd.f32 %v8760_v28, %v8759_v27 }
 0x359   :  { %v1686_v57 = vpack.c.bf16 %v8761_v19, %v8758_v2 }
 0x35b   :  { %1897 = vmatmul.mubr.bf16.gmra.mrb[64].mxu0 %v1686_v57  ;;  %v8778_v6 = vpop.f32.mrb[72].mxu1 }
 0x35c   :  { %v8779_v11 = vpop.f32.mrb[73].mxu1  ;;  %2295 = vmatprep.mubr.bf16.mxu0 %v10435_v45 }
 0x35d   :  { %v8780_v23 = vadd.f32 %v8779_v11, %v8778_v6  ;;  %v8781_v60 = vpop.f32.mrb[74].mxu1 }
 0x35e   :  { %v8782_v52 = vpop.f32.mrb[75].mxu1 }
 0x35f   :  { %v8783_v7 = vadd.f32 %v8782_v52, %v8781_v60 }
 0x361   :  { %v2157_v61 = vpack.c.bf16 %v8783_v7, %v8780_v23 }
 0x363   :  { %v8784_v18 = vpop.f32.mrb[76].mxu1  ;;  %2296 = vmatmul.mubr.bf16.vlgmr.msra.gmra.mrb[32].mxu0 %v2157_v61 }
 0x364   :  { %v8785_v42 = vpop.f32.mrb[77].mxu1  ;;  %2743 = vmatpush1.bf16.msra.mxu0 %v9587_v40  ;;  %2305 = vmatprep.mubr.bf16.mxu0 %v10435_v45 }
 0x365   :  { %v8786_v17 = vadd.f32 %v8785_v42, %v8784_v18  ;;  %v8787_v5 = vpop.f32.mrb[78].mxu1  ;;  %2744 = vmatprep.subr.bf16.mxu0 %v9592_v59 }
 0x366   :  { %v8788_v50 = vpop.f32.mrb[79].mxu1 }
 0x367   :  { %v8789_v30 = vadd.f32 %v8788_v50, %v8787_v5 }
 0x368   :  { %2745 = vmatpush1.bf16.msra.mxu0 %v9590_v32 }
 0x369   :  { %v2158_v16 = vpack.c.bf16 %v8789_v30, %v8786_v17  ;;  %2746 = vmatprep.subr.bf16.mxu0 %v9595_v9 }
 0x36b   :  { %v8790_v37 = vpop.f32.mrb[80].mxu1  ;;  %2306 = vmatmul.mubr.bf16.gmra.mrb[36].mxu0 %v2158_v16 }
 0x36c   :  { %v8791_v13 = vpop.f32.mrb[81].mxu1  ;;  %2315 = vmatprep.mubr.bf16.mxu0 %v10435_v45  ;;  %2747 = vmatpush1.bf16.msra.mxu0 %v9593_v22 }
 0x36d   :  { %v8792_v44 = vadd.f32 %v8791_v13, %v8790_v37  ;;  %v8793_v56 = vpop.f32.mrb[82].mxu1  ;;  %2748 = vmatprep.subr.bf16.mxu0 %v9598_v34 }
 0x36e   :  { %v8794_v49 = vpop.f32.mrb[83].mxu1 }
 0x36f   :  { %v8795_v24 = vadd.f32 %v8794_v49, %v8793_v56 }
 0x370   :  { %2749 = vmatpush1.bf16.msra.mxu0 %v9596_v47 }
 0x371   :  { %v2159_v10 = vpack.c.bf16 %v8795_v24, %v8792_v44  ;;  %2750 = vmatprep.subr.bf16.mxu0 %v9601_v62 }
 0x373   :  { %v8796_v1 = vpop.f32.mrb[84].mxu1  ;;  %2316 = vmatmul.mubr.bf16.gmra.mrb[40].mxu0 %v2159_v10 }
 0x374   :  { %v8797_v46 = vpop.f32.mrb[85].mxu1  ;;  %2325 = vmatprep.mubr.bf16.mxu0 %v10435_v45  ;;  %2751 = vmatpush1.bf16.msra.mxu0 %v9599_v26 }
 0x375   :  { %v8798_v21 = vadd.f32 %v8797_v46, %v8796_v1  ;;  %v8799_v0 = vpop.f32.mrb[86].mxu1  ;;  %2752 = vmatprep.subr.bf16.mxu0 %v9604_v43 }
 0x376   :  { %v8800_v25 = vpop.f32.mrb[87].mxu1 }
 0x377   :  { %v8801_v36 = vadd.f32 %v8800_v25, %v8799_v0 }
 0x378   :  { %2753 = vmatpush1.bf16.msra.mxu0 %v9602_v12 }
 0x379   :  { %v2160_v33 = vpack.c.bf16 %v8801_v36, %v8798_v21  ;;  %2754 = vmatprep.subr.bf16.mxu0 %v9607_v53 }
 0x37b   :  { %v8802_v15 = vpop.f32.mrb[88].mxu1  ;;  %2326 = vmatmul.mubr.bf16.gmra.mrb[44].mxu0 %v2160_v33 }
 0x37c   :  { %v8803_v35 = vpop.f32.mrb[89].mxu1  ;;  %2335 = vmatprep.mubr.bf16.mxu0 %v10435_v45  ;;  %2755 = vmatpush1.bf16.msra.mxu0 %v9605_v48 }
 0x37d   :  { %v8804_v39 = vadd.f32 %v8803_v35, %v8802_v15  ;;  %v8805_v8 = vpop.f32.mrb[90].mxu1  ;;  %2756 = vmatprep.subr.bf16.mxu0 %v9610_v58 }
 0x37e   :  { %v8806_v4 = vpop.f32.mrb[91].mxu1 }
 0x37f   :  { %v8807_v29 = vadd.f32 %v8806_v4, %v8805_v8 }
 0x380   :  { %2757 = vmatpush1.bf16.msra.mxu0 %v9608_v54 }
 0x381   :  { %v2161_v14 = vpack.c.bf16 %v8807_v29, %v8804_v39 }
 0x383   :  { %v8808_v51 = vpop.f32.mrb[92].mxu1  ;;  %2336 = vmatmul.mubr.bf16.gmra.mrb[48].mxu0 %v2161_v14 }
 0x384   :  { %v8809_v31 = vpop.f32.mrb[93].mxu1  ;;  %2345 = vmatprep.mubr.bf16.mxu0 %v10435_v45 }
 0x385   :  { %v8810_v63 = vadd.f32 %v8809_v31, %v8808_v51  ;;  %v8811_v38 = vpop.f32.mrb[94].mxu1 }
 0x386   :  { %v8812_v3 = vpop.f32.mrb[95].mxu1 }
 0x387   :  { %v8813_v55 = vadd.f32 %v8812_v3, %v8811_v38 }
 0x389   :  { %v2162_v20 = vpack.c.bf16 %v8813_v55, %v8810_v63 }
 0x38b   :  { %v8814_v41 = vpop.f32.mrb[96].mxu1  ;;  %2346 = vmatmul.mubr.bf16.gmra.mrb[52].mxu0 %v2162_v20 }
 0x38c   :  { %v8815_v2 = vpop.f32.mrb[97].mxu1  ;;  %2355 = vmatprep.mubr.bf16.mxu0 %v10435_v45 }
 0x38d   :  { %v8816_v27 = vadd.f32 %v8815_v2, %v8814_v41  ;;  %v8817_v28 = vpop.f32.mrb[98].mxu1 }
 0x38e   :  { %v8818_v19 = vpop.f32.mrb[99].mxu1 }
 0x38f   :  { %v8819_v57 = vadd.f32 %v8818_v19, %v8817_v28 }
 0x391   :  { %v2163_v6 = vpack.c.bf16 %v8819_v57, %v8816_v27 }
 0x393   :  { %v8820_v11 = vpop.f32.mrb[100].mxu1  ;;  %2356 = vmatmul.mubr.bf16.gmra.mrb[56].mxu0 %v2163_v6 }
 0x394   :  { %v8821_v23 = vpop.f32.mrb[101].mxu1  ;;  %2365 = vmatprep.mubr.bf16.mxu0 %v10435_v45 }
 0x395   :  { %v8822_v60 = vadd.f32 %v8821_v23, %v8820_v11  ;;  %v8823_v52 = vpop.f32.mrb[102].mxu1 }
 0x396   :  { %v8824_v7 = vpop.f32.mrb[103].mxu1 }
 0x397   :  { %v8825_v40 = vadd.f32 %v8824_v7, %v8823_v52 }
 0x399   :  { %v2164_v61 = vpack.c.bf16 %v8825_v40, %v8822_v60 }
 0x39b   :  { %v8826_v59 = vpop.f32.mrb[104].mxu1  ;;  %2366 = vmatmul.mubr.bf16.gmra.mrb[60].mxu0 %v2164_v61 }
 0x39c   :  { %v8827_v18 = vpop.f32.mrb[105].mxu1  ;;  %2375 = vmatprep.mubr.bf16.mxu0 %v10435_v45 }
 0x39d   :  { %v8828_v42 = vadd.f32 %v8827_v18, %v8826_v59  ;;  %v8829_v32 = vpop.f32.mrb[106].mxu1 }
 0x39e   :  { %v8830_v17 = vpop.f32.mrb[107].mxu1 }
 0x39f   :  { %v8831_v5 = vadd.f32 %v8830_v17, %v8829_v32 }
 0x3a1   :  { %v2165_v9 = vpack.c.bf16 %v8831_v5, %v8828_v42 }
 0x3a3   :  { %2376 = vmatmul.mubr.bf16.gmra.mrb[64].mxu0 %v2165_v9  ;;  %v8848_v50 = vpop.f32.mrb[108].mxu1 }
 0x3a4   :  { %v8849_v30 = vpop.f32.mrb[109].mxu1  ;;  %2774 = vmatprep.mubr.bf16.mxu0 %v10435_v45 }
 0x3a5   :  { %v8850_v22 = vadd.f32 %v8849_v30, %v8848_v50  ;;  %v8851_v16 = vpop.f32.mrb[110].mxu1  ;;  %v9611_v50 = vld [vmem:[%s13531_s7] ss:$16 sps:$4 sm:$0xff]   ;;  %v9613_v30 = vld [vmem:[%s13531_s7 + $0x4] ss:$16 sps:$4 sm:$0xff]  }
 0x3a6   :  { %v8852_v34 = vpop.f32.mrb[111].mxu1  ;;  %3784 = vmatprep.subr.bf16.mxu0 %v9613_v30 }
 0x3a7   :  { %v8853_v37 = vadd.f32 %v8852_v34, %v8851_v16  ;;  %v9619_v16 = vld [vmem:[%s13531_s7 + $0x44] ss:$16 sps:$4 sm:$0xff]   ;;  %v9617_v34 = vld [vmem:[%s13531_s7 + $0x40] ss:$16 sps:$4 sm:$0xff]  }
 0x3a9   :  { %v2636_v13 = vpack.c.bf16 %v8853_v37, %v8850_v22  ;;  %v9616_v22 = vld [vmem:[%s13531_s7 + $0x24] ss:$16 sps:$4 sm:$0xff]  }
 0x3aa   :  { %v9622_v37 = vld [vmem:[%s13531_s7 + $0x64] ss:$16 sps:$4 sm:$0xff]  }
 0x3ab   :  { %v8854_v47 = vpop.f32.mrb[112].mxu1  ;;  %2775 = vmatmul.mubr.bf16.vlgmr.msra.gmra.mrb[32].mxu0 %v2636_v13  ;;  %v9620_v13 = vld [vmem:[%s13531_s7 + $0x60] ss:$16 sps:$4 sm:$0xff]  }
 0x3ac   :  { %v8855_v44 = vpop.f32.mrb[113].mxu1  ;;  %2784 = vmatprep.mubr.bf16.mxu0 %v10435_v45  ;;  %3785 = vmatpush1.bf16.msra.mxu0 %v9611_v50 }
 0x3ad   :  { %v8856_v56 = vadd.f32 %v8855_v44, %v8854_v47  ;;  %v8857_v62 = vpop.f32.mrb[114].mxu1  ;;  %3786 = vmatprep.subr.bf16.mxu0 %v9616_v22  ;;  %v9625_v47 = vld [vmem:[%s13531_s7 + $0x84] ss:$16 sps:$4 sm:$0xff]   ;;  %v9623_v44 = vld [vmem:[%s13531_s7 + $0x80] ss:$16 sps:$4 sm:$0xff]  }
 0x3ae   :  { %v8858_v49 = vpop.f32.mrb[115].mxu1 }
 0x3af   :  { %v8859_v24 = vadd.f32 %v8858_v49, %v8857_v62  ;;  %v9626_v62 = vld [vmem:[%s13531_s7 + $0xa0] ss:$16 sps:$4 sm:$0xff]   ;;  %v9631_v49 = vld [vmem:[%s13531_s7 + $0xc4] ss:$16 sps:$4 sm:$0xff]  }
 0x3b1   :  { %v2637_v26 = vpack.c.bf16 %v8859_v24, %v8856_v56  ;;  %v9628_v56 = vld [vmem:[%s13531_s7 + $0xa4] ss:$16 sps:$4 sm:$0xff]   ;;  %v9629_v24 = vld [vmem:[%s13531_s7 + $0xc0] ss:$16 sps:$4 sm:$0xff]  }
 0x3b3   :  { %v8860_v10 = vpop.f32.mrb[116].mxu1  ;;  %2785 = vmatmul.mubr.bf16.gmra.mrb[36].mxu0 %v2637_v26  ;;  %v1418_v26 = vlaneseq }
 0x3b4   :  { %v8861_v43 = vpop.f32.mrb[117].mxu1  ;;  %2794 = vmatprep.mubr.bf16.mxu0 %v10435_v45 }
 0x3b5   :  { %v8862_v1 = vadd.f32 %v8861_v43, %v8860_v10  ;;  %v8863_v46 = vpop.f32.mrb[118].mxu1  ;;  %v11872_v10 = vshrl.u32 %v1418_v26, 7  ;;  %v975_v43 = vld [vmem:[%s13532_s5] sm:$0x3] }
 0x3b6   :  { %v8864_v12 = vpop.f32.mrb[119].mxu1 }
 0x3b7   :  { %v8865_v21 = vadd.f32 %v8864_v12, %v8863_v46  ;;  %v1424_v46 = vsub.s32 1, %v11872_v10 }
 0x3b9   :  { %v2638_v0 = vpack.c.bf16 %v8865_v21, %v8862_v1  ;;  %v1420_v1 = vsub.s32 0, %v11872_v10  ;;  %v11885_v21 = vrot.slane %v975_v43, %v1424_v46 }
 0x3bb   :  { %v8866_v53 = vpop.f32.mrb[120].mxu1  ;;  %2795 = vmatmul.mubr.bf16.gmra.mrb[40].mxu0 %v2638_v0  ;;  %v11881_v12 = vrot.slane %v975_v43, %v1420_v1 }
 0x3bc   :  { %v8867_v25 = vpop.f32.mrb[121].mxu1  ;;  %2804 = vmatprep.mubr.bf16.mxu0 %v10435_v45 }
 0x3bd   :  { %v8868_v36 = vadd.f32 %v8867_v25, %v8866_v53  ;;  %v8869_v48 = vpop.f32.mrb[122].mxu1 }
 0x3be   :  { %v8870_v33 = vpop.f32.mrb[123].mxu1 }
 0x3bf   :  { %v8871_v58 = vadd.f32 %v8870_v33, %v8869_v48 }
 0x3c1   :  { %v2639_v15 = vpack.c.bf16 %v8871_v58, %v8868_v36 }
 0x3c3   :  { %v8872_v35 = vpop.f32.mrb[124].mxu1  ;;  %2805 = vmatmul.mubr.bf16.gmra.mrb[44].mxu0 %v2639_v15 }
 0x3c4   :  { %v8873_v54 = vpop.f32.mrb[125].mxu1  ;;  %2814 = vmatprep.mubr.bf16.mxu0 %v10435_v45 }
 0x3c5   :  { %v8874_v39 = vadd.f32 %v8873_v54, %v8872_v35  ;;  %v8875_v8 = vpop.f32.mrb[126].mxu1 }
 0x3c6   :  { %v8876_v4 = vpop.f32.mrb[127].mxu1 }
 0x3c7   :  { %v8877_v29 = vadd.f32 %v8876_v4, %v8875_v8 }
 0x3c9   :  { %v2640_v14 = vpack.c.bf16 %v8877_v29, %v8874_v39 }
 0x3cb   :  { %v8878_v51 = vpop.f32.mrb[128].mxu1  ;;  %2815 = vmatmul.mubr.bf16.gmra.mrb[48].mxu0 %v2640_v14 }
 0x3cc   :  { %v8879_v31 = vpop.f32.mrb[129].mxu1  ;;  %2824 = vmatprep.mubr.bf16.mxu0 %v10435_v45 }
 0x3cd   :  { %v8880_v63 = vadd.f32 %v8879_v31, %v8878_v51  ;;  %v8881_v38 = vpop.f32.mrb[130].mxu1 }
 0x3ce   :  { %v8882_v3 = vpop.f32.mrb[131].mxu1 }
 0x3cf   :  { %v8883_v55 = vadd.f32 %v8882_v3, %v8881_v38 }
 0x3d1   :  { %v2641_v20 = vpack.c.bf16 %v8883_v55, %v8880_v63 }
 0x3d3   :  { %v8884_v41 = vpop.f32.mrb[132].mxu1  ;;  %2825 = vmatmul.mubr.bf16.gmra.mrb[52].mxu0 %v2641_v20 }
 0x3d4   :  { %v8885_v2 = vpop.f32.mrb[133].mxu1  ;;  %2834 = vmatprep.mubr.bf16.mxu0 %v10435_v45 }
 0x3d5   :  { %v8886_v27 = vadd.f32 %v8885_v2, %v8884_v41  ;;  %v8887_v28 = vpop.f32.mrb[134].mxu1 }
 0x3d6   :  { %v8888_v19 = vpop.f32.mrb[135].mxu1 }
 0x3d7   :  { %v8889_v57 = vadd.f32 %v8888_v19, %v8887_v28 }
 0x3d9   :  { %v2642_v6 = vpack.c.bf16 %v8889_v57, %v8886_v27 }
 0x3db   :  { %v8890_v11 = vpop.f32.mrb[136].mxu1  ;;  %2835 = vmatmul.mubr.bf16.gmra.mrb[56].mxu0 %v2642_v6 }
 0x3dc   :  { %v8891_v23 = vpop.f32.mrb[137].mxu1  ;;  %2844 = vmatprep.mubr.bf16.mxu0 %v10435_v45 }
 0x3dd   :  { %v8892_v60 = vadd.f32 %v8891_v23, %v8890_v11  ;;  %v8893_v52 = vpop.f32.mrb[138].mxu1 }
 0x3de   :  { %v8894_v7 = vpop.f32.mrb[139].mxu1 }
 0x3df   :  { %v8895_v40 = vadd.f32 %v8894_v7, %v8893_v52 }
 0x3e1   :  { %v2643_v61 = vpack.c.bf16 %v8895_v40, %v8892_v60 }
 0x3e3   :  { %v8896_v59 = vpop.f32.mrb[140].mxu1  ;;  %2845 = vmatmul.mubr.bf16.gmra.mrb[60].mxu0 %v2643_v61 }
 0x3e4   :  { %v8897_v18 = vpop.f32.mrb[141].mxu1  ;;  %2854 = vmatprep.mubr.bf16.mxu0 %v10435_v45  ;;  %v9614_v45 = vld [vmem:[%s13531_s7 + $0x20] ss:$16 sps:$4 sm:$0xff]  }
 0x3e5   :  { %v8898_v42 = vadd.f32 %v8897_v18, %v8896_v59  ;;  %v8899_v32 = vpop.f32.mrb[142].mxu1  ;;  %3787 = vmatpush1.bf16.msra.mxu0 %v9614_v45 }
 0x3e6   :  { %v8900_v17 = vpop.f32.mrb[143].mxu1  ;;  %3788 = vmatprep.subr.bf16.mxu0 %v9619_v16 }
 0x3e7   :  { %v8901_v5 = vadd.f32 %v8900_v17, %v8899_v32 }
 0x3e9   :  { %v2644_v9 = vpack.c.bf16 %v8901_v5, %v8898_v42  ;;  %3789 = vmatpush1.bf16.msra.mxu0 %v9617_v34 }
 0x3ea   :  { %3790 = vmatprep.subr.bf16.mxu0 %v9622_v37 }
 0x3eb   :  { %2855 = vmatmul.mubr.bf16.gmra.mrb[64].mxu0 %v2644_v9 }
 0x3ed   :  { %3791 = vmatpush1.bf16.msra.mxu0 %v9620_v13 }
 0x3ee   :  { %3792 = vmatprep.subr.bf16.mxu0 %v9625_v47 }
 0x3f1   :  { %3793 = vmatpush1.bf16.msra.mxu0 %v9623_v44 }
 0x3f2   :  { %3794 = vmatprep.subr.bf16.mxu0 %v9628_v56 }
 0x3f5   :  { %3795 = vmatpush1.bf16.msra.mxu0 %v9626_v62 }
 0x3f6   :  { %3796 = vmatprep.subr.bf16.mxu0 %v9631_v49 }
 0x3f9   :  { %3797 = vmatpush1.bf16.msra.mxu0 %v9629_v24 }
 0x47e   :  { %v2776_v0 = vpop.f32.mrb[32].mxu0 }
 0x47f   :  { %v9126_v53 = vadd.f32 %v2776_v0, %v11881_v12  ;;  %v2778_v25 = vpop.f32.mrb[33].mxu0 }
 0x480   :  { %v9127_v36 = vadd.f32 %v2778_v25, %v11885_v21  ;;  %v2780_v48 = vpop.f32.mrb[34].mxu0 }
 0x481   :  { %v11889_v33 = vmax.f32 %v9126_v53, 0.0  ;;  %v9128_v58 = vadd.f32 %v2780_v48, %v11881_v12  ;;  %v2782_v15 = vpop.f32.mrb[35].mxu0 }
 0x482   :  { %v11892_v35 = vmax.f32 %v9127_v36, 0.0  ;;  %v9129_v54 = vadd.f32 %v2782_v15, %v11885_v21 }
 0x483   :  { %v2937_v39 = vmul.f32 %v11889_v33, %v11889_v33  ;;  %v11897_v8 = vmax.f32 %v9128_v58, 0.0 }
 0x484   :  { %v2938_v4 = vmul.f32 %v11892_v35, %v11892_v35  ;;  %v11901_v29 = vmax.f32 %v9129_v54, 0.0 }
 0x485   :  { %v2939_v14 = vmul.f32 %v11897_v8, %v11897_v8 }
 0x486   :  { %v2940_v51 = vmul.f32 %v11901_v29, %v11901_v29  ;;  %v2786_v31 = vpop.f32.mrb[36].mxu0  ;;  %v2973_v63 = vadd.f32 %v2938_v4, %v2937_v39 }
 0x487   :  { %v9130_v38 = vadd.f32 %v2786_v31, %v11881_v12  ;;  %v2788_v3 = vpop.f32.mrb[37].mxu0 }
 0x488   :  { %v9131_v55 = vadd.f32 %v2788_v3, %v11885_v21  ;;  %2974 = vadd.xlane.f32.xlu0 %v2973_v63  ;;  %v2790_v20 = vpop.f32.mrb[38].mxu0  ;;  %v2976_v41 = vadd.f32 %v2940_v51, %v2939_v14 }
 0x489   :  { %v11909_v2 = vmax.f32 %v9130_v38, 0.0  ;;  %v9132_v27 = vadd.f32 %v2790_v20, %v11881_v12  ;;  %v2792_v28 = vpop.f32.mrb[39].mxu0 }
 0x48a   :  { %v11912_v19 = vmax.f32 %v9131_v55, 0.0  ;;  %v9133_v57 = vadd.f32 %v2792_v28, %v11885_v21  ;;  %2977 = vadd.xlane.f32.xlu1 %v2976_v41 }
 0x48b   :  { %v2941_v6 = vmul.f32 %v11909_v2, %v11909_v2  ;;  %v11917_v11 = vmax.f32 %v9132_v27, 0.0 }
 0x48c   :  { %v2942_v23 = vmul.f32 %v11912_v19, %v11912_v19  ;;  %v11921_v60 = vmax.f32 %v9133_v57, 0.0 }
 0x48d   :  { %v2943_v52 = vmul.f32 %v11917_v11, %v11917_v11 }
 0x48e   :  { %v2944_v7 = vmul.f32 %v11921_v60, %v11921_v60  ;;  %v2796_v40 = vpop.f32.mrb[40].mxu0  ;;  %v2979_v61 = vadd.f32 %v2942_v23, %v2941_v6 }
 0x48f   :  { %v9134_v59 = vadd.f32 %v2796_v40, %v11881_v12  ;;  %v2798_v18 = vpop.f32.mrb[41].mxu0 }
 0x490   :  { %v9135_v42 = vadd.f32 %v2798_v18, %v11885_v21  ;;  %2980 = vadd.xlane.f32.xlu0 %v2979_v61  ;;  %v2800_v32 = vpop.f32.mrb[42].mxu0  ;;  %v2982_v17 = vadd.f32 %v2944_v7, %v2943_v52 }
 0x491   :  { %v11929_v5 = vmax.f32 %v9134_v59, 0.0  ;;  %v9136_v9 = vadd.f32 %v2800_v32, %v11881_v12  ;;  %v2802_v50 = vpop.f32.mrb[43].mxu0 }
 0x492   :  { %v11932_v30 = vmax.f32 %v9135_v42, 0.0  ;;  %v9137_v22 = vadd.f32 %v2802_v50, %v11885_v21  ;;  %2983 = vadd.xlane.f32.xlu1 %v2982_v17  ;;  %v9634_v50 = vld [vmem:[%s13531_s7 + $0xe4] ss:$16 sps:$4 sm:$0xff]  }
 0x493   :  { %v2945_v45 = vmul.f32 %v11929_v5, %v11929_v5  ;;  %v11937_v16 = vmax.f32 %v9136_v9, 0.0  ;;  %v9632_v9 = vld [vmem:[%s13531_s7 + $0xe0] ss:$16 sps:$4 sm:$0xff]   ;;  %3798 = vmatprep.subr.bf16.mxu0 %v9634_v50 }
 0x494   :  { %v2946_v34 = vmul.f32 %v11932_v30, %v11932_v30  ;;  %v11941_v37 = vmax.f32 %v9137_v22, 0.0  ;;  %3799 = vmatpush1.bf16.msra.mxu0 %v9632_v9 }
 0x495   :  { %v2947_v13 = vmul.f32 %v11937_v16, %v11937_v16 }
 0x496   :  { %v2948_v47 = vmul.f32 %v11941_v37, %v11941_v37  ;;  %v2806_v44 = vpop.f32.mrb[44].mxu0  ;;  %v2985_v56 = vadd.f32 %v2946_v34, %v2945_v45 }
 0x497   :  { %v9138_v62 = vadd.f32 %v2806_v44, %v11881_v12  ;;  %v2808_v49 = vpop.f32.mrb[45].mxu0 }
 0x498   :  { %v9139_v24 = vadd.f32 %v2808_v49, %v11885_v21  ;;  %2986 = vadd.xlane.f32.xlu0 %v2985_v56  ;;  %v2810_v26 = vpop.f32.mrb[46].mxu0  ;;  %v2988_v43 = vadd.f32 %v2948_v47, %v2947_v13  ;;  %v9637_v56 = vld [vmem:[%s13531_s7 + $0x104] ss:$16 sps:$4 sm:$0xff]  }
 0x499   :  { %v11949_v0 = vmax.f32 %v9138_v62, 0.0  ;;  %v9140_v53 = vadd.f32 %v2810_v26, %v11881_v12  ;;  %v2812_v25 = vpop.f32.mrb[47].mxu0  ;;  %3800 = vmatprep.subr.bf16.mxu0 %v9637_v56 }
 0x49a   :  { %v11952_v36 = vmax.f32 %v9139_v24, 0.0  ;;  %v9141_v48 = vadd.f32 %v2812_v25, %v11885_v21  ;;  %2989 = vadd.xlane.f32.xlu1 %v2988_v43  ;;  %v9635_v24 = vld [vmem:[%s13531_s7 + $0x100] ss:$16 sps:$4 sm:$0xff]  }
 0x49b   :  { %v2949_v58 = vmul.f32 %v11949_v0, %v11949_v0  ;;  %v11957_v15 = vmax.f32 %v9140_v53, 0.0  ;;  %3801 = vmatpush1.bf16.msra.mxu0 %v9635_v24 }
 0x49c   :  { %v2950_v54 = vmul.f32 %v11952_v36, %v11952_v36  ;;  %v11961_v39 = vmax.f32 %v9141_v48, 0.0 }
 0x49d   :  { %v2951_v4 = vmul.f32 %v11957_v15, %v11957_v15 }
 0x49e   :  { %v2952_v14 = vmul.f32 %v11961_v39, %v11961_v39  ;;  %v2816_v51 = vpop.f32.mrb[48].mxu0  ;;  %v2991_v31 = vadd.f32 %v2950_v54, %v2949_v58 }
 0x49f   :  { %v9142_v63 = vadd.f32 %v2816_v51, %v11881_v12  ;;  %v2818_v38 = vpop.f32.mrb[49].mxu0 }
 0x4a0   :  { %v9143_v3 = vadd.f32 %v2818_v38, %v11885_v21  ;;  %2992 = vadd.xlane.f32.xlu0 %v2991_v31  ;;  %v2820_v55 = vpop.f32.mrb[50].mxu0  ;;  %v2994_v20 = vadd.f32 %v2952_v14, %v2951_v4  ;;  %v9638_v31 = vld [vmem:[%s13531_s7 + $0x120] ss:$16 sps:$4 sm:$0xff]  }
 0x4a1   :  { %v11969_v41 = vmax.f32 %v9142_v63, 0.0  ;;  %v9144_v27 = vadd.f32 %v2820_v55, %v11881_v12  ;;  %v2822_v28 = vpop.f32.mrb[51].mxu0  ;;  %v9640_v63 = vld [vmem:[%s13531_s7 + $0x124] ss:$16 sps:$4 sm:$0xff]  }
 0x4a2   :  { %v11972_v57 = vmax.f32 %v9143_v3, 0.0  ;;  %v9145_v6 = vadd.f32 %v2822_v28, %v11885_v21  ;;  %2995 = vadd.xlane.f32.xlu1 %v2994_v20  ;;  %3802 = vmatprep.subr.bf16.mxu0 %v9640_v63 }
 0x4a3   :  { %v2953_v23 = vmul.f32 %v11969_v41, %v11969_v41  ;;  %v11977_v52 = vmax.f32 %v9144_v27, 0.0  ;;  %3803 = vmatpush1.bf16.msra.mxu0 %v9638_v31 }
 0x4a4   :  { %v2954_v7 = vmul.f32 %v11972_v57, %v11972_v57  ;;  %v11981_v40 = vmax.f32 %v9145_v6, 0.0  ;;  %v9643_v6 = vld [vmem:[%s13531_s7 + $0x144] ss:$16 sps:$4 sm:$0xff]  }
 0x4a5   :  { %v2955_v61 = vmul.f32 %v11977_v52, %v11977_v52  ;;  %3804 = vmatprep.subr.bf16.mxu0 %v9643_v6 }
 0x4a6   :  { %v2956_v59 = vmul.f32 %v11981_v40, %v11981_v40  ;;  %v2826_v18 = vpop.f32.mrb[52].mxu0  ;;  %v2997_v42 = vadd.f32 %v2954_v7, %v2953_v23 }
 0x4a7   :  { %v9146_v32 = vadd.f32 %v2826_v18, %v11881_v12  ;;  %v2828_v17 = vpop.f32.mrb[53].mxu0 }
 0x4a8   :  { %v9147_v22 = vadd.f32 %v2828_v17, %v11885_v21  ;;  %2998 = vadd.xlane.f32.xlu0 %v2997_v42  ;;  %v2830_v45 = vpop.f32.mrb[54].mxu0  ;;  %v3000_v34 = vadd.f32 %v2956_v59, %v2955_v61  ;;  %v9641_v61 = vld [vmem:[%s13531_s7 + $0x140] ss:$16 sps:$4 sm:$0xff]  }
 0x4a9   :  { %v11995_v13 = vmax.f32 %v9146_v32, 0.0  ;;  %v9148_v47 = vadd.f32 %v2830_v45, %v11881_v12  ;;  %v2832_v44 = vpop.f32.mrb[55].mxu0  ;;  %3805 = vmatpush1.bf16.msra.mxu0 %v9641_v61  ;;  %v9650_v61 = vld [vmem:[%s13531_s7 + $0x1a0] ss:$16 sps:$4 sm:$0xff]  }
 0x4aa   :  { %v12001_v62 = vmax.f32 %v9147_v22, 0.0  ;;  %v9149_v49 = vadd.f32 %v2832_v44, %v11885_v21  ;;  %3001 = vadd.xlane.f32.xlu1 %v3000_v34  ;;  %v9646_v44 = vld [vmem:[%s13531_s7 + $0x164] ss:$16 sps:$4 sm:$0xff]  }
 0x4ab   :  { %v2957_v26 = vmul.f32 %v11995_v13, %v11995_v13  ;;  %v12009_v43 = vmax.f32 %v9148_v47, 0.0  ;;  %v9644_v47 = vld [vmem:[%s13531_s7 + $0x160] ss:$16 sps:$4 sm:$0xff]   ;;  %3806 = vmatprep.subr.bf16.mxu0 %v9646_v44 }
 0x4ac   :  { %v2958_v53 = vmul.f32 %v12001_v62, %v12001_v62  ;;  %v12013_v25 = vmax.f32 %v9149_v49, 0.0 }
 0x4ad   :  { %v2959_v48 = vmul.f32 %v12009_v43, %v12009_v43  ;;  %3807 = vmatpush1.bf16.msra.mxu0 %v9644_v47 }
 0x4ae   :  { %v2960_v58 = vmul.f32 %v12013_v25, %v12013_v25  ;;  %v2836_v54 = vpop.f32.mrb[56].mxu0  ;;  %v3003_v4 = vadd.f32 %v2958_v53, %v2957_v26 }
 0x4af   :  { %v9150_v14 = vadd.f32 %v2836_v54, %v11881_v12  ;;  %v2838_v51 = vpop.f32.mrb[57].mxu0 }
 0x4b0   :  { %v9151_v38 = vadd.f32 %v2838_v51, %v11885_v21  ;;  %3004 = vadd.xlane.f32.xlu0 %v3003_v4  ;;  %v2840_v3 = vpop.f32.mrb[58].mxu0  ;;  %v3006_v55 = vadd.f32 %v2960_v58, %v2959_v48  ;;  %v9649_v58 = vld [vmem:[%s13531_s7 + $0x184] ss:$16 sps:$4 sm:$0xff]  }
 0x4b1   :  { %v12027_v20 = vmax.f32 %v9150_v14, 0.0  ;;  %v9152_v27 = vadd.f32 %v2840_v3, %v11881_v12  ;;  %v2842_v28 = vpop.f32.mrb[59].mxu0  ;;  %v9647_v14 = vld [vmem:[%s13531_s7 + $0x180] ss:$16 sps:$4 sm:$0xff]   ;;  %3808 = vmatprep.subr.bf16.mxu0 %v9649_v58 }
 0x4b2   :  { %v12033_v23 = vmax.f32 %v9151_v38, 0.0  ;;  %v9153_v7 = vadd.f32 %v2842_v28, %v11885_v21  ;;  %3007 = vadd.xlane.f32.xlu1 %v3006_v55  ;;  %3809 = vmatpush1.bf16.msra.mxu0 %v9647_v14  ;;  %v9658_v14 = vld [vmem:[%s13531_s7 + $0x1e4] ss:$16 sps:$4 sm:$0xff]  }
 0x4b3   :  { %v2961_v59 = vmul.f32 %v12027_v20, %v12027_v20  ;;  %v12041_v18 = vmax.f32 %v9152_v27, 0.0 }
 0x4b4   :  { %v2962_v42 = vmul.f32 %v12033_v23, %v12033_v23  ;;  %v12045_v32 = vmax.f32 %v9153_v7, 0.0 }
 0x4b5   :  { %v2963_v17 = vmul.f32 %v12041_v18, %v12041_v18 }
 0x4b6   :  { %v2964_v9 = vmul.f32 %v12045_v32, %v12045_v32  ;;  %v2846_v50 = vpop.f32.mrb[60].mxu0  ;;  %v3009_v22 = vadd.f32 %v2962_v42, %v2961_v59  ;;  %v9652_v59 = vld [vmem:[%s13531_s7 + $0x1a4] ss:$16 sps:$4 sm:$0xff]  }
 0x4b7   :  { %v9154_v45 = vadd.f32 %v2846_v50, %v11881_v12  ;;  %v2848_v34 = vpop.f32.mrb[61].mxu0  ;;  %3810 = vmatprep.subr.bf16.mxu0 %v9652_v59 }
 0x4b8   :  { %v9155_v56 = vadd.f32 %v2848_v34, %v11885_v21  ;;  %3010 = vadd.xlane.f32.xlu0 %v3009_v22  ;;  %v2850_v49 = vpop.f32.mrb[62].mxu0  ;;  %v3012_v24 = vadd.f32 %v2964_v9, %v2963_v17  ;;  %v9655_v34 = vld [vmem:[%s13531_s7 + $0x1c4] ss:$16 sps:$4 sm:$0xff]   ;;  %3811 = vmatpush1.bf16.msra.mxu0 %v9650_v61 }
 0x4b9   :  { %v12059_v26 = vmax.f32 %v9154_v45, 0.0  ;;  %v9156_v53 = vadd.f32 %v2850_v49, %v11881_v12  ;;  %v2852_v48 = vpop.f32.mrb[63].mxu0  ;;  %3812 = vmatprep.subr.bf16.mxu0 %v9655_v34 }
 0x4ba   :  { %v12065_v54 = vmax.f32 %v9155_v56, 0.0  ;;  %v9157_v4 = vadd.f32 %v2852_v48, %v11885_v21  ;;  %3013 = vadd.xlane.f32.xlu1 %v3012_v24  ;;  %v9653_v56 = vld [vmem:[%s13531_s7 + $0x1c0] ss:$16 sps:$4 sm:$0xff]  }
 0x4bb   :  { %v2965_v51 = vmul.f32 %v12059_v26, %v12059_v26  ;;  %v12073_v31 = vmax.f32 %v9156_v53, 0.0 }
 0x4bc   :  { %v2966_v63 = vmul.f32 %v12065_v54, %v12065_v54  ;;  %v12077_v38 = vmax.f32 %v9157_v4, 0.0  ;;  %3813 = vmatpush1.bf16.msra.mxu0 %v9653_v56  ;;  %v9656_v4 = vld [vmem:[%s13531_s7 + $0x1e0] ss:$16 sps:$4 sm:$0xff]  }
 0x4bd   :  { %v2967_v3 = vmul.f32 %v12073_v31, %v12073_v31  ;;  %3814 = vmatprep.subr.bf16.mxu0 %v9658_v14 }
 0x4be   :  { %v2968_v55 = vmul.f32 %v12077_v38, %v12077_v38  ;;  %v2856_v27 = vpop.f32.mrb[64].mxu0  ;;  %v3015_v28 = vadd.f32 %v2966_v63, %v2965_v51  ;;  %v9661_v63 = vld [vmem:[%s13533_s6 + $0x4] ss:$8 sps:$4 sm:$0xff]  }
 0x4bf   :  { %v9158_v6 = vadd.f32 %v2856_v27, %v11881_v12  ;;  %v2858_v7 = vpop.f32.mrb[65].mxu0  ;;  %7765 = vmatprep.mubr.msk.bf16.mxu1 %vm3306_vm0, %v9661_v63 }
 0x4c0   :  { %v9159_v42 = vadd.f32 %v2858_v7, %v11885_v21  ;;  %3016 = vadd.xlane.f32.xlu0 %v3015_v28  ;;  %v2860_v17 = vpop.f32.mrb[66].mxu0  ;;  %v3018_v9 = vadd.f32 %v2968_v55, %v2967_v3  ;;  %3815 = vmatpush1.bf16.msra.mxu0 %v9656_v4 }
 0x4c1   :  { %v12091_v50 = vmax.f32 %v9158_v6, 0.0  ;;  %v9160_v22 = vadd.f32 %v2860_v17, %v11881_v12  ;;  %v2862_v45 = vpop.f32.mrb[67].mxu0 }
 0x4c2   :  { %v12097_v47 = vmax.f32 %v9159_v42, 0.0  ;;  %v9161_v44 = vadd.f32 %v2862_v45, %v11885_v21  ;;  %3019 = vadd.xlane.f32.xlu1 %v3018_v9 }
 0x4c3   :  { %v2969_v49 = vmul.f32 %v12091_v50, %v12091_v50  ;;  %v12105_v12 = vmax.f32 %v9160_v22, 0.0 }
 0x4c4   :  { %v2970_v24 = vmul.f32 %v12097_v47, %v12097_v47  ;;  %v12109_v53 = vmax.f32 %v9161_v44, 0.0 }
 0x4c5   :  { %v2971_v21 = vmul.f32 %v12105_v12, %v12105_v12 }
 0x4c6   :  { %v2972_v48 = vmul.f32 %v12109_v53, %v12109_v53  ;;  %v3021_v58 = vadd.f32 %v2970_v24, %v2969_v49 }
 0x4c8   :  { %3022 = vadd.xlane.f32.xlu0 %v3021_v58  ;;  %v3024_v51 = vadd.f32 %v2972_v48, %v2971_v21 }
 0x4ca   :  { %3025 = vadd.xlane.f32.xlu1 %v3024_v51 }
 0x515   :  { %v2975_v3 = vpop.xlane.xlu0 %2974 }
 0x516   :  { %10363 = vrsqrt.f32 %v2975_v3  ;;  %vm3029_vm1 = vcmp.eq.f32.partialorder %v2975_v3, inf  ;;  %v3032_v59 = vand.u32 2147483648, %v2975_v3  ;;  %vm3031_vm2 = vcmp.eq.f32.partialorder %v2975_v3, 0.0 }
 0x517   :  { %v2978_v55 = vpop.xlane.xlu1 %2977 }
 0x518   :  { %10365 = vrsqrt.f32 %v2978_v55  ;;  %vm3036_vm3 = vcmp.eq.f32.partialorder %v2978_v55, inf  ;;  %v3039_v22 = vand.u32 2147483648, %v2978_v55  ;;  %vm3038_vm4 = vcmp.eq.f32.partialorder %v2978_v55, 0.0 }
 0x51d   :  { %v2981_v27 = vpop.xlane.xlu0 %2980 }
 0x51e   :  { %10367 = vrsqrt.f32 %v2981_v27  ;;  %vm3043_vm5 = vcmp.eq.f32.partialorder %v2981_v27, inf  ;;  %v3046_v4 = vand.u32 2147483648, %v2981_v27  ;;  %vm3045_vm6 = vcmp.eq.f32.partialorder %v2981_v27, 0.0 }
 0x51f   :  { %v2984_v28 = vpop.xlane.xlu1 %2983 }
 0x520   :  { %v10364_v6 = vpop.eup %10363  ;;  %10369 = vrsqrt.f32 %v2984_v28  ;;  %vm3050_vm7 = vcmp.eq.f32.partialorder %v2984_v28, inf  ;;  %vm3052_vm8 = vcmp.eq.f32.partialorder %v2984_v28, 0.0 }
 0x521   :  { %v3028_v7 = vmul.f32 %v10364_v6, %v2975_v3 }
 0x522   :  { %v10366_v61 = vpop.eup %10365 }
 0x523   :  { %v3030_v42 = vsel %vm3029_vm1, %v2975_v3, %v3028_v7  ;;  %v3035_v17 = vmul.f32 %v10366_v61, %v2978_v55  ;;  %v3053_v3 = vand.u32 2147483648, %v2984_v28 }
 0x524   :  { %v3033_v9 = vsel %vm3031_vm2, %v3032_v59, %v3030_v42 }
 0x525   :  { %v3153_v45 = vadd.f32 1e-08, %v3033_v9  ;;  %v3037_v34 = vsel %vm3036_vm3, %v2978_v55, %v3035_v17  ;;  %v2987_v44 = vpop.xlane.xlu0 %2986 }
 0x526   :  { %v3040_v56 = vsel %vm3038_vm4, %v3039_v22, %v3037_v34  ;;  %10371 = vrsqrt.f32 %v2987_v44  ;;  %vm3057_vm9 = vcmp.eq.f32.partialorder %v2987_v44, inf  ;;  %vm3059_vm10 = vcmp.eq.f32.partialorder %v2987_v44, 0.0 }
 0x527   :  { %10373 = vrcp.f32 %v3153_v45  ;;  %v3154_v49 = vadd.f32 1e-08, %v3040_v56  ;;  %v2990_v24 = vpop.xlane.xlu1 %2989 }
 0x528   :  { %v10368_v21 = vpop.eup %10367  ;;  %10375 = vrsqrt.f32 %v2990_v24  ;;  %vm3064_vm11 = vcmp.eq.f32.partialorder %v2990_v24, inf  ;;  %vm3066_vm12 = vcmp.eq.f32.partialorder %v2990_v24, 0.0 }
 0x529   :  { %10377 = vrcp.f32 %v3154_v49  ;;  %v3042_v48 = vmul.f32 %v10368_v21, %v2981_v27  ;;  %v3067_v21 = vand.u32 2147483648, %v2990_v24 }
 0x52a   :  { %v10370_v58 = vpop.eup %10369 }
 0x52b   :  { %v3044_v14 = vsel %vm3043_vm5, %v2981_v27, %v3042_v48  ;;  %v3049_v51 = vmul.f32 %v10370_v58, %v2984_v28  ;;  %v3060_v27 = vand.u32 2147483648, %v2987_v44 }
 0x52c   :  { %v3047_v63 = vsel %vm3045_vm6, %v3046_v4, %v3044_v14 }
 0x52d   :  { %v3155_v55 = vadd.f32 1e-08, %v3047_v63  ;;  %v3051_v6 = vsel %vm3050_vm7, %v2984_v28, %v3049_v51  ;;  %v2993_v7 = vpop.xlane.xlu0 %2992 }
 0x52e   :  { %v3054_v61 = vsel %vm3052_vm8, %v3053_v3, %v3051_v6  ;;  %10379 = vrsqrt.f32 %v2993_v7  ;;  %vm3071_vm13 = vcmp.eq.f32.partialorder %v2993_v7, inf  ;;  %vm3073_vm14 = vcmp.eq.f32.partialorder %v2993_v7, 0.0 }
 0x52f   :  { %10381 = vrcp.f32 %v3155_v55  ;;  %v3156_v59 = vadd.f32 1e-08, %v3054_v61  ;;  %v2996_v42 = vpop.xlane.xlu1 %2995 }
 0x530   :  { %v10372_v17 = vpop.eup %10371  ;;  %10383 = vrsqrt.f32 %v2996_v42  ;;  %vm3078_vm15 = vcmp.eq.f32.partialorder %v2996_v42, inf  ;;  %vm3080_vm1 = vcmp.eq.f32.partialorder %v2996_v42, 0.0 }
 0x531   :  { %v10374_v9 = vpop.eup %10373  ;;  %10385 = vrcp.f32 %v3156_v59  ;;  %v3056_v22 = vmul.f32 %v10372_v17, %v2987_v44  ;;  %v3074_v17 = vand.u32 2147483648, %v2993_v7 }
 0x532   :  { %v10376_v45 = vpop.eup %10375  ;;  %v3208_v51 = vmul.f32 %v10374_v9, %v11892_v35  ;;  %v3207_v61 = vmul.f32 %v10374_v9, %v11889_v33  ;;  %v3081_v9 = vand.u32 2147483648, %v2996_v42 }
 0x533   :  { %v10378_v34 = vpop.eup %10377  ;;  %v3058_v56 = vsel %vm3057_vm9, %v2987_v44, %v3056_v22  ;;  %v3063_v49 = vmul.f32 %v10376_v45, %v2990_v24 }
 0x534   :  { %v3061_v28 = vsel %vm3059_vm10, %v3060_v27, %v3058_v56  ;;  %v3210_v48 = vmul.f32 %v10378_v34, %v11901_v29  ;;  %v3209_v63 = vmul.f32 %v10378_v34, %v11897_v8 }
 0x535   :  { %v3157_v58 = vadd.f32 1e-08, %v3061_v28  ;;  %v3065_v4 = vsel %vm3064_vm11, %v2990_v24, %v3063_v49  ;;  %v2999_v14 = vpop.xlane.xlu0 %2998 }
 0x536   :  { %v3068_v3 = vsel %vm3066_vm12, %v3067_v21, %v3065_v4  ;;  %10387 = vrsqrt.f32 %v2999_v14  ;;  %v12130_v44 = vpack.c.bf16 %v3210_v48, %v3208_v51  ;;  %v12136_v35 = vpack.c.bf16 %v3209_v63, %v3207_v61 }
 0x537   :  { %10389 = vrcp.f32 %v3157_v58  ;;  %v3158_v55 = vadd.f32 1e-08, %v3068_v3  ;;  %v12128_v6 = vpop.xlane.xlu1 %3001  ;;  %vm3085_vm2 = vcmp.eq.f32.partialorder %v2999_v14, inf  ;;  %vm3087_vm3 = vcmp.eq.f32.partialorder %v2999_v14, 0.0 }
 0x538   :  { %v10380_v59 = vpop.eup %10379  ;;  %10391 = vrsqrt.f32 %v12128_v6  ;;  %3319 = vmatprep.subr.bf16.mxu1 %v12130_v44  ;;  %4040 = vmatprep.subr.bf16.mxu0 %v12130_v44  ;;  %vm3092_vm4 = vcmp.eq.f32.partialorder %v12128_v6, inf  ;;  %vm3094_vm5 = vcmp.eq.f32.partialorder %v12128_v6, 0.0 }
 0x539   :  { %v10382_v29 = vpop.eup %10381  ;;  %10393 = vrcp.f32 %v3158_v55  ;;  %v3070_v24 = vmul.f32 %v10380_v59, %v2993_v7  ;;  %3320 = vmatpush1.bf16.msra.mxu1 %v12136_v35 }
 0x53a   :  { %v10384_v8 = vpop.eup %10383  ;;  %v3212_v21 = vmul.f32 %v10382_v29, %v11912_v19  ;;  %v3211_v63 = vmul.f32 %v10382_v29, %v11909_v2  ;;  %v3095_v29 = vand.u32 2147483648, %v12128_v6 }
 0x53b   :  { %v10386_v22 = vpop.eup %10385  ;;  %v3072_v45 = vsel %vm3071_vm13, %v2993_v7, %v3070_v24  ;;  %v3077_v27 = vmul.f32 %v10384_v8, %v2996_v42 }
 0x53c   :  { %v3075_v33 = vsel %vm3073_vm14, %v3074_v17, %v3072_v45  ;;  %v3214_v34 = vmul.f32 %v10386_v22, %v11921_v60  ;;  %v3213_v48 = vmul.f32 %v10386_v22, %v11917_v11  ;;  %v3088_v11 = vand.u32 2147483648, %v2999_v14 }
 0x53d   :  { %v3159_v56 = vadd.f32 1e-08, %v3075_v33  ;;  %v3079_v49 = vsel %vm3078_vm15, %v2996_v42, %v3077_v27  ;;  %v3005_v28 = vpop.xlane.xlu0 %3004 }
 0x53e   :  { %v3082_v58 = vsel %vm3080_vm1, %v3081_v9, %v3079_v49  ;;  %10395 = vrsqrt.f32 %v3005_v28  ;;  %v12142_v51 = vpack.c.bf16 %v3214_v34, %v3212_v21  ;;  %v12146_v42 = vpack.c.bf16 %v3213_v48, %v3211_v63 }
 0x53f   :  { %10397 = vrcp.f32 %v3159_v56  ;;  %v3160_v7 = vadd.f32 1e-08, %v3082_v58  ;;  %v3008_v4 = vpop.xlane.xlu1 %3007  ;;  %vm3099_vm6 = vcmp.eq.f32.partialorder %v3005_v28, inf  ;;  %vm3101_vm7 = vcmp.eq.f32.partialorder %v3005_v28, 0.0 }
 0x540   :  { %v10388_v3 = vpop.eup %10387  ;;  %10399 = vrsqrt.f32 %v3008_v4  ;;  %3321 = vmatprep.subr.bf16.mxu1 %v12142_v51  ;;  %vm3106_vm8 = vcmp.eq.f32.partialorder %v3008_v4, inf  ;;  %vm3108_vm9 = vcmp.eq.f32.partialorder %v3008_v4, 0.0 }
 0x541   :  { %v10390_v55 = vpop.eup %10389  ;;  %10401 = vrcp.f32 %v3160_v7  ;;  %v3084_v60 = vmul.f32 %v10388_v3, %v2999_v14  ;;  %3322 = vmatpush1.bf16.msra.mxu1 %v12146_v42  ;;  %v3109_v3 = vand.u32 2147483648, %v3008_v4 }
 0x542   :  { %v10392_v19 = vpop.eup %10391  ;;  %v3216_v27 = vmul.f32 %v10390_v55, %v11932_v30  ;;  %v3215_v49 = vmul.f32 %v10390_v55, %v11929_v5 }
 0x543   :  { %v10394_v61 = vpop.eup %10393  ;;  %v3086_v59 = vsel %vm3085_vm2, %v2999_v14, %v3084_v60  ;;  %v3091_v24 = vmul.f32 %v10392_v19, %v12128_v6 }
 0x544   :  { %v3089_v2 = vsel %vm3087_vm3, %v3088_v11, %v3086_v59  ;;  %v3218_v8 = vmul.f32 %v10394_v61, %v11941_v37  ;;  %v3217_v14 = vmul.f32 %v10394_v61, %v11937_v16  ;;  %v3102_v16 = vand.u32 2147483648, %v3005_v28 }
 0x545   :  { %v3161_v17 = vadd.f32 1e-08, %v3089_v2  ;;  %v3093_v22 = vsel %vm3092_vm4, %v12128_v6, %v3091_v24  ;;  %v3011_v45 = vpop.xlane.xlu0 %3010 }
 0x546   :  { %v3096_v33 = vsel %vm3094_vm5, %v3095_v29, %v3093_v22  ;;  %10403 = vrsqrt.f32 %v3011_v45  ;;  %v12157_v56 = vpack.c.bf16 %v3218_v8, %v3216_v27  ;;  %v12161_v6 = vpack.c.bf16 %v3217_v14, %v3215_v49 }
 0x547   :  { %10405 = vrcp.f32 %v3161_v17  ;;  %v3162_v9 = vadd.f32 1e-08, %v3096_v33  ;;  %v3014_v34 = vpop.xlane.xlu1 %3013  ;;  %vm3113_vm10 = vcmp.eq.f32.partialorder %v3011_v45, inf  ;;  %vm3115_vm11 = vcmp.eq.f32.partialorder %v3011_v45, 0.0 }
 0x548   :  { %v10396_v21 = vpop.eup %10395  ;;  %10407 = vrsqrt.f32 %v3014_v34  ;;  %3323 = vmatprep.subr.bf16.mxu1 %v12157_v56  ;;  %vm3120_vm12 = vcmp.eq.f32.partialorder %v3014_v34, inf  ;;  %vm3122_vm13 = vcmp.eq.f32.partialorder %v3014_v34, 0.0 }
 0x549   :  { %v10398_v37 = vpop.eup %10397  ;;  %10409 = vrcp.f32 %v3162_v9  ;;  %v3098_v48 = vmul.f32 %v10396_v21, %v3005_v28  ;;  %3324 = vmatpush1.bf16.msra.mxu1 %v12161_v6  ;;  %v3123_v9 = vand.u32 2147483648, %v3014_v34 }
 0x54a   :  { %v10400_v30 = vpop.eup %10399  ;;  %v3220_v61 = vmul.f32 %v10398_v37, %v11952_v36  ;;  %v3219_v8 = vmul.f32 %v10398_v37, %v11949_v0 }
 0x54b   :  { %v10402_v58 = vpop.eup %10401  ;;  %v3100_v7 = vsel %vm3099_vm6, %v3005_v28, %v3098_v48  ;;  %v3105_v63 = vmul.f32 %v10400_v30, %v3008_v4 }
 0x54c   :  { %v3103_v5 = vsel %vm3101_vm7, %v3102_v16, %v3100_v7  ;;  %v3222_v55 = vmul.f32 %v10402_v58, %v11961_v39  ;;  %v3221_v59 = vmul.f32 %v10402_v58, %v11957_v15  ;;  %v3116_v15 = vand.u32 2147483648, %v3011_v45 }
 0x54d   :  { %v3163_v60 = vadd.f32 1e-08, %v3103_v5  ;;  %v3107_v19 = vsel %vm3106_vm8, %v3008_v4, %v3105_v63  ;;  %v3017_v11 = vpop.xlane.xlu0 %3016 }
 0x54e   :  { %v3110_v24 = vsel %vm3108_vm9, %v3109_v3, %v3107_v19  ;;  %10411 = vrsqrt.f32 %v3017_v11  ;;  %v12167_v29 = vpack.c.bf16 %v3222_v55, %v3220_v61  ;;  %v12171_v4 = vpack.c.bf16 %v3221_v59, %v3219_v8 }
 0x54f   :  { %10413 = vrcp.f32 %v3163_v60  ;;  %v3164_v28 = vadd.f32 1e-08, %v3110_v24  ;;  %v3020_v2 = vpop.xlane.xlu1 %3019  ;;  %vm3127_vm14 = vcmp.eq.f32.partialorder %v3017_v11, inf  ;;  %vm3129_vm15 = vcmp.eq.f32.partialorder %v3017_v11, 0.0 }
 0x550   :  { %v10404_v17 = vpop.eup %10403  ;;  %10415 = vrsqrt.f32 %v3020_v2  ;;  %3325 = vmatprep.subr.bf16.mxu1 %v12167_v29  ;;  %vm3134_vm1 = vcmp.eq.f32.partialorder %v3020_v2, inf  ;;  %v3137_v59 = vand.u32 2147483648, %v3020_v2  ;;  %vm3136_vm2 = vcmp.eq.f32.partialorder %v3020_v2, 0.0 }
 0x551   :  { %v10406_v22 = vpop.eup %10405  ;;  %10417 = vrcp.f32 %v3164_v28  ;;  %v3112_v39 = vmul.f32 %v10404_v17, %v3011_v45  ;;  %3326 = vmatpush1.bf16.msra.mxu1 %v12171_v4 }
 0x552   :  { %v10408_v36 = vpop.eup %10407  ;;  %v3224_v30 = vmul.f32 %v10406_v22, %v11972_v57  ;;  %v3223_v5 = vmul.f32 %v10406_v22, %v11969_v41 }
 0x553   :  { %v10410_v27 = vpop.eup %10409  ;;  %v3114_v14 = vsel %vm3113_vm10, %v3011_v45, %v3112_v39  ;;  %v3119_v33 = vmul.f32 %v10408_v36, %v3014_v34 }
 0x554   :  { %v3117_v0 = vsel %vm3115_vm11, %v3116_v15, %v3114_v14  ;;  %v3226_v49 = vmul.f32 %v10410_v27, %v11981_v40  ;;  %v3225_v16 = vmul.f32 %v10410_v27, %v11977_v52  ;;  %v3130_v52 = vand.u32 2147483648, %v3017_v11 }
 0x555   :  { %v3165_v21 = vadd.f32 1e-08, %v3117_v0  ;;  %v3121_v37 = vsel %vm3120_vm12, %v3014_v34, %v3119_v33  ;;  %v3023_v48 = vpop.xlane.xlu0 %3022 }
 0x556   :  { %v3124_v58 = vsel %vm3122_vm13, %v3123_v9, %v3121_v37  ;;  %10419 = vrsqrt.f32 %v3023_v48  ;;  %v12177_v63 = vpack.c.bf16 %v3226_v49, %v3224_v30  ;;  %v12181_v34 = vpack.c.bf16 %v3225_v16, %v3223_v5 }
 0x557   :  { %10421 = vrcp.f32 %v3165_v21  ;;  %v3166_v45 = vadd.f32 1e-08, %v3124_v58  ;;  %v3026_v7 = vpop.xlane.xlu1 %3025  ;;  %vm3141_vm3 = vcmp.eq.f32.partialorder %v3023_v48, inf  ;;  %vm3143_vm4 = vcmp.eq.f32.partialorder %v3023_v48, 0.0 }
 0x558   :  { %v10412_v3 = vpop.eup %10411  ;;  %10423 = vrsqrt.f32 %v3026_v7  ;;  %3327 = vmatprep.subr.bf16.mxu1 %v12177_v63  ;;  %vm3148_vm5 = vcmp.eq.f32.partialorder %v3026_v7, inf  ;;  %v3151_v9 = vand.u32 2147483648, %v3026_v7  ;;  %vm3150_vm6 = vcmp.eq.f32.partialorder %v3026_v7, 0.0 }
 0x559   :  { %v10414_v55 = vpop.eup %10413  ;;  %10425 = vrcp.f32 %v3166_v45  ;;  %v3126_v40 = vmul.f32 %v10412_v3, %v3017_v11  ;;  %3328 = vmatpush1.bf16.msra.mxu1 %v12181_v34 }
 0x55a   :  { %v10416_v57 = vpop.eup %10415  ;;  %v3228_v41 = vmul.f32 %v10414_v55, %v12001_v62  ;;  %v3227_v8 = vmul.f32 %v10414_v55, %v11995_v13 }
 0x55b   :  { %v10418_v60 = vpop.eup %10417  ;;  %v3128_v19 = vsel %vm3127_vm14, %v3017_v11, %v3126_v40  ;;  %v3133_v61 = vmul.f32 %v10416_v57, %v3020_v2 }
 0x55c   :  { %v3131_v24 = vsel %vm3129_vm15, %v3130_v52, %v3128_v19  ;;  %v3230_v28 = vmul.f32 %v10418_v60, %v12013_v25  ;;  %v3229_v17 = vmul.f32 %v10418_v60, %v12009_v43  ;;  %v3144_v43 = vand.u32 2147483648, %v3023_v48 }
 0x55d   :  { %v3167_v22 = vadd.f32 1e-08, %v3131_v24  ;;  %v3135_v39 = vsel %vm3134_vm1, %v3020_v2, %v3133_v61  ;;  %v9674_v24 = vld [vmem:[%s13531_s7 + $0x28] ss:$16 sps:$4 sm:$0xff]  }
 0x55e   :  { %v3138_v36 = vsel %vm3136_vm2, %v3137_v59, %v3135_v39  ;;  %v12188_v15 = vpack.c.bf16 %v3230_v28, %v3228_v41  ;;  %v12190_v11 = vpack.c.bf16 %v3229_v17, %v3227_v8  ;;  %v9673_v41 = vld [vmem:[%s13531_s7 + $0xc] ss:$16 sps:$4 sm:$0xff]   ;;  %v9664_v8 = vld [vmem:[%s13533_s6 + $0x10] ss:$8 sps:$4 sm:$0xff]  }
 0x55f   :  { %10427 = vrcp.f32 %v3167_v22  ;;  %v3168_v27 = vadd.f32 1e-08, %v3138_v36  ;;  %v9679_v28 = vld [vmem:[%s13531_s7 + $0x4c] ss:$16 sps:$4 sm:$0xff]   ;;  %v9677_v22 = vld [vmem:[%s13531_s7 + $0x48] ss:$16 sps:$4 sm:$0xff]  }
 0x560   :  { %v10420_v14 = vpop.eup %10419  ;;  %3329 = vmatprep.subr.bf16.mxu1 %v12188_v15  ;;  %v9665_v17 = vld [vmem:[%s13533_s6 + $0x24] ss:$8 sps:$4 sm:$0xff]   ;;  %v9680_v36 = vld [vmem:[%s13531_s7 + $0x68] ss:$16 sps:$4 sm:$0xff]  }
 0x561   :  { %v10422_v62 = vpop.eup %10421  ;;  %10429 = vrcp.f32 %v3168_v27  ;;  %v3140_v25 = vmul.f32 %v10420_v14, %v3023_v48  ;;  %3330 = vmatpush1.bf16.msra.mxu1 %v12190_v11  ;;  %v9682_v39 = vld [vmem:[%s13531_s7 + $0x6c] ss:$16 sps:$4 sm:$0xff]   ;;  %v9667_v14 = vld [vmem:[%s13533_s6 + $0x20] ss:$8 sps:$4 sm:$0xff]  }
 0x562   :  { %v10424_v13 = vpop.eup %10423  ;;  %v3232_v49 = vmul.f32 %v10422_v62, %v12033_v23  ;;  %v3231_v30 = vmul.f32 %v10422_v62, %v12027_v20  ;;  %v9685_v27 = vld [vmem:[%s13531_s7 + $0x8c] ss:$16 sps:$4 sm:$0xff]  }
 0x563   :  { %v10426_v2 = vpop.eup %10425  ;;  %v3142_v33 = vsel %vm3141_vm3, %v3023_v48, %v3140_v25  ;;  %v3147_v0 = vmul.f32 %v10424_v13, %v3026_v7  ;;  %v9668_v62 = vld [vmem:[%s13533_s6 + $0x34] ss:$8 sps:$4 sm:$0xff]   ;;  %v9683_v25 = vld [vmem:[%s13531_s7 + $0x88] ss:$16 sps:$4 sm:$0xff]  }
 0x564   :  { %v3145_v21 = vsel %vm3143_vm4, %v3144_v43, %v3142_v33  ;;  %v3234_v37 = vmul.f32 %v10426_v2, %v12045_v32  ;;  %v3233_v16 = vmul.f32 %v10426_v2, %v12041_v18  ;;  %v9688_v13 = vld [vmem:[%s13531_s7 + $0xac] ss:$16 sps:$4 sm:$0xff]   ;;  %v9686_v43 = vld [vmem:[%s13531_s7 + $0xa8] ss:$16 sps:$4 sm:$0xff]  }
 0x565   :  { %v3169_v58 = vadd.f32 1e-08, %v3145_v21  ;;  %v3149_v45 = vsel %vm3148_vm5, %v3026_v7, %v3147_v0  ;;  %v9691_v2 = vld [vmem:[%s13531_s7 + $0xcc] ss:$16 sps:$4 sm:$0xff]   ;;  %v9670_v33 = vld [vmem:[%s13533_s6 + $0x30] ss:$8 sps:$4 sm:$0xff]  }
 0x566   :  { %v3152_v5 = vsel %vm3150_vm6, %v3151_v9, %v3149_v45  ;;  %v12198_v3 = vpack.c.bf16 %v3234_v37, %v3232_v49  ;;  %v12200_v55 = vpack.c.bf16 %v3233_v16, %v3231_v30  ;;  %v9689_v0 = vld [vmem:[%s13531_s7 + $0xc8] ss:$16 sps:$4 sm:$0xff]   ;;  %v9694_v9 = vld [vmem:[%s13531_s7 + $0xec] ss:$16 sps:$4 sm:$0xff]  }
 0x567   :  { %10431 = vrcp.f32 %v3169_v58  ;;  %v3170_v48 = vadd.f32 1e-08, %v3152_v5  ;;  %v9692_v49 = vld [vmem:[%s13531_s7 + $0xe8] ss:$16 sps:$4 sm:$0xff]   ;;  %v9697_v21 = vld [vmem:[%s13531_s7 + $0x10c] ss:$16 sps:$4 sm:$0xff]  }
 0x568   :  { %3331 = vmatprep.subr.bf16.mxu1 %v12198_v3  ;;  %v9695_v37 = vld [vmem:[%s13531_s7 + $0x108] ss:$16 sps:$4 sm:$0xff]   ;;  %v9700_v30 = vld [vmem:[%s13531_s7 + $0x12c] ss:$16 sps:$4 sm:$0xff]  }
 0x569   :  { %v10428_v23 = vpop.eup %10427  ;;  %10433 = vrcp.f32 %v3170_v48  ;;  %3332 = vmatpush1.bf16.msra.mxu1 %v12200_v55  ;;  %v9698_v16 = vld [vmem:[%s13531_s7 + $0x128] ss:$16 sps:$4 sm:$0xff]   ;;  %v9703_v58 = vld [vmem:[%s13531_s7 + $0x14c] ss:$16 sps:$4 sm:$0xff]  }
 0x56a   :  { %v3236_v20 = vmul.f32 %v10428_v23, %v12065_v54  ;;  %v3235_v7 = vmul.f32 %v10428_v23, %v12059_v26  ;;  %v9701_v45 = vld [vmem:[%s13531_s7 + $0x148] ss:$16 sps:$4 sm:$0xff]   ;;  %v9706_v5 = vld [vmem:[%s13531_s7 + $0x16c] ss:$16 sps:$4 sm:$0xff]  }
 0x56b   :  { %v10430_v32 = vpop.eup %10429  ;;  %v9704_v48 = vld [vmem:[%s13531_s7 + $0x168] ss:$16 sps:$4 sm:$0xff]   ;;  %v9709_v23 = vld [vmem:[%s13531_s7 + $0x18c] ss:$16 sps:$4 sm:$0xff]  }
 0x56c   :  { %v3238_v18 = vmul.f32 %v10430_v32, %v12077_v38  ;;  %v3237_v40 = vmul.f32 %v10430_v32, %v12073_v31  ;;  %v9707_v32 = vld [vmem:[%s13531_s7 + $0x188] ss:$16 sps:$4 sm:$0xff]  }
 0x56e   :  { %v12208_v57 = vpack.c.bf16 %v3238_v18, %v3236_v20  ;;  %v12210_v52 = vpack.c.bf16 %v3237_v40, %v3235_v7  ;;  %v9712_v20 = vld [vmem:[%s13531_s7 + $0x1ac] ss:$16 sps:$4 sm:$0xff]   ;;  %v9710_v18 = vld [vmem:[%s13531_s7 + $0x1a8] ss:$16 sps:$4 sm:$0xff]  }
 0x56f   :  { %v9715_v7 = vld [vmem:[%s13531_s7 + $0x1cc] ss:$16 sps:$4 sm:$0xff]   ;;  %v9713_v40 = vld [vmem:[%s13531_s7 + $0x1c8] ss:$16 sps:$4 sm:$0xff]  }
 0x570   :  { %3333 = vmatprep.subr.bf16.mxu1 %v12208_v57 }
 0x571   :  { %v10432_v60 = vpop.eup %10431  ;;  %3334 = vmatpush1.bf16.msra.mxu1 %v12210_v52 }
 0x572   :  { %v3240_v61 = vmul.f32 %v10432_v60, %v12097_v47  ;;  %v3239_v38 = vmul.f32 %v10432_v60, %v12091_v50  ;;  %v9659_v47 = vld [vmem:[%s13533_s6] ss:$8 sps:$4 sm:$0xff]   ;;  %v9662_v50 = vld [vmem:[%s13533_s6 + $0x14] ss:$8 sps:$4 sm:$0xff]  }
 0x573   :  { %v10434_v19 = vpop.eup %10433  ;;  %v9716_v60 = vld [vmem:[%s13531_s7 + $0x1e8] ss:$16 sps:$4 sm:$0xff]  }
 0x574   :  { %v3242_v54 = vmul.f32 %v10434_v19, %v12109_v53  ;;  %v3241_v26 = vmul.f32 %v10434_v19, %v12105_v12  ;;  %v9671_v12 = vld [vmem:[%s13531_s7 + $0x8] ss:$16 sps:$4 sm:$0xff]   ;;  %v9676_v53 = vld [vmem:[%s13531_s7 + $0x2c] ss:$16 sps:$4 sm:$0xff]  }
 0x575   :  { %v9718_v19 = vld [vmem:[%s13531_s7 + $0x1ec] ss:$16 sps:$4 sm:$0xff]  }
 0x576   :  { %v12218_v59 = vpack.c.bf16 %v3242_v54, %v3240_v61  ;;  %v12220_v31 = vpack.c.bf16 %v3241_v26, %v3239_v38  ;;  %v9721_v61 = vld [vmem:[%s13531_s7 + $0x20c] ss:$16 sps:$4 sm:$0xff]  }
 0x578   :  { %3335 = vmatprep.subr.bf16.mxu1 %v12218_v59 }
 0x579   :  { %3336 = vmatpush1.bf16.msra.mxu1 %v12220_v31 }
 0x57a   :  { %3857 = vmatprep.subr.bf16.mxu1 %v9673_v41 }
 0x57c   :  { %3352 = vmatmul.mubr.bf16.vlgmr.msra.gmra.mrb[144].mxu1 %v9659_v47 }
 0x57d   :  { %7766 = vmatprep.mubr.msk.bf16.mxu1 %vm3306_vm0, %v9662_v50  ;;  %3858 = vmatpush1.bf16.msra.mxu1 %v9671_v12  ;;  %v9719_v12 = vld [vmem:[%s13531_s7 + $0x208] ss:$16 sps:$4 sm:$0xff]  }
 0x57e   :  { %3859 = vmatprep.subr.bf16.mxu1 %v9676_v53  ;;  %v9724_v53 = vld [vmem:[%s13531_s7 + $0x22c] ss:$16 sps:$4 sm:$0xff]  }
 0x581   :  { %3860 = vmatpush1.bf16.msra.mxu1 %v9674_v24  ;;  %v9722_v24 = vld [vmem:[%s13531_s7 + $0x228] ss:$16 sps:$4 sm:$0xff]  }
 0x582   :  { %3861 = vmatprep.subr.bf16.mxu1 %v9679_v28 }
 0x584   :  { %3362 = vmatmul.mubr.bf16.gmra.mrb[148].mxu1 %v9664_v8 }
 0x585   :  { %7767 = vmatprep.mubr.msk.bf16.mxu1 %vm3306_vm0, %v9665_v17  ;;  %3862 = vmatpush1.bf16.msra.mxu1 %v9677_v22  ;;  %v9727_v17 = vld [vmem:[%s13531_s7 + $0x24c] ss:$16 sps:$4 sm:$0xff]  }
 0x586   :  { %3863 = vmatprep.subr.bf16.mxu1 %v9682_v39 }
 0x589   :  { %3864 = vmatpush1.bf16.msra.mxu1 %v9680_v36 }
 0x58a   :  { %3865 = vmatprep.subr.bf16.mxu1 %v9685_v27 }
 0x58c   :  { %3372 = vmatmul.mubr.bf16.gmra.mrb[152].mxu1 %v9667_v14  ;;  %v9725_v14 = vld [vmem:[%s13531_s7 + $0x248] ss:$16 sps:$4 sm:$0xff]  }
 0x58d   :  { %7768 = vmatprep.mubr.msk.bf16.mxu1 %vm3306_vm0, %v9668_v62  ;;  %3866 = vmatpush1.bf16.msra.mxu1 %v9683_v25  ;;  %v9730_v62 = vld [vmem:[%s13531_s7 + $0x26c] ss:$16 sps:$4 sm:$0xff]   ;;  %v9728_v25 = vld [vmem:[%s13531_s7 + $0x268] ss:$16 sps:$4 sm:$0xff]  }
 0x58e   :  { %3867 = vmatprep.subr.bf16.mxu1 %v9688_v13 }
 0x591   :  { %3868 = vmatpush1.bf16.msra.mxu1 %v9686_v43 }
 0x592   :  { %3869 = vmatprep.subr.bf16.mxu1 %v9691_v2  ;;  %v9733_v2 = vld [vmem:[%s13531_s7 + $0x28c] ss:$16 sps:$4 sm:$0xff]  }
 0x594   :  { %3382 = vmatmul.mubr.bf16.gmra.mrb[156].mxu1 %v9670_v33 }
 0x595   :  { %3870 = vmatpush1.bf16.msra.mxu1 %v9689_v0 }
 0x596   :  { %3871 = vmatprep.subr.bf16.mxu1 %v9694_v9 }
 0x599   :  { %3872 = vmatpush1.bf16.msra.mxu1 %v9692_v49 }
 0x59a   :  { %3873 = vmatprep.subr.bf16.mxu1 %v9697_v21  ;;  %v9731_v21 = vld [vmem:[%s13531_s7 + $0x288] ss:$16 sps:$4 sm:$0xff]  }
 0x59d   :  { %3874 = vmatpush1.bf16.msra.mxu1 %v9695_v37  ;;  %v9736_v37 = vld [vmem:[%s13531_s7 + $0x2ac] ss:$16 sps:$4 sm:$0xff]  }
 0x59e   :  { %3875 = vmatprep.subr.bf16.mxu1 %v9700_v30  ;;  %v9734_v30 = vld [vmem:[%s13531_s7 + $0x2a8] ss:$16 sps:$4 sm:$0xff]  }
 0x5a1   :  { %3876 = vmatpush1.bf16.msra.mxu1 %v9698_v16 }
 0x5a2   :  { %3877 = vmatprep.subr.bf16.mxu1 %v9703_v58 }
 0x5a5   :  { %3878 = vmatpush1.bf16.msra.mxu1 %v9701_v45  ;;  %v9739_v45 = vld [vmem:[%s13531_s7 + $0x2cc] ss:$16 sps:$4 sm:$0xff]  }
 0x5a6   :  { %3879 = vmatprep.subr.bf16.mxu1 %v9706_v5 }
 0x5a9   :  { %3880 = vmatpush1.bf16.msra.mxu1 %v9704_v48 }
 0x5aa   :  { %3881 = vmatprep.subr.bf16.mxu1 %v9709_v23 }
 0x5ad   :  { %3882 = vmatpush1.bf16.msra.mxu1 %v9707_v32 }
 0x5ae   :  { %3883 = vmatprep.subr.bf16.mxu1 %v9712_v20  ;;  %v9737_v20 = vld [vmem:[%s13531_s7 + $0x2c8] ss:$16 sps:$4 sm:$0xff]  }
 0x5b1   :  { %3884 = vmatpush1.bf16.msra.mxu1 %v9710_v18  ;;  %v9742_v18 = vld [vmem:[%s13531_s7 + $0x2ec] ss:$16 sps:$4 sm:$0xff]  }
 0x5b2   :  { %3885 = vmatprep.subr.bf16.mxu1 %v9715_v7  ;;  %v9748_v7 = vld [vmem:[%s13533_s6 + $0x44] ss:$8 sps:$4 sm:$0xff]  }
 0x5b5   :  { %3886 = vmatpush1.bf16.msra.mxu1 %v9713_v40  ;;  %v9740_v40 = vld [vmem:[%s13531_s7 + $0x2e8] ss:$16 sps:$4 sm:$0xff]  }
 0x5b6   :  { %3887 = vmatprep.subr.bf16.mxu1 %v9718_v19  ;;  %v9743_v19 = vld [vmem:[%s13531_s7 + $0x308] ss:$16 sps:$4 sm:$0xff]  }
 0x5b9   :  { %3888 = vmatpush1.bf16.msra.mxu1 %v9716_v60  ;;  %v9745_v60 = vld [vmem:[%s13531_s7 + $0x30c] ss:$16 sps:$4 sm:$0xff]  }
 0x5ba   :  { %4579 = vmatprep.subr.bf16.mxu1 %v9721_v61  ;;  %v9751_v61 = vld [vmem:[%s13531_s7 + $0x32c] ss:$16 sps:$4 sm:$0xff]  }
 0x64f   :  { %v3353_v54 = vpop.f32.mrb[144].mxu1 }
 0x650   :  { %v3355_v38 = vpop.f32.mrb[145].mxu1 }
 0x651   :  { %v3357_v26 = vpop.f32.mrb[146].mxu1 }
 0x652   :  { %v3392_v41 = vpack.c.bf16 %v3357_v26, %v3353_v54  ;;  %v3359_v47 = vpop.f32.mrb[147].mxu1  ;;  %v9781_v54 = vld [vmem:[%s13531_s7 + $0x204] ss:$16 sps:$4 sm:$0xff]   ;;  %v9749_v26 = vld [vmem:[%s13531_s7 + $0x328] ss:$16 sps:$4 sm:$0xff]  }
 0x653   :  { %v3393_v50 = vpack.c.bf16 %v3359_v47, %v3355_v38  ;;  %v9746_v38 = vld [vmem:[%s13533_s6 + $0x40] ss:$8 sps:$4 sm:$0xff]   ;;  %v9754_v47 = vld [vmem:[%s13531_s7 + $0x34c] ss:$16 sps:$4 sm:$0xff]  }
 0x655   :  { %3816 = vmatprep.mubr.bf16.mxu0 %v3393_v50  ;;  %3889 = vmatprep.mubr.bf16.mxu1 %v3393_v50  ;;  %v9779_v50 = vld [vmem:[%s13531_s7 + $0x200] ss:$16 sps:$4 sm:$0xff]  }
 0x656   :  { %3817 = vmatmul.mubr.bf16.vlgmr.msra.gmra.mrb[68].mxu0 %v3392_v41  ;;  %3890 = vmatmul.mubr.bf16.vlgmr.msra.gmra.mrb[160].mxu1 %v3392_v41  ;;  %v9758_v41 = vld [vmem:[%s13533_s6 + $0x54] ss:$8 sps:$4 sm:$0xff]  }
 0x657   :  { %4041 = vmatpush1.bf16.msra.mxu0 %v12136_v35  ;;  %4580 = vmatpush1.bf16.msra.mxu1 %v9719_v12  ;;  %v3363_v28 = vpop.f32.mrb[148].mxu1  ;;  %v9784_v12 = vld [vmem:[%s13531_s7 + $0x224] ss:$16 sps:$4 sm:$0xff]  }
 0x658   :  { %4042 = vmatprep.subr.bf16.mxu0 %v12142_v51  ;;  %4581 = vmatprep.subr.bf16.mxu1 %v9724_v53  ;;  %v3365_v8 = vpop.f32.mrb[149].mxu1  ;;  %v9752_v53 = vld [vmem:[%s13531_s7 + $0x348] ss:$16 sps:$4 sm:$0xff]  }
 0x659   :  { %v3367_v22 = vpop.f32.mrb[150].mxu1 }
 0x65a   :  { %v3394_v39 = vpack.c.bf16 %v3367_v22, %v3363_v28  ;;  %v3369_v36 = vpop.f32.mrb[151].mxu1  ;;  %v9782_v28 = vld [vmem:[%s13531_s7 + $0x220] ss:$16 sps:$4 sm:$0xff]   ;;  %v9755_v22 = vld [vmem:[%s13531_s7 + $0x368] ss:$16 sps:$4 sm:$0xff]  }
 0x65b   :  { %4043 = vmatpush1.bf16.msra.mxu0 %v12146_v42  ;;  %4582 = vmatpush1.bf16.msra.mxu1 %v9722_v24  ;;  %v3395_v27 = vpack.c.bf16 %v3369_v36, %v3365_v8  ;;  %v9757_v24 = vld [vmem:[%s13531_s7 + $0x36c] ss:$16 sps:$4 sm:$0xff]   ;;  %v9787_v8 = vld [vmem:[%s13531_s7 + $0x244] ss:$16 sps:$4 sm:$0xff]  }
 0x65c   :  { %4044 = vmatprep.subr.bf16.mxu0 %v12157_v56  ;;  %4583 = vmatprep.subr.bf16.mxu1 %v9727_v17  ;;  %v9760_v17 = vld [vmem:[%s13533_s6 + $0x50] ss:$8 sps:$4 sm:$0xff]   ;;  %v9763_v36 = vld [vmem:[%s13531_s7 + $0x38c] ss:$16 sps:$4 sm:$0xff]  }
 0x65d   :  { %3826 = vmatprep.mubr.bf16.mxu0 %v3395_v27  ;;  %3899 = vmatprep.mubr.bf16.mxu1 %v3395_v27  ;;  %v9785_v27 = vld [vmem:[%s13531_s7 + $0x240] ss:$16 sps:$4 sm:$0xff]  }
 0x65e   :  { %3827 = vmatmul.mubr.bf16.gmra.mrb[72].mxu0 %v3394_v39  ;;  %3900 = vmatmul.mubr.bf16.gmra.mrb[164].mxu1 %v3394_v39  ;;  %v9767_v39 = vld [vmem:[%s13533_s6 + $0x64] ss:$8 sps:$4 sm:$0xff]  }
 0x65f   :  { %4045 = vmatpush1.bf16.msra.mxu0 %v12161_v6  ;;  %4584 = vmatpush1.bf16.msra.mxu1 %v9725_v14  ;;  %v3373_v13 = vpop.f32.mrb[152].mxu1  ;;  %v9790_v14 = vld [vmem:[%s13531_s7 + $0x264] ss:$16 sps:$4 sm:$0xff]  }
 0x660   :  { %4046 = vmatprep.subr.bf16.mxu0 %v12167_v29  ;;  %4585 = vmatprep.subr.bf16.mxu1 %v9730_v62  ;;  %v3375_v43 = vpop.f32.mrb[153].mxu1  ;;  %v9761_v62 = vld [vmem:[%s13531_s7 + $0x388] ss:$16 sps:$4 sm:$0xff]  }
 0x661   :  { %v3377_v33 = vpop.f32.mrb[154].mxu1 }
 0x662   :  { %v3396_v0 = vpack.c.bf16 %v3377_v33, %v3373_v13  ;;  %v3379_v9 = vpop.f32.mrb[155].mxu1  ;;  %v9788_v13 = vld [vmem:[%s13531_s7 + $0x260] ss:$16 sps:$4 sm:$0xff]   ;;  %v9764_v33 = vld [vmem:[%s13531_s7 + $0x3a8] ss:$16 sps:$4 sm:$0xff]  }
 0x663   :  { %4047 = vmatpush1.bf16.msra.mxu0 %v12171_v4  ;;  %4586 = vmatpush1.bf16.msra.mxu1 %v9728_v25  ;;  %v3397_v49 = vpack.c.bf16 %v3379_v9, %v3375_v43  ;;  %v9766_v25 = vld [vmem:[%s13531_s7 + $0x3ac] ss:$16 sps:$4 sm:$0xff]   ;;  %v9793_v43 = vld [vmem:[%s13531_s7 + $0x284] ss:$16 sps:$4 sm:$0xff]  }
 0x664   :  { %4048 = vmatprep.subr.bf16.mxu0 %v12177_v63  ;;  %4587 = vmatprep.subr.bf16.mxu1 %v9733_v2  ;;  %v9769_v2 = vld [vmem:[%s13533_s6 + $0x60] ss:$8 sps:$4 sm:$0xff]   ;;  %v9772_v9 = vld [vmem:[%s13531_s7 + $0x3cc] ss:$16 sps:$4 sm:$0xff]  }
 0x665   :  { %3836 = vmatprep.mubr.bf16.mxu0 %v3397_v49  ;;  %3909 = vmatprep.mubr.bf16.mxu1 %v3397_v49  ;;  %v9791_v49 = vld [vmem:[%s13531_s7 + $0x280] ss:$16 sps:$4 sm:$0xff]  }
 0x666   :  { %3837 = vmatmul.mubr.bf16.gmra.mrb[76].mxu0 %v3396_v0  ;;  %3910 = vmatmul.mubr.bf16.gmra.mrb[168].mxu1 %v3396_v0  ;;  %v9776_v0 = vld [vmem:[%s13533_s6 + $0x74] ss:$8 sps:$4 sm:$0xff]  }
 0x667   :  { %4049 = vmatpush1.bf16.msra.mxu0 %v12181_v34  ;;  %4588 = vmatpush1.bf16.msra.mxu1 %v9731_v21  ;;  %v3383_v16 = vpop.f32.mrb[156].mxu1  ;;  %v9796_v21 = vld [vmem:[%s13531_s7 + $0x2a4] ss:$16 sps:$4 sm:$0xff]  }
 0x668   :  { %4050 = vmatprep.subr.bf16.mxu0 %v12188_v15  ;;  %4589 = vmatprep.subr.bf16.mxu1 %v9736_v37  ;;  %v3385_v58 = vpop.f32.mrb[157].mxu1  ;;  %v9770_v37 = vld [vmem:[%s13531_s7 + $0x3c8] ss:$16 sps:$4 sm:$0xff]  }
 0x669   :  { %v3387_v5 = vpop.f32.mrb[158].mxu1 }
 0x66a   :  { %v3398_v48 = vpack.c.bf16 %v3387_v5, %v3383_v16  ;;  %v3389_v23 = vpop.f32.mrb[159].mxu1  ;;  %v9794_v16 = vld [vmem:[%s13531_s7 + $0x2a0] ss:$16 sps:$4 sm:$0xff]   ;;  %v9773_v5 = vld [vmem:[%s13531_s7 + $0x3e8] ss:$16 sps:$4 sm:$0xff]  }
 0x66b   :  { %4051 = vmatpush1.bf16.msra.mxu0 %v12190_v11  ;;  %4590 = vmatpush1.bf16.msra.mxu1 %v9734_v30  ;;  %v3399_v32 = vpack.c.bf16 %v3389_v23, %v3385_v58  ;;  %v9775_v30 = vld [vmem:[%s13531_s7 + $0x3ec] ss:$16 sps:$4 sm:$0xff]   ;;  %v9799_v58 = vld [vmem:[%s13531_s7 + $0x2c4] ss:$16 sps:$4 sm:$0xff]  }
 0x66c   :  { %4052 = vmatprep.subr.bf16.mxu0 %v12198_v3  ;;  %4591 = vmatprep.subr.bf16.mxu1 %v9739_v45  ;;  %v9778_v45 = vld [vmem:[%s13533_s6 + $0x70] ss:$8 sps:$4 sm:$0xff]   ;;  %v9802_v23 = vld [vmem:[%s13531_s7 + $0x2e4] ss:$16 sps:$4 sm:$0xff]  }
 0x66d   :  { %3846 = vmatprep.mubr.bf16.mxu0 %v3399_v32  ;;  %3919 = vmatprep.mubr.bf16.mxu1 %v3399_v32  ;;  %v9800_v32 = vld [vmem:[%s13531_s7 + $0x2e0] ss:$16 sps:$4 sm:$0xff]  }
 0x66e   :  { %3847 = vmatmul.mubr.bf16.gmra.mrb[80].mxu0 %v3398_v48  ;;  %3920 = vmatmul.mubr.bf16.gmra.mrb[172].mxu1 %v3398_v48  ;;  %v9797_v48 = vld [vmem:[%s13531_s7 + $0x2c0] ss:$16 sps:$4 sm:$0xff]  }
 0x66f   :  { %4053 = vmatpush1.bf16.msra.mxu0 %v12200_v55  ;;  %4592 = vmatpush1.bf16.msra.mxu1 %v9737_v20  ;;  %v9805_v20 = vld [vmem:[%s13531_s7 + $0x304] ss:$16 sps:$4 sm:$0xff]  }
 0x670   :  { %4054 = vmatprep.subr.bf16.mxu0 %v12208_v57  ;;  %4593 = vmatprep.subr.bf16.mxu1 %v9742_v18  ;;  %v9803_v18 = vld [vmem:[%s13531_s7 + $0x300] ss:$16 sps:$4 sm:$0xff]  }
 0x671   :  { %7849 = vmatprep.mubr.msk.bf16.mxu0 %vm3306_vm0, %v9748_v7  ;;  %v9808_v7 = vld [vmem:[%s13531_s7 + $0x324] ss:$16 sps:$4 sm:$0xff]  }
 0x673   :  { %4055 = vmatpush1.bf16.msra.mxu0 %v12210_v52  ;;  %4594 = vmatpush1.bf16.msra.mxu1 %v9740_v40  ;;  %v9806_v40 = vld [vmem:[%s13531_s7 + $0x320] ss:$16 sps:$4 sm:$0xff]  }
 0x674   :  { %4056 = vmatprep.subr.bf16.mxu0 %v12218_v59  ;;  %4595 = vmatprep.subr.bf16.mxu1 %v9745_v60  ;;  %v9811_v60 = vld [vmem:[%s13531_s7 + $0x344] ss:$16 sps:$4 sm:$0xff]  }
 0x677   :  { %4057 = vmatpush1.bf16.msra.mxu0 %v12220_v31  ;;  %4596 = vmatpush1.bf16.msra.mxu1 %v9743_v19  ;;  %v9809_v19 = vld [vmem:[%s13531_s7 + $0x340] ss:$16 sps:$4 sm:$0xff]  }
 0x678   :  { %4597 = vmatprep.subr.bf16.mxu1 %v9751_v61  ;;  %4506 = vmatprep.subr.bf16.mxu0 %v9781_v54  ;;  %v9814_v61 = vld [vmem:[%s13531_s7 + $0x364] ss:$16 sps:$4 sm:$0xff]   ;;  %v9812_v54 = vld [vmem:[%s13531_s7 + $0x360] ss:$16 sps:$4 sm:$0xff]  }
 0x67a   :  { %4073 = vmatmul.mubr.bf16.vlgmr.msra.gmra.mrb[84].mxu0 %v9746_v38  ;;  %v9817_v38 = vld [vmem:[%s13531_s7 + $0x384] ss:$16 sps:$4 sm:$0xff]  }
 0x67b   :  { %4598 = vmatpush1.bf16.msra.mxu1 %v9749_v26  ;;  %7850 = vmatprep.mubr.msk.bf16.mxu0 %vm3306_vm0, %v9758_v41  ;;  %v9815_v26 = vld [vmem:[%s13531_s7 + $0x380] ss:$16 sps:$4 sm:$0xff]   ;;  %v9820_v41 = vld [vmem:[%s13531_s7 + $0x3a4] ss:$16 sps:$4 sm:$0xff]  }
 0x67c   :  { %4599 = vmatprep.subr.bf16.mxu1 %v9754_v47  ;;  %4507 = vmatpush1.bf16.msra.mxu0 %v9779_v50  ;;  %v9818_v47 = vld [vmem:[%s13531_s7 + $0x3a0] ss:$16 sps:$4 sm:$0xff]   ;;  %v9823_v50 = vld [vmem:[%s13531_s7 + $0x3c4] ss:$16 sps:$4 sm:$0xff]  }
 0x67d   :  { %4508 = vmatprep.subr.bf16.mxu0 %v9784_v12  ;;  %v9821_v12 = vld [vmem:[%s13531_s7 + $0x3c0] ss:$16 sps:$4 sm:$0xff]  }
 0x67f   :  { %4600 = vmatpush1.bf16.msra.mxu1 %v9752_v53  ;;  %v9824_v53 = vld [vmem:[%s13531_s7 + $0x3e0] ss:$16 sps:$4 sm:$0xff]  }
 0x680   :  { %4601 = vmatprep.subr.bf16.mxu1 %v9757_v24  ;;  %4509 = vmatpush1.bf16.msra.mxu0 %v9782_v28  ;;  %v9826_v24 = vld [vmem:[%s13531_s7 + $0x3e4] ss:$16 sps:$4 sm:$0xff]  }
 0x681   :  { %4510 = vmatprep.subr.bf16.mxu0 %v9787_v8  ;;  %v9829_v28 = vld [vmem:[%s13531_s7 + $0x404] ss:$16 sps:$4 sm:$0xff]  }
 0x682   :  { %4083 = vmatmul.mubr.bf16.gmra.mrb[88].mxu0 %v9760_v17 }
 0x683   :  { %4602 = vmatpush1.bf16.msra.mxu1 %v9755_v22  ;;  %7851 = vmatprep.mubr.msk.bf16.mxu0 %vm3306_vm0, %v9767_v39 }
 0x684   :  { %4603 = vmatprep.subr.bf16.mxu1 %v9763_v36  ;;  %4511 = vmatpush1.bf16.msra.mxu0 %v9785_v27 }
 0x685   :  { %4512 = vmatprep.subr.bf16.mxu0 %v9790_v14  ;;  %v9827_v14 = vld [vmem:[%s13531_s7 + $0x400] ss:$16 sps:$4 sm:$0xff]  }
 0x687   :  { %4604 = vmatpush1.bf16.msra.mxu1 %v9761_v62  ;;  %v9832_v62 = vld [vmem:[%s13531_s7 + $0x424] ss:$16 sps:$4 sm:$0xff]  }
 0x688   :  { %4605 = vmatprep.subr.bf16.mxu1 %v9766_v25  ;;  %4513 = vmatpush1.bf16.msra.mxu0 %v9788_v13  ;;  %v9830_v25 = vld [vmem:[%s13531_s7 + $0x420] ss:$16 sps:$4 sm:$0xff]  }
 0x689   :  { %4514 = vmatprep.subr.bf16.mxu0 %v9793_v43 }
 0x68a   :  { %4093 = vmatmul.mubr.bf16.gmra.mrb[92].mxu0 %v9769_v2  ;;  %v9835_v2 = vld [vmem:[%s13531_s7 + $0x444] ss:$16 sps:$4 sm:$0xff]  }
 0x68b   :  { %4606 = vmatpush1.bf16.msra.mxu1 %v9764_v33  ;;  %7852 = vmatprep.mubr.msk.bf16.mxu0 %vm3306_vm0, %v9776_v0 }
 0x68c   :  { %4607 = vmatprep.subr.bf16.mxu1 %v9772_v9  ;;  %4515 = vmatpush1.bf16.msra.mxu0 %v9791_v49 }
 0x68d   :  { %4516 = vmatprep.subr.bf16.mxu0 %v9796_v21  ;;  %v9833_v21 = vld [vmem:[%s13531_s7 + $0x440] ss:$16 sps:$4 sm:$0xff]  }
 0x68f   :  { %4608 = vmatpush1.bf16.msra.mxu1 %v9770_v37  ;;  %v9838_v37 = vld [vmem:[%s13531_s7 + $0x464] ss:$16 sps:$4 sm:$0xff]  }
 0x690   :  { %4609 = vmatprep.subr.bf16.mxu1 %v9775_v30  ;;  %4517 = vmatpush1.bf16.msra.mxu0 %v9794_v16  ;;  %v9836_v30 = vld [vmem:[%s13531_s7 + $0x460] ss:$16 sps:$4 sm:$0xff]  }
 0x691   :  { %4518 = vmatprep.subr.bf16.mxu0 %v9799_v58 }
 0x692   :  { %4103 = vmatmul.mubr.bf16.gmra.mrb[96].mxu0 %v9778_v45  ;;  %v9841_v45 = vld [vmem:[%s13531_s7 + $0x484] ss:$16 sps:$4 sm:$0xff]  }
 0x693   :  { %4610 = vmatpush1.bf16.msra.mxu1 %v9773_v5 }
 0x694   :  { %4741 = vmatprep.subr.bf16.mxu1 %v12130_v44  ;;  %4519 = vmatpush1.bf16.msra.mxu0 %v9797_v48 }
 0x695   :  { %4520 = vmatprep.subr.bf16.mxu0 %v9802_v23 }
 0x698   :  { %4521 = vmatpush1.bf16.msra.mxu0 %v9800_v32 }
 0x699   :  { %4522 = vmatprep.subr.bf16.mxu0 %v9805_v20  ;;  %v9839_v20 = vld [vmem:[%s13531_s7 + $0x480] ss:$16 sps:$4 sm:$0xff]  }
 0x69c   :  { %4523 = vmatpush1.bf16.msra.mxu0 %v9803_v18  ;;  %v9844_v18 = vld [vmem:[%s13531_s7 + $0x4a4] ss:$16 sps:$4 sm:$0xff]  }
 0x69d   :  { %4524 = vmatprep.subr.bf16.mxu0 %v9808_v7  ;;  %v9842_v7 = vld [vmem:[%s13531_s7 + $0x4a0] ss:$16 sps:$4 sm:$0xff]  }
 0x6a0   :  { %4525 = vmatpush1.bf16.msra.mxu0 %v9806_v40 }
 0x6a1   :  { %4526 = vmatprep.subr.bf16.mxu0 %v9811_v60 }
 0x6a4   :  { %4527 = vmatpush1.bf16.msra.mxu0 %v9809_v19  ;;  %v9847_v19 = vld [vmem:[%s13531_s7 + $0x4c4] ss:$16 sps:$4 sm:$0xff]  }
 0x6a5   :  { %4528 = vmatprep.subr.bf16.mxu0 %v9814_v61 }
 0x6a8   :  { %4529 = vmatpush1.bf16.msra.mxu0 %v9812_v54 }
 0x6a9   :  { %4530 = vmatprep.subr.bf16.mxu0 %v9817_v38 }
 0x6ac   :  { %4531 = vmatpush1.bf16.msra.mxu0 %v9815_v26 }
 0x6ad   :  { %4532 = vmatprep.subr.bf16.mxu0 %v9820_v41  ;;  %v9845_v41 = vld [vmem:[%s13531_s7 + $0x4c0] ss:$16 sps:$4 sm:$0xff]  }
 0x6b0   :  { %4533 = vmatpush1.bf16.msra.mxu0 %v9818_v47  ;;  %v9850_v47 = vld [vmem:[%s13531_s7 + $0x4e4] ss:$16 sps:$4 sm:$0xff]  }
 0x6b1   :  { %4534 = vmatprep.subr.bf16.mxu0 %v9823_v50  ;;  %v9856_v50 = vld [vmem:[%s13533_s6 + $0x84] ss:$8 sps:$4 sm:$0xff]  }
 0x6b4   :  { %4535 = vmatpush1.bf16.msra.mxu0 %v9821_v12  ;;  %v9848_v12 = vld [vmem:[%s13531_s7 + $0x4e0] ss:$16 sps:$4 sm:$0xff]  }
 0x6b5   :  { %4536 = vmatprep.subr.bf16.mxu0 %v9826_v24  ;;  %v9851_v24 = vld [vmem:[%s13531_s7 + $0x500] ss:$16 sps:$4 sm:$0xff]  }
 0x6b8   :  { %4537 = vmatpush1.bf16.msra.mxu0 %v9824_v53  ;;  %v9853_v53 = vld [vmem:[%s13531_s7 + $0x504] ss:$16 sps:$4 sm:$0xff]  }
 0x6b9   :  { %5207 = vmatprep.subr.bf16.mxu0 %v9829_v28  ;;  %v9859_v28 = vld [vmem:[%s13531_s7 + $0x524] ss:$16 sps:$4 sm:$0xff]  }
 0x74d   :  { %v4074_v8 = vpop.f32.mrb[84].mxu0 }
 0x74e   :  { %v4076_v17 = vpop.f32.mrb[85].mxu0 }
 0x74f   :  { %v4078_v22 = vpop.f32.mrb[86].mxu0 }
 0x750   :  { %v4113_v39 = vpack.c.bf16 %v4078_v22, %v4074_v8  ;;  %v4080_v36 = vpop.f32.mrb[87].mxu0  ;;  %v9889_v8 = vld [vmem:[%s13531_s7 + $0x40c] ss:$16 sps:$4 sm:$0xff]   ;;  %v9857_v22 = vld [vmem:[%s13531_s7 + $0x520] ss:$16 sps:$4 sm:$0xff]  }
 0x751   :  { %v4114_v27 = vpack.c.bf16 %v4080_v36, %v4076_v17  ;;  %v9854_v17 = vld [vmem:[%s13533_s6 + $0x80] ss:$8 sps:$4 sm:$0xff]   ;;  %v9862_v36 = vld [vmem:[%s13531_s7 + $0x544] ss:$16 sps:$4 sm:$0xff]  }
 0x753   :  { %4538 = vmatprep.mubr.bf16.mxu0 %v4114_v27  ;;  %4611 = vmatprep.mubr.bf16.mxu1 %v4114_v27  ;;  %v9887_v27 = vld [vmem:[%s13531_s7 + $0x408] ss:$16 sps:$4 sm:$0xff]  }
 0x754   :  { %4539 = vmatmul.mubr.bf16.vlgmr.msra.gmra.mrb[68].mxu0 %v4113_v39  ;;  %4612 = vmatmul.mubr.bf16.vlgmr.msra.gmra.mrb[160].mxu1 %v4113_v39  ;;  %v9866_v39 = vld [vmem:[%s13533_s6 + $0x94] ss:$8 sps:$4 sm:$0xff]  }
 0x755   :  { %4742 = vmatpush1.bf16.msra.mxu1 %v12136_v35  ;;  %5208 = vmatpush1.bf16.msra.mxu0 %v9827_v14  ;;  %v4084_v13 = vpop.f32.mrb[88].mxu0  ;;  %v9892_v14 = vld [vmem:[%s13531_s7 + $0x42c] ss:$16 sps:$4 sm:$0xff]  }
 0x756   :  { %4743 = vmatprep.subr.bf16.mxu1 %v12142_v51  ;;  %5209 = vmatprep.subr.bf16.mxu0 %v9832_v62  ;;  %v4086_v43 = vpop.f32.mrb[89].mxu0  ;;  %v9860_v62 = vld [vmem:[%s13531_s7 + $0x540] ss:$16 sps:$4 sm:$0xff]  }
 0x757   :  { %v4088_v33 = vpop.f32.mrb[90].mxu0 }
 0x758   :  { %v4115_v0 = vpack.c.bf16 %v4088_v33, %v4084_v13  ;;  %v4090_v9 = vpop.f32.mrb[91].mxu0  ;;  %v9890_v13 = vld [vmem:[%s13531_s7 + $0x428] ss:$16 sps:$4 sm:$0xff]   ;;  %v9863_v33 = vld [vmem:[%s13531_s7 + $0x560] ss:$16 sps:$4 sm:$0xff]  }
 0x759   :  { %4744 = vmatpush1.bf16.msra.mxu1 %v12146_v42  ;;  %5210 = vmatpush1.bf16.msra.mxu0 %v9830_v25  ;;  %v4116_v49 = vpack.c.bf16 %v4090_v9, %v4086_v43  ;;  %v9865_v25 = vld [vmem:[%s13531_s7 + $0x564] ss:$16 sps:$4 sm:$0xff]   ;;  %v9895_v43 = vld [vmem:[%s13531_s7 + $0x44c] ss:$16 sps:$4 sm:$0xff]  }
 0x75a   :  { %4745 = vmatprep.subr.bf16.mxu1 %v12157_v56  ;;  %5211 = vmatprep.subr.bf16.mxu0 %v9835_v2  ;;  %v9868_v2 = vld [vmem:[%s13533_s6 + $0x90] ss:$8 sps:$4 sm:$0xff]   ;;  %v9871_v9 = vld [vmem:[%s13531_s7 + $0x584] ss:$16 sps:$4 sm:$0xff]  }
 0x75b   :  { %4621 = vmatprep.mubr.bf16.mxu1 %v4116_v49  ;;  %4548 = vmatprep.mubr.bf16.mxu0 %v4116_v49  ;;  %v9893_v49 = vld [vmem:[%s13531_s7 + $0x448] ss:$16 sps:$4 sm:$0xff]  }
 0x75c   :  { %4622 = vmatmul.mubr.bf16.gmra.mrb[164].mxu1 %v4115_v0  ;;  %4549 = vmatmul.mubr.bf16.gmra.mrb[72].mxu0 %v4115_v0  ;;  %v9875_v0 = vld [vmem:[%s13533_s6 + $0xa4] ss:$8 sps:$4 sm:$0xff]  }
 0x75d   :  { %4746 = vmatpush1.bf16.msra.mxu1 %v12161_v6  ;;  %5212 = vmatpush1.bf16.msra.mxu0 %v9833_v21  ;;  %v4094_v16 = vpop.f32.mrb[92].mxu0  ;;  %v9898_v21 = vld [vmem:[%s13531_s7 + $0x46c] ss:$16 sps:$4 sm:$0xff]  }
 0x75e   :  { %4747 = vmatprep.subr.bf16.mxu1 %v12167_v29  ;;  %5213 = vmatprep.subr.bf16.mxu0 %v9838_v37  ;;  %v4096_v58 = vpop.f32.mrb[93].mxu0  ;;  %v9869_v37 = vld [vmem:[%s13531_s7 + $0x580] ss:$16 sps:$4 sm:$0xff]  }
 0x75f   :  { %v4098_v5 = vpop.f32.mrb[94].mxu0 }
 0x760   :  { %v4117_v48 = vpack.c.bf16 %v4098_v5, %v4094_v16  ;;  %v4100_v23 = vpop.f32.mrb[95].mxu0  ;;  %v9896_v16 = vld [vmem:[%s13531_s7 + $0x468] ss:$16 sps:$4 sm:$0xff]   ;;  %v9872_v5 = vld [vmem:[%s13531_s7 + $0x5a0] ss:$16 sps:$4 sm:$0xff]  }
 0x761   :  { %4748 = vmatpush1.bf16.msra.mxu1 %v12171_v4  ;;  %5214 = vmatpush1.bf16.msra.mxu0 %v9836_v30  ;;  %v4118_v32 = vpack.c.bf16 %v4100_v23, %v4096_v58  ;;  %v9874_v30 = vld [vmem:[%s13531_s7 + $0x5a4] ss:$16 sps:$4 sm:$0xff]   ;;  %v9901_v58 = vld [vmem:[%s13531_s7 + $0x48c] ss:$16 sps:$4 sm:$0xff]  }
 0x762   :  { %4749 = vmatprep.subr.bf16.mxu1 %v12177_v63  ;;  %5215 = vmatprep.subr.bf16.mxu0 %v9841_v45  ;;  %v9877_v45 = vld [vmem:[%s13533_s6 + $0xa0] ss:$8 sps:$4 sm:$0xff]   ;;  %v9880_v23 = vld [vmem:[%s13531_s7 + $0x5c4] ss:$16 sps:$4 sm:$0xff]  }
 0x763   :  { %4631 = vmatprep.mubr.bf16.mxu1 %v4118_v32  ;;  %4558 = vmatprep.mubr.bf16.mxu0 %v4118_v32  ;;  %v9899_v32 = vld [vmem:[%s13531_s7 + $0x488] ss:$16 sps:$4 sm:$0xff]  }
 0x764   :  { %4632 = vmatmul.mubr.bf16.gmra.mrb[168].mxu1 %v4117_v48  ;;  %4559 = vmatmul.mubr.bf16.gmra.mrb[76].mxu0 %v4117_v48  ;;  %v9884_v48 = vld [vmem:[%s13533_s6 + $0xb4] ss:$8 sps:$4 sm:$0xff]  }
 0x765   :  { %4750 = vmatpush1.bf16.msra.mxu1 %v12181_v34  ;;  %5216 = vmatpush1.bf16.msra.mxu0 %v9839_v20  ;;  %v4104_v40 = vpop.f32.mrb[96].mxu0  ;;  %v9904_v20 = vld [vmem:[%s13531_s7 + $0x4ac] ss:$16 sps:$4 sm:$0xff]  }
 0x766   :  { %4751 = vmatprep.subr.bf16.mxu1 %v12188_v15  ;;  %5217 = vmatprep.subr.bf16.mxu0 %v9844_v18  ;;  %v4106_v60 = vpop.f32.mrb[97].mxu0  ;;  %v9878_v18 = vld [vmem:[%s13531_s7 + $0x5c0] ss:$16 sps:$4 sm:$0xff]  }
 0x767   :  { %v4108_v61 = vpop.f32.mrb[98].mxu0 }
 0x768   :  { %v4119_v54 = vpack.c.bf16 %v4108_v61, %v4104_v40  ;;  %v4110_v38 = vpop.f32.mrb[99].mxu0  ;;  %v9902_v40 = vld [vmem:[%s13531_s7 + $0x4a8] ss:$16 sps:$4 sm:$0xff]   ;;  %v9881_v61 = vld [vmem:[%s13531_s7 + $0x5e0] ss:$16 sps:$4 sm:$0xff]  }
 0x769   :  { %4752 = vmatpush1.bf16.msra.mxu1 %v12190_v11  ;;  %5218 = vmatpush1.bf16.msra.mxu0 %v9842_v7  ;;  %v4120_v26 = vpack.c.bf16 %v4110_v38, %v4106_v60  ;;  %v9883_v7 = vld [vmem:[%s13531_s7 + $0x5e4] ss:$16 sps:$4 sm:$0xff]   ;;  %v9907_v60 = vld [vmem:[%s13531_s7 + $0x4cc] ss:$16 sps:$4 sm:$0xff]  }
 0x76a   :  { %4753 = vmatprep.subr.bf16.mxu1 %v12198_v3  ;;  %5219 = vmatprep.subr.bf16.mxu0 %v9847_v19  ;;  %v9886_v19 = vld [vmem:[%s13533_s6 + $0xb0] ss:$8 sps:$4 sm:$0xff]   ;;  %v9910_v38 = vld [vmem:[%s13531_s7 + $0x4ec] ss:$16 sps:$4 sm:$0xff]  }
 0x76b   :  { %4641 = vmatprep.mubr.bf16.mxu1 %v4120_v26  ;;  %4568 = vmatprep.mubr.bf16.mxu0 %v4120_v26  ;;  %v9908_v26 = vld [vmem:[%s13531_s7 + $0x4e8] ss:$16 sps:$4 sm:$0xff]  }
 0x76c   :  { %4642 = vmatmul.mubr.bf16.gmra.mrb[172].mxu1 %v4119_v54  ;;  %4569 = vmatmul.mubr.bf16.gmra.mrb[80].mxu0 %v4119_v54  ;;  %v9905_v54 = vld [vmem:[%s13531_s7 + $0x4c8] ss:$16 sps:$4 sm:$0xff]  }
 0x76d   :  { %4754 = vmatpush1.bf16.msra.mxu1 %v12200_v55  ;;  %5220 = vmatpush1.bf16.msra.mxu0 %v9845_v41  ;;  %v9913_v41 = vld [vmem:[%s13531_s7 + $0x50c] ss:$16 sps:$4 sm:$0xff]  }
 0x76e   :  { %4755 = vmatprep.subr.bf16.mxu1 %v12208_v57  ;;  %5221 = vmatprep.subr.bf16.mxu0 %v9850_v47  ;;  %v9911_v47 = vld [vmem:[%s13531_s7 + $0x508] ss:$16 sps:$4 sm:$0xff]  }
 0x76f   :  { %7997 = vmatprep.mubr.msk.bf16.mxu1 %vm3306_vm0, %v9856_v50  ;;  %v9914_v50 = vld [vmem:[%s13531_s7 + $0x528] ss:$16 sps:$4 sm:$0xff]  }
 0x771   :  { %4756 = vmatpush1.bf16.msra.mxu1 %v12210_v52  ;;  %5222 = vmatpush1.bf16.msra.mxu0 %v9848_v12  ;;  %v9919_v12 = vld [vmem:[%s13531_s7 + $0x54c] ss:$16 sps:$4 sm:$0xff]  }
 0x772   :  { %4757 = vmatprep.subr.bf16.mxu1 %v12218_v59  ;;  %5223 = vmatprep.subr.bf16.mxu0 %v9853_v53  ;;  %v9917_v53 = vld [vmem:[%s13531_s7 + $0x548] ss:$16 sps:$4 sm:$0xff]  }
 0x775   :  { %4758 = vmatpush1.bf16.msra.mxu1 %v12220_v31  ;;  %5224 = vmatpush1.bf16.msra.mxu0 %v9851_v24  ;;  %v9922_v24 = vld [vmem:[%s13531_s7 + $0x56c] ss:$16 sps:$4 sm:$0xff]  }
 0x776   :  { %5225 = vmatprep.subr.bf16.mxu0 %v9859_v28  ;;  %5280 = vmatprep.subr.bf16.mxu1 %v9889_v8  ;;  %v9920_v28 = vld [vmem:[%s13531_s7 + $0x568] ss:$16 sps:$4 sm:$0xff]   ;;  %v9925_v8 = vld [vmem:[%s13531_s7 + $0x58c] ss:$16 sps:$4 sm:$0xff]  }
 0x778   :  { %4774 = vmatmul.mubr.bf16.vlgmr.msra.gmra.mrb[176].mxu1 %v9854_v17  ;;  %v9923_v17 = vld [vmem:[%s13531_s7 + $0x588] ss:$16 sps:$4 sm:$0xff]  }
 0x779   :  { %5226 = vmatpush1.bf16.msra.mxu0 %v9857_v22  ;;  %7998 = vmatprep.mubr.msk.bf16.mxu1 %vm3306_vm0, %v9866_v39  ;;  %v9928_v22 = vld [vmem:[%s13531_s7 + $0x5ac] ss:$16 sps:$4 sm:$0xff]   ;;  %v9926_v39 = vld [vmem:[%s13531_s7 + $0x5a8] ss:$16 sps:$4 sm:$0xff]  }
 0x77a   :  { %5227 = vmatprep.subr.bf16.mxu0 %v9862_v36  ;;  %5281 = vmatpush1.bf16.msra.mxu1 %v9887_v27  ;;  %v9929_v36 = vld [vmem:[%s13531_s7 + $0x5c8] ss:$16 sps:$4 sm:$0xff]   ;;  %v9931_v27 = vld [vmem:[%s13531_s7 + $0x5cc] ss:$16 sps:$4 sm:$0xff]  }
 0x77b   :  { %5282 = vmatprep.subr.bf16.mxu1 %v9892_v14  ;;  %v9932_v14 = vld [vmem:[%s13531_s7 + $0x5e8] ss:$16 sps:$4 sm:$0xff]  }
 0x77d   :  { %5228 = vmatpush1.bf16.msra.mxu0 %v9860_v62  ;;  %v9934_v62 = vld [vmem:[%s13531_s7 + $0x5ec] ss:$16 sps:$4 sm:$0xff]  }
 0x77e   :  { %5229 = vmatprep.subr.bf16.mxu0 %v9865_v25  ;;  %5283 = vmatpush1.bf16.msra.mxu1 %v9890_v13  ;;  %v9952_v25 = vld [vmem:[%s13531_s7 + $0x60c] ss:$16 sps:$4 sm:$0xff]  }
 0x77f   :  { %5284 = vmatprep.subr.bf16.mxu1 %v9895_v43 }
 0x780   :  { %4784 = vmatmul.mubr.bf16.gmra.mrb[180].mxu1 %v9868_v2 }
 0x781   :  { %5230 = vmatpush1.bf16.msra.mxu0 %v9863_v33  ;;  %7999 = vmatprep.mubr.msk.bf16.mxu1 %vm3306_vm0, %v9875_v0 }
 0x782   :  { %5231 = vmatprep.subr.bf16.mxu0 %v9871_v9  ;;  %5285 = vmatpush1.bf16.msra.mxu1 %v9893_v49  ;;  %v9950_v49 = vld [vmem:[%s13531_s7 + $0x608] ss:$16 sps:$4 sm:$0xff]  }
 0x783   :  { %5286 = vmatprep.subr.bf16.mxu1 %v9898_v21  ;;  %v9958_v21 = vld [vmem:[%s13531_s7 + $0x62c] ss:$16 sps:$4 sm:$0xff]  }
 0x785   :  { %5232 = vmatpush1.bf16.msra.mxu0 %v9869_v37 }
 0x786   :  { %5233 = vmatprep.subr.bf16.mxu0 %v9874_v30  ;;  %5287 = vmatpush1.bf16.msra.mxu1 %v9896_v16  ;;  %v9956_v30 = vld [vmem:[%s13531_s7 + $0x628] ss:$16 sps:$4 sm:$0xff]  }
 0x787   :  { %5288 = vmatprep.subr.bf16.mxu1 %v9901_v58  ;;  %v9964_v58 = vld [vmem:[%s13531_s7 + $0x64c] ss:$16 sps:$4 sm:$0xff]  }
 0x788   :  { %4794 = vmatmul.mubr.bf16.gmra.mrb[184].mxu1 %v9877_v45 }
 0x789   :  { %5234 = vmatpush1.bf16.msra.mxu0 %v9872_v5  ;;  %8000 = vmatprep.mubr.msk.bf16.mxu1 %vm3306_vm0, %v9884_v48 }
 0x78a   :  { %5235 = vmatprep.subr.bf16.mxu0 %v9880_v23  ;;  %5289 = vmatpush1.bf16.msra.mxu1 %v9899_v32  ;;  %v9962_v23 = vld [vmem:[%s13531_s7 + $0x648] ss:$16 sps:$4 sm:$0xff]  }
 0x78b   :  { %5290 = vmatprep.subr.bf16.mxu1 %v9904_v20  ;;  %v9968_v32 = vld [vmem:[%s13531_s7 + $0x668] ss:$16 sps:$4 sm:$0xff]   ;;  %v9976_v20 = vld [vmem:[%s13531_s7 + $0x68c] ss:$16 sps:$4 sm:$0xff]  }
 0x78d   :  { %5236 = vmatpush1.bf16.msra.mxu0 %v9878_v18 }
 0x78e   :  { %5237 = vmatprep.subr.bf16.mxu0 %v9883_v7  ;;  %5291 = vmatpush1.bf16.msra.mxu1 %v9902_v40 }
 0x78f   :  { %5292 = vmatprep.subr.bf16.mxu1 %v9907_v60  ;;  %v9974_v60 = vld [vmem:[%s13531_s7 + $0x688] ss:$16 sps:$4 sm:$0xff]  }
 0x790   :  { %4804 = vmatmul.mubr.bf16.gmra.mrb[188].mxu1 %v9886_v19  ;;  %v9980_v19 = vld [vmem:[%s13531_s7 + $0x6a8] ss:$16 sps:$4 sm:$0xff]  }
 0x791   :  { %5238 = vmatpush1.bf16.msra.mxu0 %v9881_v61  ;;  %v9988_v61 = vld [vmem:[%s13531_s7 + $0x6cc] ss:$16 sps:$4 sm:$0xff]  }
 0x792   :  { %5442 = vmatprep.subr.bf16.mxu0 %v12130_v44  ;;  %5293 = vmatpush1.bf16.msra.mxu1 %v9905_v54  ;;  %v9916_v44 = vld [vmem:[%s13531_s7 + $0x52c] ss:$16 sps:$4 sm:$0xff]  }
 0x793   :  { %5294 = vmatprep.subr.bf16.mxu1 %v9910_v38 }
 0x796   :  { %5295 = vmatpush1.bf16.msra.mxu1 %v9908_v26 }
 0x797   :  { %5296 = vmatprep.subr.bf16.mxu1 %v9913_v41  ;;  %v9937_v41 = vld [vmem:[%s13533_s6 + $0xc4] ss:$8 sps:$4 sm:$0xff]  }
 0x79a   :  { %5297 = vmatpush1.bf16.msra.mxu1 %v9911_v47  ;;  %v9994_v47 = vld [vmem:[%s13531_s7 + $0x6ec] ss:$16 sps:$4 sm:$0xff]  }
 0x79b   :  { %5298 = vmatprep.subr.bf16.mxu1 %v9916_v44  ;;  %v10006_v44 = vld [vmem:[%s13531_s7 + $0x72c] ss:$16 sps:$4 sm:$0xff]  }
 0x79e   :  { %5299 = vmatpush1.bf16.msra.mxu1 %v9914_v50  ;;  %v9947_v50 = vld [vmem:[%s13531_s7 + $0x600] ss:$16 sps:$4 sm:$0xff]  }
 0x79f   :  { %5300 = vmatprep.subr.bf16.mxu1 %v9919_v12  ;;  %v9955_v12 = vld [vmem:[%s13531_s7 + $0x624] ss:$16 sps:$4 sm:$0xff]  }
 0x7a2   :  { %5301 = vmatpush1.bf16.msra.mxu1 %v9917_v53  ;;  %v10004_v53 = vld [vmem:[%s13531_s7 + $0x728] ss:$16 sps:$4 sm:$0xff]  }
 0x7a3   :  { %5302 = vmatprep.subr.bf16.mxu1 %v9922_v24  ;;  %v9953_v24 = vld [vmem:[%s13531_s7 + $0x620] ss:$16 sps:$4 sm:$0xff]  }
 0x7a6   :  { %5303 = vmatpush1.bf16.msra.mxu1 %v9920_v28  ;;  %v9961_v28 = vld [vmem:[%s13531_s7 + $0x644] ss:$16 sps:$4 sm:$0xff]  }
 0x7a7   :  { %5304 = vmatprep.subr.bf16.mxu1 %v9925_v8  ;;  %v10010_v8 = vld [vmem:[%s13531_s7 + $0x748] ss:$16 sps:$4 sm:$0xff]  }
 0x7aa   :  { %5305 = vmatpush1.bf16.msra.mxu1 %v9923_v17  ;;  %v10018_v17 = vld [vmem:[%s13531_s7 + $0x76c] ss:$16 sps:$4 sm:$0xff]  }
 0x7ab   :  { %5306 = vmatprep.subr.bf16.mxu1 %v9928_v22  ;;  %v9940_v22 = vld [vmem:[%s13533_s6 + $0xd0] ss:$8 sps:$4 sm:$0xff]  }
 0x7ae   :  { %5307 = vmatpush1.bf16.msra.mxu1 %v9926_v39  ;;  %v9941_v39 = vld [vmem:[%s13533_s6 + $0xe4] ss:$8 sps:$4 sm:$0xff]  }
 0x7af   :  { %5308 = vmatprep.subr.bf16.mxu1 %v9931_v27  ;;  %v9967_v27 = vld [vmem:[%s13531_s7 + $0x664] ss:$16 sps:$4 sm:$0xff]  }
 0x7b2   :  { %5309 = vmatpush1.bf16.msra.mxu1 %v9929_v36  ;;  %v9959_v36 = vld [vmem:[%s13531_s7 + $0x640] ss:$16 sps:$4 sm:$0xff]  }
 0x7b3   :  { %5310 = vmatprep.subr.bf16.mxu1 %v9934_v62  ;;  %v10024_v62 = vld [vmem:[%s13531_s7 + $0x78c] ss:$16 sps:$4 sm:$0xff]  }
 0x7b6   :  { %5311 = vmatpush1.bf16.msra.mxu1 %v9932_v14  ;;  %v10016_v14 = vld [vmem:[%s13531_s7 + $0x768] ss:$16 sps:$4 sm:$0xff]  }
 0x7b7   :  { %5981 = vmatprep.subr.bf16.mxu1 %v9952_v25  ;;  %v9965_v25 = vld [vmem:[%s13531_s7 + $0x660] ss:$16 sps:$4 sm:$0xff]  }
 0x84b   :  { %v4775_v13 = vpop.f32.mrb[176].mxu1 }
 0x84c   :  { %v4777_v43 = vpop.f32.mrb[177].mxu1 }
 0x84d   :  { %v4779_v2 = vpop.f32.mrb[178].mxu1 }
 0x84e   :  { %v4814_v33 = vpack.c.bf16 %v4779_v2, %v4775_v13  ;;  %v4781_v0 = vpop.f32.mrb[179].mxu1  ;;  %v9973_v13 = vld [vmem:[%s13531_s7 + $0x684] ss:$16 sps:$4 sm:$0xff]   ;;  %v10030_v2 = vld [vmem:[%s13531_s7 + $0x7ac] ss:$16 sps:$4 sm:$0xff]  }
 0x84f   :  { %v4815_v9 = vpack.c.bf16 %v4781_v0, %v4777_v43  ;;  %v10022_v43 = vld [vmem:[%s13531_s7 + $0x788] ss:$16 sps:$4 sm:$0xff]   ;;  %v9944_v0 = vld [vmem:[%s13533_s6 + $0xf4] ss:$8 sps:$4 sm:$0xff]  }
 0x851   :  { %5239 = vmatprep.mubr.bf16.mxu0 %v4815_v9  ;;  %5312 = vmatprep.mubr.bf16.mxu1 %v4815_v9  ;;  %v9971_v9 = vld [vmem:[%s13531_s7 + $0x680] ss:$16 sps:$4 sm:$0xff]  }
 0x852   :  { %5240 = vmatmul.mubr.bf16.vlgmr.msra.gmra.mrb[68].mxu0 %v4814_v33  ;;  %5313 = vmatmul.mubr.bf16.vlgmr.msra.gmra.mrb[160].mxu1 %v4814_v33  ;;  %v9943_v33 = vld [vmem:[%s13533_s6 + $0xe0] ss:$8 sps:$4 sm:$0xff]  }
 0x853   :  { %5443 = vmatpush1.bf16.msra.mxu0 %v12136_v35  ;;  %v4785_v37 = vpop.f32.mrb[180].mxu1  ;;  %5982 = vmatpush1.bf16.msra.mxu1 %v9950_v49  ;;  %v9979_v49 = vld [vmem:[%s13531_s7 + $0x6a4] ss:$16 sps:$4 sm:$0xff]  }
 0x854   :  { %5444 = vmatprep.subr.bf16.mxu0 %v12142_v51  ;;  %v4787_v16 = vpop.f32.mrb[181].mxu1  ;;  %5983 = vmatprep.subr.bf16.mxu1 %v9958_v21  ;;  %v9970_v51 = vld [vmem:[%s13531_s7 + $0x66c] ss:$16 sps:$4 sm:$0xff]   ;;  %v10028_v21 = vld [vmem:[%s13531_s7 + $0x7a8] ss:$16 sps:$4 sm:$0xff]  }
 0x855   :  { %v4789_v45 = vpop.f32.mrb[182].mxu1 }
 0x856   :  { %v4816_v5 = vpack.c.bf16 %v4789_v45, %v4785_v37  ;;  %v4791_v48 = vpop.f32.mrb[183].mxu1  ;;  %v10036_v37 = vld [vmem:[%s13531_s7 + $0x7cc] ss:$16 sps:$4 sm:$0xff]   ;;  %v9946_v45 = vld [vmem:[%s13533_s6 + $0xf0] ss:$8 sps:$4 sm:$0xff]  }
 0x857   :  { %5445 = vmatpush1.bf16.msra.mxu0 %v12146_v42  ;;  %v4817_v35 = vpack.c.bf16 %v4791_v48, %v4787_v16  ;;  %5984 = vmatpush1.bf16.msra.mxu1 %v9956_v30  ;;  %v9977_v30 = vld [vmem:[%s13531_s7 + $0x6a0] ss:$16 sps:$4 sm:$0xff]   ;;  %v9985_v16 = vld [vmem:[%s13531_s7 + $0x6c4] ss:$16 sps:$4 sm:$0xff]  }
 0x858   :  { %5446 = vmatprep.subr.bf16.mxu0 %v12157_v56  ;;  %5985 = vmatprep.subr.bf16.mxu1 %v9964_v58  ;;  %v10034_v58 = vld [vmem:[%s13531_s7 + $0x7c8] ss:$16 sps:$4 sm:$0xff]   ;;  %v9991_v48 = vld [vmem:[%s13531_s7 + $0x6e4] ss:$16 sps:$4 sm:$0xff]  }
 0x859   :  { %5249 = vmatprep.mubr.bf16.mxu0 %v4817_v35  ;;  %5322 = vmatprep.mubr.bf16.mxu1 %v4817_v35  ;;  %v9989_v35 = vld [vmem:[%s13531_s7 + $0x6e0] ss:$16 sps:$4 sm:$0xff]  }
 0x85a   :  { %5250 = vmatmul.mubr.bf16.gmra.mrb[72].mxu0 %v4816_v5  ;;  %5323 = vmatmul.mubr.bf16.gmra.mrb[164].mxu1 %v4816_v5  ;;  %v9983_v5 = vld [vmem:[%s13531_s7 + $0x6c0] ss:$16 sps:$4 sm:$0xff]  }
 0x85b   :  { %5447 = vmatpush1.bf16.msra.mxu0 %v12161_v6  ;;  %v4795_v42 = vpop.f32.mrb[184].mxu1  ;;  %5986 = vmatpush1.bf16.msra.mxu1 %v9962_v23  ;;  %v9997_v23 = vld [vmem:[%s13531_s7 + $0x704] ss:$16 sps:$4 sm:$0xff]  }
 0x85c   :  { %5448 = vmatprep.subr.bf16.mxu0 %v12167_v29  ;;  %v4797_v56 = vpop.f32.mrb[185].mxu1  ;;  %5987 = vmatprep.subr.bf16.mxu1 %v9970_v51  ;;  %v9982_v29 = vld [vmem:[%s13531_s7 + $0x6ac] ss:$16 sps:$4 sm:$0xff]   ;;  %v9995_v51 = vld [vmem:[%s13531_s7 + $0x700] ss:$16 sps:$4 sm:$0xff]  }
 0x85d   :  { %v4799_v18 = vpop.f32.mrb[186].mxu1 }
 0x85e   :  { %v4818_v7 = vpack.c.bf16 %v4799_v18, %v4795_v42  ;;  %v4801_v40 = vpop.f32.mrb[187].mxu1  ;;  %v10003_v42 = vld [vmem:[%s13531_s7 + $0x724] ss:$16 sps:$4 sm:$0xff]  }
 0x85f   :  { %5449 = vmatpush1.bf16.msra.mxu0 %v12171_v4  ;;  %v4819_v6 = vpack.c.bf16 %v4801_v40, %v4797_v56  ;;  %5988 = vmatpush1.bf16.msra.mxu1 %v9968_v32  ;;  %v10001_v32 = vld [vmem:[%s13531_s7 + $0x720] ss:$16 sps:$4 sm:$0xff]   ;;  %v10009_v56 = vld [vmem:[%s13531_s7 + $0x744] ss:$16 sps:$4 sm:$0xff]  }
 0x860   :  { %5450 = vmatprep.subr.bf16.mxu0 %v12177_v63  ;;  %5989 = vmatprep.subr.bf16.mxu1 %v9976_v20  ;;  %v10007_v20 = vld [vmem:[%s13531_s7 + $0x740] ss:$16 sps:$4 sm:$0xff]   ;;  %v10015_v18 = vld [vmem:[%s13531_s7 + $0x764] ss:$16 sps:$4 sm:$0xff]  }
 0x861   :  { %5259 = vmatprep.mubr.bf16.mxu0 %v4819_v6  ;;  %5332 = vmatprep.mubr.bf16.mxu1 %v4819_v6  ;;  %v10021_v40 = vld [vmem:[%s13531_s7 + $0x784] ss:$16 sps:$4 sm:$0xff]   ;;  %v10019_v6 = vld [vmem:[%s13531_s7 + $0x780] ss:$16 sps:$4 sm:$0xff]  }
 0x862   :  { %5260 = vmatmul.mubr.bf16.gmra.mrb[76].mxu0 %v4818_v7  ;;  %5333 = vmatmul.mubr.bf16.gmra.mrb[168].mxu1 %v4818_v7  ;;  %v10013_v7 = vld [vmem:[%s13531_s7 + $0x760] ss:$16 sps:$4 sm:$0xff]  }
 0x863   :  { %5451 = vmatpush1.bf16.msra.mxu0 %v12181_v34  ;;  %v4805_v4 = vpop.f32.mrb[188].mxu1  ;;  %5990 = vmatpush1.bf16.msra.mxu1 %v9974_v60  ;;  %v10027_v60 = vld [vmem:[%s13531_s7 + $0x7a4] ss:$16 sps:$4 sm:$0xff]  }
 0x864   :  { %5452 = vmatprep.subr.bf16.mxu0 %v12188_v15  ;;  %v4807_v63 = vpop.f32.mrb[189].mxu1  ;;  %5991 = vmatprep.subr.bf16.mxu1 %v9982_v29  ;;  %v9986_v15 = vld [vmem:[%s13531_s7 + $0x6c8] ss:$16 sps:$4 sm:$0xff]   ;;  %v10025_v29 = vld [vmem:[%s13531_s7 + $0x7a0] ss:$16 sps:$4 sm:$0xff]  }
 0x865   :  { %v4809_v54 = vpop.f32.mrb[190].mxu1 }
 0x866   :  { %v4820_v38 = vpack.c.bf16 %v4809_v54, %v4805_v4  ;;  %v4811_v26 = vpop.f32.mrb[191].mxu1  ;;  %v10033_v4 = vld [vmem:[%s13531_s7 + $0x7c4] ss:$16 sps:$4 sm:$0xff]   ;;  %v10040_v54 = vld [vmem:[%s13531_s7 + $0x7e8] ss:$16 sps:$4 sm:$0xff]  }
 0x867   :  { %5453 = vmatpush1.bf16.msra.mxu0 %v12190_v11  ;;  %v4821_v34 = vpack.c.bf16 %v4811_v26, %v4807_v63  ;;  %5992 = vmatpush1.bf16.msra.mxu1 %v9980_v19  ;;  %v9992_v11 = vld [vmem:[%s13531_s7 + $0x6e8] ss:$16 sps:$4 sm:$0xff]   ;;  %v10031_v19 = vld [vmem:[%s13531_s7 + $0x7c0] ss:$16 sps:$4 sm:$0xff]  }
 0x868   :  { %5454 = vmatprep.subr.bf16.mxu0 %v12198_v3  ;;  %5993 = vmatprep.subr.bf16.mxu1 %v9988_v61  ;;  %v10000_v3 = vld [vmem:[%s13531_s7 + $0x70c] ss:$16 sps:$4 sm:$0xff]   ;;  %v10037_v63 = vld [vmem:[%s13531_s7 + $0x7e0] ss:$16 sps:$4 sm:$0xff]   ;;  %v10039_v61 = vld [vmem:[%s13531_s7 + $0x7e4] ss:$16 sps:$4 sm:$0xff]  }
 0x869   :  { %5269 = vmatprep.mubr.bf16.mxu0 %v4821_v34  ;;  %5342 = vmatprep.mubr.bf16.mxu1 %v4821_v34  ;;  %v10043_v26 = vld [vmem:[%s13534_s9 + $0x40] sm:$0xff]  }
 0x86a   :  { %5270 = vmatmul.mubr.bf16.gmra.mrb[80].mxu0 %v4820_v38  ;;  %5343 = vmatmul.mubr.bf16.gmra.mrb[172].mxu1 %v4820_v38  ;;  %v10042_v38 = vld [vmem:[%s13531_s7 + $0x7ec] ss:$16 sps:$4 sm:$0xff]   ;;  %v10048_v34 = vld [vmem:[%s13534_s9 + $0x140] sm:$0xff]  }
 0x86b   :  { %5455 = vmatpush1.bf16.msra.mxu0 %v12200_v55  ;;  %8145 = vmatprep.mubr.msk.bf16.mxu0 %vm3306_vm0, %v9937_v41  ;;  %v9949_v55 = vld [vmem:[%s13531_s7 + $0x604] ss:$16 sps:$4 sm:$0xff]  }
 0x86c   :  { %5456 = vmatprep.subr.bf16.mxu0 %v12208_v57  ;;  %5994 = vmatpush1.bf16.msra.mxu1 %v9986_v15  ;;  %v9998_v57 = vld [vmem:[%s13531_s7 + $0x708] ss:$16 sps:$4 sm:$0xff]  }
 0x86d   :  { %5995 = vmatprep.subr.bf16.mxu1 %v9994_v47 }
 0x86f   :  { %5457 = vmatpush1.bf16.msra.mxu0 %v12210_v52  ;;  %v9935_v52 = vld [vmem:[%s13533_s6 + $0xc0] ss:$8 sps:$4 sm:$0xff]  }
 0x870   :  { %5458 = vmatprep.subr.bf16.mxu0 %v12218_v59  ;;  %5996 = vmatpush1.bf16.msra.mxu1 %v9992_v11  ;;  %v9938_v59 = vld [vmem:[%s13533_s6 + $0xd4] ss:$8 sps:$4 sm:$0xff]  }
 0x871   :  { %5997 = vmatprep.subr.bf16.mxu1 %v10000_v3 }
 0x873   :  { %5459 = vmatpush1.bf16.msra.mxu0 %v12220_v31  ;;  %v10012_v31 = vld [vmem:[%s13531_s7 + $0x74c] ss:$16 sps:$4 sm:$0xff]  }
 0x874   :  { %5908 = vmatprep.subr.bf16.mxu0 %v9949_v55  ;;  %5998 = vmatpush1.bf16.msra.mxu1 %v9998_v57  ;;  %v10044_v57 = vld [vmem:[%s13534_s9] sm:$0xff]  }
 0x875   :  { %5999 = vmatprep.subr.bf16.mxu1 %v10006_v44  ;;  %v10050_v44 = vld [vmem:[%s13534_s9 + $0x100] sm:$0xff]  }
 0x876   :  { %5475 = vmatmul.mubr.bf16.vlgmr.msra.gmra.mrb[100].mxu0 %v9935_v52  ;;  %v10045_v52 = vld [vmem:[%s13534_s9 + $0x48] sm:$0xff]  }
 0x877   :  { %8146 = vmatprep.mubr.msk.bf16.mxu0 %vm3306_vm0, %v9938_v59  ;;  %5909 = vmatpush1.bf16.msra.mxu0 %v9947_v50  ;;  %v10052_v59 = vld [vmem:[%s13534_s9 + $0x148] sm:$0xff]  }
 0x878   :  { %5910 = vmatprep.subr.bf16.mxu0 %v9955_v12  ;;  %6000 = vmatpush1.bf16.msra.mxu1 %v10004_v53  ;;  %v10046_v12 = vld [vmem:[%s13534_s9 + $0x8] sm:$0xff]  }
 0x879   :  { %6001 = vmatprep.subr.bf16.mxu1 %v10012_v31  ;;  %v10054_v53 = vld [vmem:[%s13534_s9 + $0x108] sm:$0xff]  }
 0x87b   :  { %5911 = vmatpush1.bf16.msra.mxu0 %v9953_v24  ;;  %v10047_v24 = vld [vmem:[%s13534_s9 + $0x50] sm:$0xff]  }
 0x87c   :  { %5912 = vmatprep.subr.bf16.mxu0 %v9961_v28  ;;  %6002 = vmatpush1.bf16.msra.mxu1 %v10010_v8  ;;  %v10056_v28 = vld [vmem:[%s13534_s9 + $0x150] sm:$0xff]  }
 0x87d   :  { %6003 = vmatprep.subr.bf16.mxu1 %v10018_v17 }
 0x87e   :  { %5485 = vmatmul.mubr.bf16.gmra.mrb[104].mxu0 %v9940_v22 }
 0x87f   :  { %8147 = vmatprep.mubr.msk.bf16.mxu0 %vm3306_vm0, %v9941_v39  ;;  %5913 = vmatpush1.bf16.msra.mxu0 %v9959_v36  ;;  %v10049_v36 = vld [vmem:[%s13534_s9 + $0x10] sm:$0xff]  }
 0x880   :  { %5914 = vmatprep.subr.bf16.mxu0 %v9967_v27  ;;  %6004 = vmatpush1.bf16.msra.mxu1 %v10016_v14  ;;  %v10058_v27 = vld [vmem:[%s13534_s9 + $0x110] sm:$0xff]   ;;  %v10051_v14 = vld [vmem:[%s13534_s9 + $0x58] sm:$0xff]  }
 0x881   :  { %6005 = vmatprep.subr.bf16.mxu1 %v10024_v62  ;;  %v10060_v62 = vld [vmem:[%s13534_s9 + $0x158] sm:$0xff]  }
 0x883   :  { %5915 = vmatpush1.bf16.msra.mxu0 %v9965_v25 }
 0x884   :  { %5916 = vmatprep.subr.bf16.mxu0 %v9973_v13  ;;  %6006 = vmatpush1.bf16.msra.mxu1 %v10022_v43  ;;  %v10053_v13 = vld [vmem:[%s13534_s9 + $0x18] sm:$0xff]  }
 0x885   :  { %6007 = vmatprep.subr.bf16.mxu1 %v10030_v2  ;;  %v10062_v43 = vld [vmem:[%s13534_s9 + $0x118] sm:$0xff]  }
 0x886   :  { %5495 = vmatmul.mubr.bf16.gmra.mrb[108].mxu0 %v9943_v33  ;;  %v10055_v33 = vld [vmem:[%s13534_s9 + $0x60] sm:$0xff]  }
 0x887   :  { %8148 = vmatprep.mubr.msk.bf16.mxu0 %vm3306_vm0, %v9944_v0  ;;  %5917 = vmatpush1.bf16.msra.mxu0 %v9971_v9 }
 0x888   :  { %5918 = vmatprep.subr.bf16.mxu0 %v9979_v49  ;;  %6008 = vmatpush1.bf16.msra.mxu1 %v10028_v21 }
 0x889   :  { %6009 = vmatprep.subr.bf16.mxu1 %v10036_v37  ;;  %v10057_v37 = vld [vmem:[%s13534_s9 + $0x20] sm:$0xff]  }
 0x88b   :  { %5919 = vmatpush1.bf16.msra.mxu0 %v9977_v30  ;;  %v10059_v30 = vld [vmem:[%s13534_s9 + $0x68] sm:$0xff]  }
 0x88c   :  { %5920 = vmatprep.subr.bf16.mxu0 %v9985_v16  ;;  %6010 = vmatpush1.bf16.msra.mxu1 %v10034_v58  ;;  %v10061_v58 = vld [vmem:[%s13534_s9 + $0x28] sm:$0xff]  }
 0x88d   :  { %6011 = vmatprep.subr.bf16.mxu1 %v10042_v38  ;;  %v3945_v38 = vsub.s32 3, %v11872_v10 }
 0x88e   :  { %5505 = vmatmul.mubr.bf16.gmra.mrb[112].mxu0 %v9946_v45 }
 0x88f   :  { %5921 = vmatpush1.bf16.msra.mxu0 %v9983_v5 }
 0x890   :  { %5922 = vmatprep.subr.bf16.mxu0 %v9991_v48  ;;  %6012 = vmatpush1.bf16.msra.mxu1 %v10040_v54  ;;  %v3261_v54 = vld [vmem:[%s13535_s8] sm:$0xf] }
 0x891   :  { %8902 = vmatprep.subr.bf16.mxu1 %v10043_v26  ;;  %v13166_v26 = vrot.slane %v3261_v54, %v1420_v1 }
 0x893   :  { %5923 = vmatpush1.bf16.msra.mxu0 %v9989_v35 }
 0x894   :  { %5924 = vmatprep.subr.bf16.mxu0 %v9997_v23 }
 0x897   :  { %5925 = vmatpush1.bf16.msra.mxu0 %v9995_v51  ;;  %v10063_v51 = vld [vmem:[%s13534_s9 + $0x70] sm:$0xff]  }
 0x898   :  { %5926 = vmatprep.subr.bf16.mxu0 %v10003_v42  ;;  %v10064_v42 = vld [vmem:[%s13534_s9 + $0x160] sm:$0xff]  }
 0x89b   :  { %5927 = vmatpush1.bf16.msra.mxu0 %v10001_v32  ;;  %v10065_v32 = vld [vmem:[%s13534_s9 + $0x30] sm:$0xff]  }
 0x89c   :  { %5928 = vmatprep.subr.bf16.mxu0 %v10009_v56  ;;  %v10066_v56 = vld [vmem:[%s13534_s9 + $0x120] sm:$0xff]  }
 0x89f   :  { %5929 = vmatpush1.bf16.msra.mxu0 %v10007_v20  ;;  %v10067_v20 = vld [vmem:[%s13534_s9 + $0x78] sm:$0xff]  }
 0x8a0   :  { %5930 = vmatprep.subr.bf16.mxu0 %v10015_v18  ;;  %v10068_v18 = vld [vmem:[%s13534_s9 + $0x168] sm:$0xff]  }
 0x8a3   :  { %5931 = vmatpush1.bf16.msra.mxu0 %v10013_v7  ;;  %v10069_v7 = vld [vmem:[%s13534_s9 + $0x38] sm:$0xff]  }
 0x8a4   :  { %5932 = vmatprep.subr.bf16.mxu0 %v10021_v40  ;;  %v10070_v40 = vld [vmem:[%s13534_s9 + $0x128] sm:$0xff]  }
 0x8a7   :  { %5933 = vmatpush1.bf16.msra.mxu0 %v10019_v6  ;;  %v10071_v6 = vld [vmem:[%s13534_s9 + $0xc0] sm:$0xff]  }
 0x8a8   :  { %5934 = vmatprep.subr.bf16.mxu0 %v10027_v60  ;;  %v10072_v60 = vld [vmem:[%s13534_s9 + $0x170] sm:$0xff]  }
 0x8ab   :  { %5935 = vmatpush1.bf16.msra.mxu0 %v10025_v29  ;;  %v10074_v29 = vld [vmem:[%s13534_s9 + $0x130] sm:$0xff]  }
 0x8ac   :  { %5936 = vmatprep.subr.bf16.mxu0 %v10033_v4  ;;  %v10076_v4 = vld [vmem:[%s13534_s9 + $0x178] sm:$0xff]  }
 0x8af   :  { %5937 = vmatpush1.bf16.msra.mxu0 %v10031_v19  ;;  %v10078_v19 = vld [vmem:[%s13534_s9 + $0x138] sm:$0xff]  }
 0x8b0   :  { %5938 = vmatprep.subr.bf16.mxu0 %v10039_v61  ;;  %v3941_v61 = vsub.s32 2, %v11872_v10 }
 0x8b3   :  { %5939 = vmatpush1.bf16.msra.mxu0 %v10037_v63  ;;  %v10080_v63 = vld [vmem:[%s13534_s9 + $0x240] sm:$0xff]  }
 0x8b4   :  { %8946 = vmatprep.subr.bf16.mxu0 %v10048_v34  ;;  %v13168_v34 = vrot.slane %v3261_v54, %v3941_v61 }
 0x949   :  { %v5476_v41 = vpop.f32.mrb[100].mxu0 }
 0x94a   :  { %v5478_v15 = vpop.f32.mrb[101].mxu0 }
 0x94b   :  { %v5480_v47 = vpop.f32.mrb[102].mxu0 }
 0x94c   :  { %v5515_v11 = vpack.c.bf16 %v5480_v47, %v5476_v41  ;;  %v5482_v3 = vpop.f32.mrb[103].mxu0  ;;  %v13172_v41 = vrot.slane %v3261_v54, %v1424_v46 }
 0x94d   :  { %v5516_v55 = vpack.c.bf16 %v5482_v3, %v5478_v15  ;;  %v13174_v15 = vrot.slane %v3261_v54, %v3945_v38 }
 0x94f   :  { %5940 = vmatprep.mubr.bf16.mxu0 %v5516_v55  ;;  %6013 = vmatprep.mubr.bf16.mxu1 %v5516_v55 }
 0x950   :  { %5941 = vmatmul.mubr.bf16.vlgmr.msra.gmra.mrb[68].mxu0 %v5515_v11  ;;  %6014 = vmatmul.mubr.bf16.vlgmr.msra.gmra.mrb[160].mxu1 %v5515_v11 }
 0x951   :  { %v5486_v50 = vpop.f32.mrb[104].mxu0  ;;  %8903 = vmatpush3.bf16.msra.mxu1 %v10044_v57  ;;  %8947 = vmatpush3.bf16.msra.mxu0 %v10050_v44 }
 0x952   :  { %v5488_v31 = vpop.f32.mrb[105].mxu0  ;;  %8904 = vmatprep.subr.bf16.mxu1 %v10045_v52  ;;  %8948 = vmatprep.subr.bf16.mxu0 %v10052_v59 }
 0x953   :  { %v5490_v8 = vpop.f32.mrb[106].mxu0 }
 0x954   :  { %v5517_v17 = vpack.c.bf16 %v5490_v8, %v5486_v50  ;;  %v5492_v22 = vpop.f32.mrb[107].mxu0 }
 0x955   :  { %v5518_v39 = vpack.c.bf16 %v5492_v22, %v5488_v31  ;;  %8905 = vmatpush3.bf16.msra.mxu1 %v10046_v12  ;;  %8949 = vmatpush3.bf16.msra.mxu0 %v10054_v53 }
 0x956   :  { %8906 = vmatprep.subr.bf16.mxu1 %v10047_v24  ;;  %8950 = vmatprep.subr.bf16.mxu0 %v10056_v28 }
 0x957   :  { %5950 = vmatprep.mubr.bf16.mxu0 %v5518_v39  ;;  %6023 = vmatprep.mubr.bf16.mxu1 %v5518_v39 }
 0x958   :  { %5951 = vmatmul.mubr.bf16.gmra.mrb[72].mxu0 %v5517_v17  ;;  %6024 = vmatmul.mubr.bf16.gmra.mrb[164].mxu1 %v5517_v17 }
 0x959   :  { %v5496_v25 = vpop.f32.mrb[108].mxu0  ;;  %8907 = vmatpush3.bf16.msra.mxu1 %v10049_v36  ;;  %8951 = vmatpush3.bf16.msra.mxu0 %v10058_v27 }
 0x95a   :  { %v5498_v2 = vpop.f32.mrb[109].mxu0  ;;  %8908 = vmatprep.subr.bf16.mxu1 %v10051_v14  ;;  %8952 = vmatprep.subr.bf16.mxu0 %v10060_v62 }
 0x95b   :  { %v5500_v0 = vpop.f32.mrb[110].mxu0 }
 0x95c   :  { %v5519_v9 = vpack.c.bf16 %v5500_v0, %v5496_v25  ;;  %v5502_v49 = vpop.f32.mrb[111].mxu0  ;;  %v10073_v0 = vld [vmem:[%s13534_s9 + $0x80] sm:$0xff]  }
 0x95d   :  { %v5520_v21 = vpack.c.bf16 %v5502_v49, %v5498_v2  ;;  %8909 = vmatpush3.bf16.msra.mxu1 %v10053_v13  ;;  %8953 = vmatpush3.bf16.msra.mxu0 %v10062_v43 }
 0x95e   :  { %8910 = vmatprep.subr.bf16.mxu1 %v10055_v33  ;;  %8954 = vmatprep.subr.bf16.mxu0 %v10064_v42 }
 0x95f   :  { %5960 = vmatprep.mubr.bf16.mxu0 %v5520_v21  ;;  %6033 = vmatprep.mubr.bf16.mxu1 %v5520_v21 }
 0x960   :  { %5961 = vmatmul.mubr.bf16.gmra.mrb[76].mxu0 %v5519_v9  ;;  %6034 = vmatmul.mubr.bf16.gmra.mrb[168].mxu1 %v5519_v9 }
 0x961   :  { %v5506_v16 = vpop.f32.mrb[112].mxu0  ;;  %8911 = vmatpush3.bf16.msra.mxu1 %v10057_v37  ;;  %8955 = vmatpush3.bf16.msra.mxu0 %v10066_v56  ;;  %v10077_v56 = vld [vmem:[%s13534_s9 + $0x88] sm:$0xff]  }
 0x962   :  { %v5508_v45 = vpop.f32.mrb[113].mxu0  ;;  %8912 = vmatprep.subr.bf16.mxu1 %v10059_v30  ;;  %8956 = vmatprep.subr.bf16.mxu0 %v10068_v18  ;;  %v10075_v30 = vld [vmem:[%s13534_s9 + $0xc8] sm:$0xff]  }
 0x963   :  { %v5510_v5 = vpop.f32.mrb[114].mxu0 }
 0x964   :  { %v5521_v48 = vpack.c.bf16 %v5510_v5, %v5506_v16  ;;  %v5512_v35 = vpop.f32.mrb[115].mxu0 }
 0x965   :  { %v5522_v23 = vpack.c.bf16 %v5512_v35, %v5508_v45  ;;  %8913 = vmatpush3.bf16.msra.mxu1 %v10061_v58  ;;  %8957 = vmatpush3.bf16.msra.mxu0 %v10070_v40 }
 0x966   :  { %8914 = vmatprep.subr.bf16.mxu1 %v10063_v51  ;;  %8958 = vmatprep.subr.bf16.mxu0 %v10072_v60 }
 0x967   :  { %5970 = vmatprep.mubr.bf16.mxu0 %v5522_v23  ;;  %6043 = vmatprep.mubr.bf16.mxu1 %v5522_v23 }
 0x968   :  { %5971 = vmatmul.mubr.bf16.gmra.mrb[80].mxu0 %v5521_v48  ;;  %6044 = vmatmul.mubr.bf16.gmra.mrb[172].mxu1 %v5521_v48 }
 0x969   :  { %8915 = vmatpush3.bf16.msra.mxu1 %v10065_v32  ;;  %8959 = vmatpush3.bf16.msra.mxu0 %v10074_v29 }
 0x96a   :  { %8916 = vmatprep.subr.bf16.mxu1 %v10067_v20  ;;  %8960 = vmatprep.subr.bf16.mxu0 %v10076_v4 }
 0x96d   :  { %8917 = vmatpush3.bf16.msra.mxu1 %v10069_v7  ;;  %8961 = vmatpush3.bf16.msra.mxu0 %v10078_v19 }
 0x96e   :  { %8924 = vmatprep.subr.bf16.mxu1 %v10071_v6  ;;  %8990 = vmatprep.subr.bf16.mxu0 %v10080_v63  ;;  %v10079_v6 = vld [vmem:[%s13534_s9 + $0xd0] sm:$0xff]  }
 0xa23   :  { %v5942_v47 = vpop.f32.mrb[68].mxu0  ;;  %v6015_v11 = vpop.f32.mrb[160].mxu1 }
 0xa24   :  { %v9162_v3 = vadd.f32 %v5942_v47, %v13166_v26  ;;  %v9178_v55 = vadd.f32 %v6015_v11, %v13168_v34  ;;  %v5944_v57 = vpop.f32.mrb[69].mxu0  ;;  %v6017_v44 = vpop.f32.mrb[161].mxu1 }
 0xa25   :  { %v9163_v52 = vadd.f32 %v5944_v57, %v13172_v41  ;;  %v9179_v1 = vadd.f32 %v6017_v44, %v13174_v15  ;;  %v5946_v59 = vpop.f32.mrb[70].mxu0  ;;  %v6019_v50 = vpop.f32.mrb[162].mxu1 }
 0xa26   :  { %v9164_v10 = vadd.f32 %v5946_v59, %v13166_v26  ;;  %v9180_v46 = vadd.f32 %v6019_v50, %v13168_v34  ;;  %v5948_v12 = vpop.f32.mrb[71].mxu0  ;;  %v6021_v53 = vpop.f32.mrb[163].mxu1  ;;  %v6086_v28 = vmax.f32 %v9162_v3, 0.0  ;;  %v6088_v8 = vmax.f32 %v9178_v55, 0.0  ;;  %v10081_v3 = vld [vmem:[%s13534_s9 + $0x90] sm:$0xff]   ;;  %v10082_v55 = vld [vmem:[%s13534_s9 + $0x200] sm:$0xff]  }
 0xa27   :  { %v9165_v31 = vadd.f32 %v5948_v12, %v13172_v41  ;;  %v9181_v24 = vadd.f32 %v6021_v53, %v13174_v15  ;;  %v6087_v39 = vmax.f32 %v9163_v52, 0.0  ;;  %v6089_v36 = vmax.f32 %v9179_v1, 0.0  ;;  %v10083_v59 = vld [vmem:[%s13534_s9 + $0xd8] sm:$0xff]   ;;  %v10084_v50 = vld [vmem:[%s13534_s9 + $0x248] sm:$0xff]  }
 0xa28   :  { %v6090_v17 = vmax.f32 %v9164_v10, 0.0  ;;  %v6092_v22 = vmax.f32 %v9180_v46, 0.0 }
 0xa29   :  { %v6091_v27 = vmax.f32 %v9165_v31, 0.0  ;;  %v6093_v14 = vmax.f32 %v9181_v24, 0.0 }
 0xa2a   :  { %v6118_v62 = vpack.c.bf16 %v6090_v17, %v6086_v28  ;;  %v13184_v25 = vpack.c.bf16 %v6092_v22, %v6088_v8 }
 0xa2b   :  { %v6119_v13 = vpack.c.bf16 %v6091_v27, %v6087_v39  ;;  %v6121_v43 = vpack.c.bf16 %v6093_v14, %v6089_v36  ;;  %v5952_v2 = vpop.f32.mrb[72].mxu0  ;;  %v6025_v33 = vpop.f32.mrb[164].mxu1  ;;  %v10085_v39 = vld [vmem:[%s13534_s9 + $0x98] sm:$0xff]   ;;  %v10086_v36 = vld [vmem:[%s13534_s9 + $0x208] sm:$0xff]  }
 0xa2c   :  { %v9166_v9 = vadd.f32 %v5952_v2, %v13166_v26  ;;  %v9182_v49 = vadd.f32 %v6025_v33, %v13168_v34  ;;  %v5954_v21 = vpop.f32.mrb[73].mxu0  ;;  %v6027_v37 = vpop.f32.mrb[165].mxu1  ;;  %v10088_v2 = vld [vmem:[%s13534_s9 + $0x250] sm:$0xff]  }
 0xa2d   :  { %v9167_v16 = vadd.f32 %v5954_v21, %v13172_v41  ;;  %v9183_v58 = vadd.f32 %v6027_v37, %v13174_v15  ;;  %v5956_v45 = vpop.f32.mrb[74].mxu0  ;;  %v6029_v5 = vpop.f32.mrb[166].mxu1  ;;  %6423 = vmatprep.mubr.bf16.mxu1 %v6119_v13 }
 0xa2e   :  { %v9168_v48 = vadd.f32 %v5956_v45, %v13166_v26  ;;  %v9184_v35 = vadd.f32 %v6029_v5, %v13168_v34  ;;  %v5958_v23 = vpop.f32.mrb[75].mxu0  ;;  %v6031_v51 = vpop.f32.mrb[167].mxu1  ;;  %6424 = vmatmul.mubr.bf16.vlgmr.msra.gmra.mrb[192].mxu1 %v6118_v62  ;;  %v6094_v20 = vmax.f32 %v9166_v9, 0.0  ;;  %v6096_v18 = vmax.f32 %v9182_v49, 0.0  ;;  %v10089_v5 = vld [vmem:[%s13534_s9 + $0xa0] sm:$0xff]  }
 0xa2f   :  { %v9169_v42 = vadd.f32 %v5958_v23, %v13172_v41  ;;  %v9185_v32 = vadd.f32 %v6031_v51, %v13174_v15  ;;  %8925 = vmatpush3.bf16.msra.mxu1 %v10073_v0  ;;  %6464 = vmatprep.mubr.bf16.mxu1 %v6121_v43  ;;  %v6095_v60 = vmax.f32 %v9167_v16, 0.0  ;;  %v6097_v29 = vmax.f32 %v9183_v58, 0.0  ;;  %v10087_v43 = vld [vmem:[%s13534_s9 + $0xe0] sm:$0xff]  }
 0xa30   :  { %v6098_v7 = vmax.f32 %v9168_v48, 0.0  ;;  %v6100_v40 = vmax.f32 %v9184_v35, 0.0  ;;  %8926 = vmatprep.subr.bf16.mxu1 %v10075_v30  ;;  %v10090_v48 = vld [vmem:[%s13534_s9 + $0x210] sm:$0xff]  }
 0xa31   :  { %v6099_v4 = vmax.f32 %v9169_v42, 0.0  ;;  %v6101_v19 = vmax.f32 %v9185_v32, 0.0  ;;  %v10091_v32 = vld [vmem:[%s13534_s9 + $0xe8] sm:$0xff]  }
 0xa32   :  { %v6122_v63 = vpack.c.bf16 %v6098_v7, %v6094_v20  ;;  %v13206_v61 = vpack.c.bf16 %v6100_v40, %v6096_v18 }
 0xa33   :  { %v6123_v54 = vpack.c.bf16 %v6099_v4, %v6095_v60  ;;  %v13208_v38 = vpack.c.bf16 %v6101_v19, %v6097_v29  ;;  %8927 = vmatpush3.bf16.msra.mxu1 %v10077_v56  ;;  %v5962_v47 = vpop.f32.mrb[76].mxu0  ;;  %v6035_v11 = vpop.f32.mrb[168].mxu1  ;;  %v10092_v56 = vld [vmem:[%s13534_s9 + $0x258] sm:$0xff]  }
 0xa34   :  { %v9170_v57 = vadd.f32 %v5962_v47, %v13166_v26  ;;  %v9186_v44 = vadd.f32 %v6035_v11, %v13168_v34  ;;  %v5964_v52 = vpop.f32.mrb[77].mxu0  ;;  %v6037_v1 = vpop.f32.mrb[169].mxu1  ;;  %8928 = vmatprep.subr.bf16.mxu1 %v10079_v6  ;;  %v10094_v47 = vld [vmem:[%s13534_s9 + $0x218] sm:$0xff]  }
 0xa35   :  { %v9171_v10 = vadd.f32 %v5964_v52, %v13172_v41  ;;  %v9187_v46 = vadd.f32 %v6037_v1, %v13174_v15  ;;  %v5966_v12 = vpop.f32.mrb[78].mxu0  ;;  %v6039_v53 = vpop.f32.mrb[170].mxu1  ;;  %6770 = vmatprep.mubr.bf16.mxu0 %v6123_v54  ;;  %v10093_v54 = vld [vmem:[%s13534_s9 + $0xa8] sm:$0xff]  }
 0xa36   :  { %v9172_v31 = vadd.f32 %v5966_v12, %v13166_v26  ;;  %v9188_v24 = vadd.f32 %v6039_v53, %v13168_v34  ;;  %v5968_v28 = vpop.f32.mrb[79].mxu0  ;;  %v6041_v8 = vpop.f32.mrb[171].mxu1  ;;  %6771 = vmatmul.mubr.bf16.vlgmr.msra.gmra.mrb[116].mxu0 %v6122_v63  ;;  %v6102_v27 = vmax.f32 %v9170_v57, 0.0  ;;  %v6104_v14 = vmax.f32 %v9186_v44, 0.0  ;;  %v10098_v12 = vld [vmem:[%s13534_s9 + $0x220] sm:$0xff]   ;;  %v10099_v53 = vld [vmem:[%s13534_s9 + $0xf8] sm:$0xff]  }
 0xa37   :  { %v9173_v17 = vadd.f32 %v5968_v28, %v13172_v41  ;;  %v9189_v22 = vadd.f32 %v6041_v8, %v13174_v15  ;;  %8929 = vmatpush3.bf16.msra.mxu1 %v10081_v3  ;;  %8991 = vmatpush3.bf16.msra.mxu0 %v10082_v55  ;;  %v6103_v33 = vmax.f32 %v9171_v10, 0.0  ;;  %v6105_v0 = vmax.f32 %v9187_v46, 0.0  ;;  %v10097_v46 = vld [vmem:[%s13534_s9 + $0xb0] sm:$0xff]   ;;  %v10102_v28 = vld [vmem:[%s13534_s9 + $0x228] sm:$0xff]   ;;  %v10103_v8 = vld [vmem:[%s13534_s9 + $0x1c0] sm:$0xff]  }
 0xa38   :  { %v6106_v62 = vmax.f32 %v9172_v31, 0.0  ;;  %v6108_v13 = vmax.f32 %v9188_v24, 0.0  ;;  %8930 = vmatprep.subr.bf16.mxu1 %v10083_v59  ;;  %8992 = vmatprep.subr.bf16.mxu0 %v10084_v50  ;;  %v10100_v31 = vld [vmem:[%s13534_s9 + $0x268] sm:$0xff]   ;;  %v10101_v24 = vld [vmem:[%s13534_s9 + $0xb8] sm:$0xff]  }
 0xa39   :  { %v6107_v9 = vmax.f32 %v9173_v17, 0.0  ;;  %v6109_v49 = vmax.f32 %v9189_v22, 0.0  ;;  %v10104_v17 = vld [vmem:[%s13534_s9 + $0x270] sm:$0xff]   ;;  %v10105_v22 = vld [vmem:[%s13534_s9 + $0x180] sm:$0xff]  }
 0xa3a   :  { %v13242_v21 = vpack.c.bf16 %v6106_v62, %v6102_v27  ;;  %v13244_v37 = vpack.c.bf16 %v6108_v13, %v6104_v14  ;;  %v10108_v27 = vld [vmem:[%s13534_s9 + $0x278] sm:$0xff]   ;;  %v10109_v14 = vld [vmem:[%s13534_s9 + $0x188] sm:$0xff]   ;;  %v10111_v13 = vld [vmem:[%s13534_s9 + $0x1d0] sm:$0xff]  }
 0xa3b   :  { %v6127_v30 = vpack.c.bf16 %v6107_v9, %v6103_v33  ;;  %v13246_v16 = vpack.c.bf16 %v6109_v49, %v6105_v0  ;;  %8931 = vmatpush3.bf16.msra.mxu1 %v10085_v39  ;;  %8993 = vmatpush3.bf16.msra.mxu0 %v10086_v36  ;;  %v5972_v58 = vpop.f32.mrb[80].mxu0  ;;  %v6045_v45 = vpop.f32.mrb[172].mxu1  ;;  %v10106_v39 = vld [vmem:[%s13534_s9 + $0x230] sm:$0xff]   ;;  %v10107_v36 = vld [vmem:[%s13534_s9 + $0x1c8] sm:$0xff]   ;;  %v10110_v62 = vld [vmem:[%s13534_s9 + $0x238] sm:$0xff]  }
 0xa3c   :  { %v9174_v35 = vadd.f32 %v5972_v58, %v13166_v26  ;;  %v9190_v23 = vadd.f32 %v6045_v45, %v13168_v34  ;;  %v5974_v51 = vpop.f32.mrb[81].mxu0  ;;  %v6047_v42 = vpop.f32.mrb[173].mxu1  ;;  %8932 = vmatprep.subr.bf16.mxu1 %v10087_v43  ;;  %8994 = vmatprep.subr.bf16.mxu0 %v10088_v2  ;;  %v10114_v43 = vld [vmem:[%s13534_s9 + $0x300] sm:$0xff]   ;;  %v10115_v2 = vld [vmem:[%s13534_s9 + $0x1d8] sm:$0xff]   ;;  %v10116_v33 = vld [vmem:[%s13534_s9 + $0x348] sm:$0xff]  }
 0xa3d   :  { %v9175_v20 = vadd.f32 %v5974_v51, %v13172_v41  ;;  %v9191_v18 = vadd.f32 %v6047_v42, %v13174_v15  ;;  %v5976_v7 = vpop.f32.mrb[82].mxu0  ;;  %v6049_v40 = vpop.f32.mrb[174].mxu1  ;;  %7111 = vmatprep.mubr.bf16.mxu0 %v6127_v30  ;;  %v10117_v0 = vld [vmem:[%s13534_s9 + $0x198] sm:$0xff]   ;;  %v10118_v9 = vld [vmem:[%s13534_s9 + $0x308] sm:$0xff]   ;;  %v10119_v49 = vld [vmem:[%s13534_s9 + $0x1e0] sm:$0xff]  }
 0xa3e   :  { %v9176_v6 = vadd.f32 %v5976_v7, %v13166_v26  ;;  %v9192_v60 = vadd.f32 %v6049_v40, %v13168_v34  ;;  %v5978_v29 = vpop.f32.mrb[83].mxu0  ;;  %v6051_v4 = vpop.f32.mrb[175].mxu1  ;;  %v6110_v11 = vmax.f32 %v9174_v35, 0.0  ;;  %v6112_v26 = vmax.f32 %v9190_v23, 0.0  ;;  %v10121_v30 = vld [vmem:[%s13534_s9 + $0x1a0] sm:$0xff]   ;;  %v10122_v58 = vld [vmem:[%s13534_s9 + $0x310] sm:$0xff]  }
 0xa3f   :  { %v9177_v19 = vadd.f32 %v5978_v29, %v13172_v41  ;;  %v9193_v63 = vadd.f32 %v6051_v4, %v13174_v15  ;;  %8933 = vmatpush3.bf16.msra.mxu1 %v10089_v5  ;;  %8995 = vmatpush3.bf16.msra.mxu0 %v10090_v48  ;;  %v10095_v41 = vld [vmem:[%s13534_s9 + $0xf0] sm:$0xff]   ;;  %v10096_v15 = vld [vmem:[%s13534_s9 + $0x260] sm:$0xff]   ;;  %v6111_v55 = vmax.f32 %v9175_v20, 0.0  ;;  %v6113_v57 = vmax.f32 %v9191_v18, 0.0  ;;  %v10123_v45 = vld [vmem:[%s13534_s9 + $0x1e8] sm:$0xff]  }
 0xa40   :  { %v6114_v3 = vmax.f32 %v9176_v6, 0.0  ;;  %v6116_v34 = vmax.f32 %v9192_v60, 0.0  ;;  %8934 = vmatprep.subr.bf16.mxu1 %v10091_v32  ;;  %8996 = vmatprep.subr.bf16.mxu0 %v10092_v56  ;;  %v10124_v5 = vld [vmem:[%s13534_s9 + $0x358] sm:$0xff]   ;;  %v10125_v48 = vld [vmem:[%s13534_s9 + $0x1a8] sm:$0xff]   ;;  %v10127_v23 = vld [vmem:[%s13534_s9 + $0x1f0] sm:$0xff]  }
 0xa41   :  { %v6115_v44 = vmax.f32 %v9177_v19, 0.0  ;;  %v6117_v52 = vmax.f32 %v9193_v63, 0.0  ;;  %v10126_v35 = vld [vmem:[%s13534_s9 + $0x318] sm:$0xff]   ;;  %v10128_v51 = vld [vmem:[%s13534_s9 + $0x360] sm:$0xff]   ;;  %v10129_v42 = vld [vmem:[%s13534_s9 + $0x1b0] sm:$0xff]  }
 0xa42   :  { %v13280_v1 = vpack.c.bf16 %v6114_v3, %v6110_v11  ;;  %v13282_v59 = vpack.c.bf16 %v6116_v34, %v6112_v26  ;;  %v10130_v32 = vld [vmem:[%s13534_s9 + $0x320] sm:$0xff]   ;;  %v10131_v56 = vld [vmem:[%s13534_s9 + $0x1f8] sm:$0xff]   ;;  %v10132_v20 = vld [vmem:[%s13534_s9 + $0x368] sm:$0xff]  }
 0xa43   :  { %v6131_v50 = vpack.c.bf16 %v6115_v44, %v6111_v55  ;;  %v13284_v10 = vpack.c.bf16 %v6117_v52, %v6113_v57  ;;  %8935 = vmatpush3.bf16.msra.mxu1 %v10093_v54  ;;  %8997 = vmatpush3.bf16.msra.mxu0 %v10094_v47  ;;  %v10133_v18 = vld [vmem:[%s13534_s9 + $0x1b8] sm:$0xff]   ;;  %v10134_v7 = vld [vmem:[%s13534_s9 + $0x328] sm:$0xff]   ;;  %v10135_v40 = vld [vmem:[%s13534_s9 + $0x2c0] sm:$0xff]  }
 0xa44   :  { %8936 = vmatprep.subr.bf16.mxu1 %v10095_v41  ;;  %8998 = vmatprep.subr.bf16.mxu0 %v10096_v15  ;;  %v10136_v6 = vld [vmem:[%s13534_s9 + $0x370] sm:$0xff]   ;;  %v10137_v60 = vld [vmem:[%s13534_s9 + $0x280] sm:$0xff]   ;;  %v10139_v4 = vld [vmem:[%s13534_s9 + $0x2c8] sm:$0xff]  }
 0xa45   :  { %v10138_v29 = vld [vmem:[%s13534_s9 + $0x330] sm:$0xff]   ;;  %v10140_v19 = vld [vmem:[%s13534_s9 + $0x378] sm:$0xff]   ;;  %v10141_v63 = vld [vmem:[%s13534_s9 + $0x288] sm:$0xff]  }
 0xa46   :  { %v10142_v54 = vld [vmem:[%s13534_s9 + $0x338] sm:$0xff]   ;;  %v10143_v47 = vld [vmem:[%s13534_s9 + $0x2d0] sm:$0xff]   ;;  %v10147_v26 = vld [vmem:[%s13534_s9 + $0x2e0] sm:$0xff]  }
 0xa47   :  { %8937 = vmatpush3.bf16.msra.mxu1 %v10097_v46  ;;  %8999 = vmatpush3.bf16.msra.mxu0 %v10098_v12  ;;  %v10146_v11 = vld [vmem:[%s13534_s9 + $0x298] sm:$0xff]   ;;  %v10148_v3 = vld [vmem:[%s13534_s9 + $0x2a0] sm:$0xff]   ;;  %v10149_v34 = vld [vmem:[%s13534_s9 + $0x2e8] sm:$0xff]  }
 0xa48   :  { %8938 = vmatprep.subr.bf16.mxu1 %v10099_v53  ;;  %9000 = vmatprep.subr.bf16.mxu0 %v10100_v31  ;;  %v10150_v41 = vld [vmem:[%s13534_s9 + $0x2a8] sm:$0xff]   ;;  %v10151_v15 = vld [vmem:[%s13534_s9 + $0x2f0] sm:$0xff]   ;;  %v10153_v57 = vld [vmem:[%s13534_s9 + $0x2f8] sm:$0xff]  }
 0xa49   :  { %v10152_v55 = vld [vmem:[%s13534_s9 + $0x2b0] sm:$0xff]   ;;  %v10154_v44 = vld [vmem:[%s13534_s9 + $0x2b8] sm:$0xff]   ;;  %v10155_v52 = vld [vmem:[%s13534_s9 + $0x3c0] sm:$0xff]  }
 0xa4a   :  { %v10158_v46 = vld [vmem:[%s13534_s9 + $0x388] sm:$0xff]   ;;  %v10159_v12 = vld [vmem:[%s13534_s9 + $0x3d0] sm:$0xff]   ;;  %v10163_v31 = vld [vmem:[%s13534_s9 + $0x3e0] sm:$0xff]  }
 0xa4b   :  { %8939 = vmatpush3.bf16.msra.mxu1 %v10101_v24  ;;  %9001 = vmatpush3.bf16.msra.mxu0 %v10102_v28  ;;  %v10160_v53 = vld [vmem:[%s13534_s9 + $0x390] sm:$0xff]   ;;  %v10164_v24 = vld [vmem:[%s13534_s9 + $0x3a0] sm:$0xff]   ;;  %v10165_v28 = vld [vmem:[%s13534_s9 + $0x3e8] sm:$0xff]  }
 0xa4c   :  { %8968 = vmatprep.subr.bf16.mxu1 %v10103_v8  ;;  %9002 = vmatprep.subr.bf16.mxu0 %v10104_v17  ;;  %v10166_v8 = vld [vmem:[%s13534_s9 + $0x3a8] sm:$0xff]   ;;  %v10167_v17 = vld [vmem:[%s13534_s9 + $0x3f0] sm:$0xff]  }
 0xa4e   :  { %6465 = vmatmul.mubr.bf16.vlgmr.msra.gmra.mrb[196].mxu1 %v13184_v25  ;;  %v10112_v25 = vld [vmem:[%s13534_s9 + $0x340] sm:$0xff]  }
 0xa4f   :  { %8969 = vmatpush3.bf16.msra.mxu1 %v10105_v22  ;;  %6811 = vmatprep.mubr.bf16.mxu1 %v13208_v38  ;;  %v10113_v38 = vld [vmem:[%s13534_s9 + $0x190] sm:$0xff]  }
 0xa50   :  { %9003 = vmatpush3.bf16.msra.mxu0 %v10106_v39  ;;  %8970 = vmatprep.subr.bf16.mxu1 %v10107_v36  ;;  %v10168_v22 = vld [vmem:[%s13534_s9 + $0x3b0] sm:$0xff]   ;;  %v10169_v39 = vld [vmem:[%s13534_s9 + $0x3f8] sm:$0xff]  }
 0xa51   :  { %9004 = vmatprep.subr.bf16.mxu0 %v10108_v27  ;;  %v10170_v36 = vld [vmem:[%s13534_s9 + $0x3b8] sm:$0xff]  }
 0xa53   :  { %8971 = vmatpush3.bf16.msra.mxu1 %v10109_v14 }
 0xa54   :  { %9005 = vmatpush3.bf16.msra.mxu0 %v10110_v62  ;;  %8972 = vmatprep.subr.bf16.mxu1 %v10111_v13 }
 0xa55   :  { %9034 = vmatprep.subr.bf16.mxu0 %v10112_v25 }
 0xa57   :  { %7112 = vmatmul.mubr.bf16.vlgmr.msra.gmra.mrb[120].mxu0 %v13242_v21  ;;  %8973 = vmatpush3.bf16.msra.mxu1 %v10113_v38  ;;  %v10120_v21 = vld [vmem:[%s13534_s9 + $0x350] sm:$0xff]  }
 0xa58   :  { %9035 = vmatpush3.bf16.msra.mxu0 %v10114_v43  ;;  %7452 = vmatprep.mubr.bf16.mxu0 %v6131_v50  ;;  %v10157_v50 = vld [vmem:[%s13534_s9 + $0x3c8] sm:$0xff]  }
 0xa59   :  { %8974 = vmatprep.subr.bf16.mxu1 %v10115_v2  ;;  %9036 = vmatprep.subr.bf16.mxu0 %v10116_v33 }
 0xa5b   :  { %8975 = vmatpush3.bf16.msra.mxu1 %v10117_v0 }
 0xa5c   :  { %9037 = vmatpush3.bf16.msra.mxu0 %v10118_v9  ;;  %8976 = vmatprep.subr.bf16.mxu1 %v10119_v49 }
 0xa5d   :  { %9038 = vmatprep.subr.bf16.mxu0 %v10120_v21 }
 0xa5f   :  { %8977 = vmatpush3.bf16.msra.mxu1 %v10121_v30 }
 0xa60   :  { %9039 = vmatpush3.bf16.msra.mxu0 %v10122_v58  ;;  %8978 = vmatprep.subr.bf16.mxu1 %v10123_v45 }
 0xa61   :  { %9040 = vmatprep.subr.bf16.mxu0 %v10124_v5 }
 0xa63   :  { %8979 = vmatpush3.bf16.msra.mxu1 %v10125_v48 }
 0xa64   :  { %9041 = vmatpush3.bf16.msra.mxu0 %v10126_v35  ;;  %8980 = vmatprep.subr.bf16.mxu1 %v10127_v23 }
 0xa65   :  { %9042 = vmatprep.subr.bf16.mxu0 %v10128_v51 }
 0xa67   :  { %8981 = vmatpush3.bf16.msra.mxu1 %v10129_v42 }
 0xa68   :  { %9043 = vmatpush3.bf16.msra.mxu0 %v10130_v32  ;;  %8982 = vmatprep.subr.bf16.mxu1 %v10131_v56 }
 0xa69   :  { %9044 = vmatprep.subr.bf16.mxu0 %v10132_v20 }
 0xa6b   :  { %8983 = vmatpush3.bf16.msra.mxu1 %v10133_v18 }
 0xa6c   :  { %9045 = vmatpush3.bf16.msra.mxu0 %v10134_v7  ;;  %9012 = vmatprep.subr.bf16.mxu1 %v10135_v40  ;;  %v8309_v7 = vld [vmem:[%s13536_s10] ss:$0 sm:$0xff] }
 0xa6d   :  { %9046 = vmatprep.subr.bf16.mxu0 %v10136_v6 }
 0xa6e   :  { %6812 = vmatmul.mubr.bf16.vlgmr.msra.gmra.mrb[200].mxu1 %v13206_v61  ;;  %v10144_v61 = vld [vmem:[%s13534_s9 + $0x290] sm:$0xff]  }
 0xa6f   :  { %9013 = vmatpush3.bf16.msra.mxu1 %v10137_v60  ;;  %7152 = vmatprep.mubr.bf16.mxu1 %v13246_v16  ;;  %v10145_v16 = vld [vmem:[%s13534_s9 + $0x2d8] sm:$0xff]  }
 0xa70   :  { %9047 = vmatpush3.bf16.msra.mxu0 %v10138_v29  ;;  %9014 = vmatprep.subr.bf16.mxu1 %v10139_v4 }
 0xa71   :  { %9048 = vmatprep.subr.bf16.mxu0 %v10140_v19 }
 0xa73   :  { %9015 = vmatpush3.bf16.msra.mxu1 %v10141_v63 }
 0xa74   :  { %9049 = vmatpush3.bf16.msra.mxu0 %v10142_v54  ;;  %9016 = vmatprep.subr.bf16.mxu1 %v10143_v47 }
 0xa77   :  { %7453 = vmatmul.mubr.bf16.vlgmr.msra.gmra.mrb[124].mxu0 %v13280_v1  ;;  %9017 = vmatpush3.bf16.msra.mxu1 %v10144_v61  ;;  %v10156_v1 = vld [vmem:[%s13534_s9 + $0x380] sm:$0xff]  }
 0xa78   :  { %9018 = vmatprep.subr.bf16.mxu1 %v10145_v16 }
 0xa7b   :  { %9019 = vmatpush3.bf16.msra.mxu1 %v10146_v11 }
 0xa7c   :  { %9020 = vmatprep.subr.bf16.mxu1 %v10147_v26 }
 0xa7f   :  { %9021 = vmatpush3.bf16.msra.mxu1 %v10148_v3 }
 0xa80   :  { %9022 = vmatprep.subr.bf16.mxu1 %v10149_v34 }
 0xa83   :  { %9023 = vmatpush3.bf16.msra.mxu1 %v10150_v41 }
 0xa84   :  { %9024 = vmatprep.subr.bf16.mxu1 %v10151_v15 }
 0xa87   :  { %9025 = vmatpush3.bf16.msra.mxu1 %v10152_v55 }
 0xa88   :  { %9026 = vmatprep.subr.bf16.mxu1 %v10153_v57 }
 0xa8b   :  { %9027 = vmatpush3.bf16.msra.mxu1 %v10154_v44 }
 0xa8c   :  { %9056 = vmatprep.subr.bf16.mxu1 %v10155_v52 }
 0xa8e   :  { %7153 = vmatmul.mubr.bf16.vlgmr.msra.gmra.mrb[204].mxu1 %v13244_v37  ;;  %v10161_v37 = vld [vmem:[%s13534_s9 + $0x3d8] sm:$0xff]  }
 0xa8f   :  { %9057 = vmatpush3.bf16.msra.mxu1 %v10156_v1  ;;  %7493 = vmatprep.mubr.bf16.mxu1 %v13284_v10  ;;  %v10162_v10 = vld [vmem:[%s13534_s9 + $0x398] sm:$0xff]  }
 0xa90   :  { %9058 = vmatprep.subr.bf16.mxu1 %v10157_v50 }
 0xa93   :  { %9059 = vmatpush3.bf16.msra.mxu1 %v10158_v46 }
 0xa94   :  { %9060 = vmatprep.subr.bf16.mxu1 %v10159_v12 }
 0xa97   :  { %9061 = vmatpush3.bf16.msra.mxu1 %v10160_v53 }
 0xa98   :  { %9062 = vmatprep.subr.bf16.mxu1 %v10161_v37 }
 0xa9b   :  { %9063 = vmatpush3.bf16.msra.mxu1 %v10162_v10 }
 0xa9c   :  { %9064 = vmatprep.subr.bf16.mxu1 %v10163_v31 }
 0xa9f   :  { %9065 = vmatpush3.bf16.msra.mxu1 %v10164_v24 }
 0xaa0   :  { %9066 = vmatprep.subr.bf16.mxu1 %v10165_v28 }
 0xaa3   :  { %9067 = vmatpush3.bf16.msra.mxu1 %v10166_v8 }
 0xaa4   :  { %9068 = vmatprep.subr.bf16.mxu1 %v10167_v17 }
 0xaa7   :  { %9069 = vmatpush3.bf16.msra.mxu1 %v10168_v22 }
 0xaa8   :  { %9070 = vmatprep.subr.bf16.mxu1 %v10169_v39 }
 0xaab   :  { %9071 = vmatpush3.bf16.msra.mxu1 %v10170_v36 }
 0xaae   :  { %7494 = vmatmul.mubr.bf16.vlgmr.msra.gmra.mrb[208].mxu1 %v13282_v59 }
 0xb01   :  { %v8918_v27 = vpop.f32.mrb[192].mxu1 }
 0xb02   :  { %v8919_v14 = vpop.f32.mrb[193].mxu1 }
 0xb03   :  { %v8920_v62 = vadd.f32 %v8919_v14, %v8918_v27  ;;  %v8921_v13 = vpop.f32.mrb[194].mxu1 }
 0xb04   :  { %v8922_v25 = vpop.f32.mrb[195].mxu1 }
 0xb05   :  { %v8923_v38 = vadd.f32 %v8922_v25, %v8921_v13 }
 0xb09   :  { %v8962_v43 = vpop.f32.mrb[116].mxu0 }
 0xb0a   :  { %v8963_v2 = vpop.f32.mrb[117].mxu0 }
 0xb0b   :  { %v8964_v33 = vadd.f32 %v8963_v2, %v8962_v43  ;;  %v8965_v0 = vpop.f32.mrb[118].mxu0 }
 0xb0c   :  { %v8966_v9 = vpop.f32.mrb[119].mxu0 }
 0xb0d   :  { %v8967_v49 = vadd.f32 %v8966_v9, %v8965_v0 }
 0xb21   :  { %v8940_v21 = vpop.f32.mrb[196].mxu1 }
 0xb22   :  { %v8941_v30 = vpop.f32.mrb[197].mxu1 }
 0xb23   :  { %v8942_v58 = vadd.f32 %v8941_v30, %v8940_v21  ;;  %v8943_v45 = vpop.f32.mrb[198].mxu1 }
 0xb24   :  { %v8944_v5 = vpop.f32.mrb[199].mxu1 }
 0xb25   :  { %v6467_v48 = vadd.f32 %v8942_v58, %v8920_v62  ;;  %v8945_v35 = vadd.f32 %v8944_v5, %v8943_v45 }
 0xb27   :  { %v6470_v59 = vadd.f32 %v8945_v35, %v8923_v38  ;;  %v6479_v4 = vadd.f32 %v8309_v7, %v6467_v48 }
 0xb29   :  { %v6480_v54 = vadd.f32 %v8309_v7, %v6470_v59 }
 0xb2a   :  { %v9006_v23 = vpop.f32.mrb[120].mxu0 }
 0xb2b   :  { %v9007_v51 = vpop.f32.mrb[121].mxu0 }
 0xb2c   :  { %v9008_v42 = vadd.f32 %v9007_v51, %v9006_v23  ;;  %v9009_v32 = vpop.f32.mrb[122].mxu0 }
 0xb2d   :  { %v9010_v56 = vpop.f32.mrb[123].mxu0 }
 0xb2e   :  { %v9011_v20 = vadd.f32 %v9010_v56, %v9009_v32 }
 0xb41   :  { %v8984_v18 = vpop.f32.mrb[200].mxu1 }
 0xb42   :  { %v8985_v40 = vpop.f32.mrb[201].mxu1 }
 0xb43   :  { %v8986_v6 = vadd.f32 %v8985_v40, %v8984_v18  ;;  %v8987_v60 = vpop.f32.mrb[202].mxu1 }
 0xb44   :  { %v8988_v29 = vpop.f32.mrb[203].mxu1 }
 0xb45   :  { %v6814_v19 = vadd.f32 %v8986_v6, %v8964_v33  ;;  %v8989_v63 = vadd.f32 %v8988_v29, %v8987_v60 }
 0xb47   :  { %v6820_v47 = vadd.f32 %v6814_v19, %v6479_v4  ;;  %v6817_v61 = vadd.f32 %v8989_v63, %v8967_v49 }
 0xb49   :  { %v6821_v16 = vadd.f32 %v6817_v61, %v6480_v54 }
 0xb4a   :  { %v9050_v11 = vpop.f32.mrb[124].mxu0 }
 0xb4b   :  { %v9051_v26 = vpop.f32.mrb[125].mxu0 }
 0xb4c   :  { %v9052_v3 = vadd.f32 %v9051_v26, %v9050_v11  ;;  %v9053_v34 = vpop.f32.mrb[126].mxu0 }
 0xb4d   :  { %v9054_v41 = vpop.f32.mrb[127].mxu0 }
 0xb4e   :  { %v9055_v15 = vadd.f32 %v9054_v41, %v9053_v34 }
 0xb61   :  { %v9028_v55 = vpop.f32.mrb[204].mxu1 }
 0xb62   :  { %v9029_v57 = vpop.f32.mrb[205].mxu1 }
 0xb63   :  { %v9030_v44 = vadd.f32 %v9029_v57, %v9028_v55  ;;  %v9031_v52 = vpop.f32.mrb[206].mxu1 }
 0xb64   :  { %v9032_v1 = vpop.f32.mrb[207].mxu1 }
 0xb65   :  { %v7155_v50 = vadd.f32 %v9030_v44, %v9008_v42  ;;  %v9033_v46 = vadd.f32 %v9032_v1, %v9031_v52 }
 0xb67   :  { %v7161_v12 = vadd.f32 %v7155_v50, %v6820_v47  ;;  %v7158_v53 = vadd.f32 %v9033_v46, %v9011_v20 }
 0xb69   :  { %v7162_v37 = vadd.f32 %v7158_v53, %v6821_v16 }
 0xb81   :  { %v9072_v10 = vpop.f32.mrb[208].mxu1 }
 0xb82   :  { %v9073_v31 = vpop.f32.mrb[209].mxu1 }
 0xb83   :  { %v9074_v24 = vadd.f32 %v9073_v31, %v9072_v10  ;;  %v9075_v28 = vpop.f32.mrb[210].mxu1 }
 0xb84   :  { %v9076_v8 = vpop.f32.mrb[211].mxu1 }
 0xb85   :  { %v7496_v17 = vadd.f32 %v9074_v24, %v9052_v3  ;;  %v9077_v22 = vadd.f32 %v9076_v8, %v9075_v28 }
 0xb87   :  { %v7502_v39 = vadd.f32 %v7496_v17, %v7161_v12  ;;  %v7499_v36 = vadd.f32 %v9077_v22, %v9055_v15 }
 0xb89   :  { %7504 = vst [vmem:[%s13537_s11] sm:$0xff] %v7502_v39  ;;  %v7503_v27 = vadd.f32 %v7499_v36, %v7162_v37 }
 0xb8b   :  { %7505 = vst [vmem:[%s13537_s11 + $0x8] sm:$0xff] %v7503_v27 }

</bundles_post_ra>
